<compile_context>
chip_gen: v7x
topology: tpu7x:2x2x1
jax: 0.10.0
libtpu: 0.0.40
codegen_flags: <defaults>
</compile_context>

<pallas_src>
import jax
import jax.numpy as jnp
from jax.experimental import pallas as pl
from jax.experimental.pallas import tpu as pltpu

_LRELU_SLOPE = 0.2
_BN_EPS = 1e-5
_VMEM_LIMIT_BYTES = 48 * 1024 * 1024      # below v7x's 64 MiB physical VMEM


def _round_up(x, m):
    return (x + m - 1) // m * m


def _choose_tm(m):
    # ~512-row M tiles keep the MXU fed and bound VMEM; shrink for tiny layers.
    return min(512, _round_up(m, 8))


def _compiler_params():
    return pltpu.CompilerParams(
        dimension_semantics=("parallel",),
        vmem_limit_bytes=_VMEM_LIMIT_BYTES)


# ------------------------------ kernels -------------------------------------

def _make_matmul_fused_kernel(use_bias, use_act, slope=_LRELU_SLOPE):
    """Fused conv-as-matmul (+bias) (+LeakyReLU) for one M tile."""
    if use_bias:
        def kernel(a_ref, w_ref, b_ref, o_ref):
            c = jnp.dot(a_ref[...], w_ref[...],
                        preferred_element_type=jnp.float32)
            c = c + b_ref[...]
            if use_act:
                c = jnp.where(c > 0, c, slope * c)
            o_ref[...] = c
    else:
        def kernel(a_ref, w_ref, o_ref):
            c = jnp.dot(a_ref[...], w_ref[...],
                        preferred_element_type=jnp.float32)
            if use_act:
                c = jnp.where(c > 0, c, slope * c)
            o_ref[...] = c
    return kernel


def _matmul_partial_stats_kernel(a_ref, w_ref, c_ref, stats_ref):
    """BN pass 1: matmul one M tile + per-tile partial channel sum / sum-sq.

    Conv layers feeding BN have no bias and zero-padded A rows produce exactly
    zero output rows, so they contribute nothing to the sums -- no row mask."""
    c = jnp.dot(a_ref[...], w_ref[...], preferred_element_type=jnp.float32)
    c_ref[...] = c
    s = jnp.sum(c, axis=0, keepdims=True)
    ss = jnp.sum(c * c, axis=0, keepdims=True)
    stats_ref[...] = jnp.concatenate([s, ss], axis=0)        # (2, Cp)


def _make_bn_act_kernel(m_valid, eps=_BN_EPS, slope=_LRELU_SLOPE):
    """BN pass 2: train-mode per-channel affine from global stats + LeakyReLU."""
    inv_m = 1.0 / float(m_valid)

    def kernel(c_ref, stats_ref, gamma_ref, beta_ref, o_ref):
        stats = stats_ref[...]                          # (2, Cp) f32
        mean = stats[0:1, :] * inv_m
        var = stats[1:2, :] * inv_m - mean * mean       # biased var (PyTorch BN)
        inv = jax.lax.rsqrt(var + eps)
        scale = gamma_ref[...] * inv
        shift = beta_ref[...] - mean * scale
        y = c_ref[...] * scale + shift
        o_ref[...] = jnp.where(y > 0, y, slope * y)

    return kernel


# --------------------------- per-layer wrappers ------------------------------

def _im2col_bf16(x_nhwc, kh, kw, stride, pad):
    """im2col in bf16 (plain-JAX glue); halves HBM traffic vs f32."""
    # TODO(synk): move patch extraction into the kernel (strided pl.ds reads on
    # the padded NHWC input held at memory_space=pl.ANY) to avoid materializing
    # the ~4x-expanded im2col matrix in HBM.
    n, h, w, cin = x_nhwc.shape
    oh = (h + 2 * pad - kh) // stride + 1
    ow = (w + 2 * pad - kw) // stride + 1
    xb = jnp.pad(x_nhwc.astype(jnp.bfloat16),
                 ((0, 0), (pad, pad), (pad, pad), (0, 0)))
    patches = []
    for i in range(kh):
        for j in range(kw):
            patches.append(xb[:, i:i + stride * oh:stride,
                               j:j + stride * ow:stride, :])
    cols = jnp.stack(patches, axis=3)                 # (N, OH, OW, KH*KW, Cin)
    return cols.reshape(n * oh * ow, kh * kw * cin), oh, ow


def _conv_fused_block(x_nhwc, wdict, meta, *, use_bias, use_act):
    """conv (+bias) (+LeakyReLU) as a single M-tiled Pallas matmul kernel."""
    A, oh, ow = _im2col_bf16(x_nhwc, meta["KH"], meta["KW"],
                             meta["stride"], meta["pad"])
    m, k = A.shape
    kp, cp, cout = meta["Kp"], meta["Cp"], meta["Cout"]
    tm = _choose_tm(m)
    mp = _round_up(m, tm)
    grid_m = mp // tm
    A_p = jnp.pad(A, ((0, mp - m), (0, kp - k)))

    in_specs = [pl.BlockSpec((tm, kp), lambda i: (i, 0)),     # A tile (pipelined)
                pl.BlockSpec((kp, cp), lambda i: (0, 0))]     # W resident
    args = [A_p, wdict["w_p"]]
    if use_bias:
        in_specs.append(pl.BlockSpec((1, cp), lambda i: (0, 0)))
        args.append(wdict["bias_p"])

    cost = pl.CostEstimate(
        flops=2 * m * k * cout, transcendentals=0,
        bytes_accessed=mp * kp * 2 + kp * cp * 2 + mp * cp * 4)

    out = pl.pallas_call(
        _make_matmul_fused_kernel(use_bias, use_act),
        out_shape=jax.ShapeDtypeStruct((mp, cp), jnp.float32),
        grid=(grid_m,),
        in_specs=in_specs,
        out_specs=pl.BlockSpec((tm, cp), lambda i: (i, 0)),
        compiler_params=_compiler_params(),
        cost_estimate=cost,
    )(*args)

    n = x_nhwc.shape[0]
    return out[:m, :cout].reshape(n, oh, ow, cout)


def _conv_bn_act_block(x_nhwc, wdict, meta):
    """conv + train-mode BatchNorm2d + LeakyReLU as two M-tiled Pallas passes."""
    A, oh, ow = _im2col_bf16(x_nhwc, meta["KH"], meta["KW"],
                             meta["stride"], meta["pad"])
    m, k = A.shape
    kp, cp, cout = meta["Kp"], meta["Cp"], meta["Cout"]
    tm = _choose_tm(m)
    mp = _round_up(m, tm)
    grid_m = mp // tm
    A_p = jnp.pad(A, ((0, mp - m), (0, kp - k)))

    # --- pass 1: matmul tiles + per-tile partial channel stats (parallel) ---
    cost1 = pl.CostEstimate(
        flops=2 * m * k * cout, transcendentals=0,
        bytes_accessed=mp * kp * 2 + kp * cp * 2 + (mp + 2 * grid_m) * cp * 4)

    c_p, part = pl.pallas_call(
        _matmul_partial_stats_kernel,
        out_shape=(jax.ShapeDtypeStruct((mp, cp), jnp.float32),
                   jax.ShapeDtypeStruct((grid_m, 2, cp), jnp.float32)),
        grid=(grid_m,),
        in_specs=[pl.BlockSpec((tm, kp), lambda i: (i, 0)),
                  pl.BlockSpec((kp, cp), lambda i: (0, 0))],
        out_specs=(pl.BlockSpec((tm, cp), lambda i: (i, 0)),
                   pl.BlockSpec((None, 2, cp), lambda i: (i, 0, 0))),
        compiler_params=_compiler_params(),
        cost_estimate=cost1,
    )(A_p, wdict["w_p"])

    # tiny glue: reduce per-tile partials to global per-channel sums (2, Cp).
    stats = jnp.sum(part, axis=0)

    # --- pass 2: BN affine + LeakyReLU per tile (parallel) ---
    cost2 = pl.CostEstimate(
        flops=4 * mp * cp, transcendentals=cp,
        bytes_accessed=2 * mp * cp * 4)

    out = pl.pallas_call(
        _make_bn_act_kernel(m),
        out_shape=jax.ShapeDtypeStruct((mp, cp), jnp.float32),
        grid=(grid_m,),
        in_specs=[pl.BlockSpec((tm, cp), lambda i: (i, 0)),
                  pl.BlockSpec((2, cp), lambda i: (0, 0)),
                  pl.BlockSpec((1, cp), lambda i: (0, 0)),
                  pl.BlockSpec((1, cp), lambda i: (0, 0))],
        out_specs=pl.BlockSpec((tm, cp), lambda i: (i, 0)),
        compiler_params=_compiler_params(),
        cost_estimate=cost2,
    )(c_p, stats, wdict["gamma_p"], wdict["beta_p"])

    n = x_nhwc.shape[0]
    return out[:m, :cout].reshape(n, oh, ow, cout)


# ------------------------------- parameters ----------------------------------

def init_params(key, num_features=8):
    nf = num_features
    ks = jax.random.split(key, 10)
    gain = 0.02
    return {
        "w1": gain * jax.random.normal(ks[0], (nf, 3, 4, 4), jnp.float32),
        "w2": gain * jax.random.normal(ks[1], (2 * nf, nf, 4, 4), jnp.float32),
        "g2": 1.0 + gain * jax.random.normal(ks[2], (2 * nf,), jnp.float32),
        "b2": jnp.zeros((2 * nf,), jnp.float32),
        "w3": gain * jax.random.normal(ks[3], (4 * nf, 2 * nf, 4, 4), jnp.float32),
        "g3": 1.0 + gain * jax.random.normal(ks[4], (4 * nf,), jnp.float32),
        "b3": jnp.zeros((4 * nf,), jnp.float32),
        "w4": gain * jax.random.normal(ks[5], (8 * nf, 4 * nf, 4, 4), jnp.float32),
        "g4": 1.0 + gain * jax.random.normal(ks[6], (8 * nf,), jnp.float32),
        "b4": jnp.zeros((8 * nf,), jnp.float32),
        "w5": gain * jax.random.normal(ks[7], (1, 8 * nf, 4, 4), jnp.float32),
        "bias5": gain * jax.random.normal(ks[8], (1,), jnp.float32),
    }


def prepare_params(raw):
    """One-time weight prep: (KH*KW*Cin, Cout) bf16 matrices zero-padded to
    (Kp, Cp); bias/gamma/beta as padded f32 rows.  Returns
    (weights: pytree of arrays, metas: static per-layer python info)."""

    def prep_conv(w_oihw, stride, pad, kind):
        cout, cin, kh, kw = w_oihw.shape
        k = kh * kw * cin
        kp, cp = _round_up(k, 128), _round_up(cout, 128)
        wm = jnp.transpose(w_oihw, (2, 3, 1, 0)).reshape(k, cout)
        w_p = jnp.zeros((kp, cp), jnp.bfloat16).at[:k, :cout].set(
            wm.astype(jnp.bfloat16))
        meta = dict(kind=kind, KH=kh, KW=kw, stride=stride, pad=pad,
                    K=k, Kp=kp, Cout=cout, Cp=cp)
        return w_p, meta

    def pad_row(v, cp):
        return jnp.pad(v.astype(jnp.float32), (0, cp - v.shape[0])).reshape(1, cp)

    weights, metas = [], []

    w_p, meta = prep_conv(raw["w1"], 2, 1, "conv_act")       # conv(3->nf)+LReLU
    weights.append(dict(w_p=w_p))
    metas.append(meta)

    for i in (2, 3, 4):                                      # conv + BN + LReLU
        w_p, meta = prep_conv(raw[f"w{i}"], 2, 1, "conv_bn_act")
        weights.append(dict(w_p=w_p,
                            gamma_p=pad_row(raw[f"g{i}"], meta["Cp"]),
                            beta_p=pad_row(raw[f"b{i}"], meta["Cp"])))
        metas.append(meta)

    w_p, meta = prep_conv(raw["w5"], 2, 0, "conv_bias")      # conv(8nf->1)+bias
    weights.append(dict(w_p=w_p, bias_p=pad_row(raw["bias5"], meta["Cp"])))
    metas.append(meta)

    return weights, tuple(metas)


def make_forward(metas):
    """Build a jitted forward closed over the static per-layer metadata."""

    @jax.jit
    def forward(weights, img_nchw):
        x = jnp.transpose(img_nchw, (0, 2, 3, 1)).astype(jnp.float32)  # NHWC
        for wdict, meta in zip(weights, metas):
            kind = meta["kind"]
            if kind == "conv_bn_act":
                x = _conv_bn_act_block(x, wdict, meta)
            elif kind == "conv_act":
                x = _conv_fused_block(x, wdict, meta,
                                      use_bias=False, use_act=True)
            else:  # "conv_bias": final 8nf->1 conv, with bias, no activation
                # (tiny M / Cout=1; launch-overhead bound at toy sizes -- kept
                #  in Pallas for completeness, could be dropped to plain JAX)
                x = _conv_fused_block(x, wdict, meta,
                                      use_bias=True, use_act=False)
        return jnp.transpose(x, (0, 3, 1, 2))                # NCHW, (N,1,1,1)

    return forward


# ------------------------------- reference -----------------------------------

def reference_forward(params, img_nchw):
    """Pure-JAX f32 reference (lax.conv) mirroring the PyTorch forward
    (train-mode BatchNorm)."""
    def conv(x, w, stride, pad, bias=None):
        y = jax.lax.conv_general_dilated(
            x, w, (stride, stride), [(pad, pad), (pad, pad)],
            dimension_numbers=("NCHW", "OIHW", "NCHW"),
            precision=jax.lax.Precision.HIGHEST)
        if bias is not None:
            y = y + bias[None, :, None, None]
        return y

    def bn(x, g, b, eps=_BN_EPS):
        mean = jnp.mean(x, axis=(0, 2, 3), keepdims=True)
        var = jnp.mean((x - mean) ** 2, axis=(0, 2, 3), keepdims=True)
        return (x - mean) * jax.lax.rsqrt(var + eps) * g[None, :, None, None] \
            + b[None, :, None, None]

    lrelu = lambda x: jnp.where(x > 0, x, _LRELU_SLOPE * x)

    x = lrelu(conv(img_nchw, params["w1"], 2, 1))
    x = lrelu(bn(conv(x, params["w2"], 2, 1), params["g2"], params["b2"]))
    x = lrelu(bn(conv(x, params["w3"], 2, 1), params["g3"], params["b3"]))
    x = lrelu(bn(conv(x, params["w4"], 2, 1), params["g4"], params["b4"]))
    x = conv(x, params["w5"], 2, 0, bias=params["bias5"])
    return x


if __name__ == "__main__":
    key = jax.random.PRNGKey(0)
    k_param, k_img = jax.random.split(key)

    num_features = 8                      # small stand-in for the default 64
    img = jax.random.normal(k_img, (2, 3, 64, 64), jnp.float32)  # N x 3 x 64 x 64
    params = init_params(k_param, num_features)

    weights, metas = prepare_params(params)        # one-time pad / bf16 cast
    forward = make_forward(metas)

    out = jax.block_until_ready(forward(weights, img))
    assert out.shape == (2, 1, 1, 1), out.shape

    ref = jax.block_until_ready(reference_forward(params, img))
    # bf16 MXU operands vs f32 HIGHEST-precision reference -> loosened tolerance.
    assert jnp.allclose(out, ref, rtol=5e-2, atol=5e-2), (out, ref)

    print("KERNEL_OK")
</pallas_src>

<mosaic_0001>
module attributes {stable_mosaic.version = 11 : i64} {
  func.func @kernel(%arg0: i32, %arg1: memref<512x128xbf16, #tpu.memory_space<vmem>>, %arg2: memref<128x128xbf16, #tpu.memory_space<vmem>>, %arg3: memref<512x128xf32, #tpu.memory_space<vmem>>) attributes {dimension_semantics = [#tpu.dimension_semantics<parallel>], iteration_bounds = array<i64: 4>, scalar_prefetch = 0 : i64, scratch_operands = 0 : i64, tpu.core_type = #tpu.core_type<tc>, window_params = [{transform_indices = @transform_0, window_bounds = array<i64: 512, 128>}, {pipeline_mode = #tpu.pipeline_mode<synchronous>, transform_indices = @transform_1, window_bounds = array<i64: 128, 128>}, {transform_indices = @transform_2, window_bounds = array<i64: 512, 128>}]} {
    %c0 = arith.constant 0 : index
    %c0_0 = arith.constant 0 : index
    %0 = vector.load %arg1[%c0, %c0_0] : memref<512x128xbf16, #tpu.memory_space<vmem>>, vector<512x128xbf16>
    %c0_1 = arith.constant 0 : index
    %c0_2 = arith.constant 0 : index
    %1 = vector.load %arg2[%c0_1, %c0_2] : memref<128x128xbf16, #tpu.memory_space<vmem>>, vector<128x128xbf16>
    %cst = arith.constant dense<0.000000e+00> : vector<512x128xf32>
    %2 = tpu.matmul %0, %1, %cst {dimension_numbers = #tpu.dot_dimension_numbers<[1], [0], [0], [1], [0, 0, 1, 1], [], []>} : vector<512x128xbf16>, vector<128x128xbf16>, vector<512x128xf32> -> vector<512x128xf32>
    %cst_3 = arith.constant 0.000000e+00 : f32
    %3 = vector.broadcast %cst_3 : f32 to vector<512x128xf32>
    %4 = arith.cmpf ogt, %2, %3 : vector<512x128xf32>
    %cst_4 = arith.constant 2.000000e-01 : f32
    %5 = vector.broadcast %cst_4 : f32 to vector<512x128xf32>
    %6 = arith.mulf %5, %2 : vector<512x128xf32>
    %7 = arith.select %4, %2, %6 : vector<512x128xi1>, vector<512x128xf32>
    %c0_5 = arith.constant 0 : index
    %c0_6 = arith.constant 0 : index
    %8 = vector.load %arg3[%c0_5, %c0_6] : memref<512x128xf32, #tpu.memory_space<vmem>>, vector<512x128xf32>
    tpu.vector_store %arg3[%c0_5, %c0_6], %7 {strides = array<i32>} : memref<512x128xf32, #tpu.memory_space<vmem>>, vector<512x128xf32>,
    return
  }
  func.func @transform_0(%arg0: i32) -> (i32, i32) {
    %c0_i32 = arith.constant 0 : i32
    %c0_i32_0 = arith.constant 0 : i32
    return %arg0, %c0_i32 : i32, i32
  }
  func.func @transform_1(%arg0: i32) -> (i32, i32) {
    %c0_i32 = arith.constant 0 : i32
    %c0_i32_0 = arith.constant 0 : i32
    %c0_i32_1 = arith.constant 0 : i32
    return %c0_i32, %c0_i32_0 : i32, i32
  }
  func.func @transform_2(%arg0: i32) -> (i32, i32) {
    %c0_i32 = arith.constant 0 : i32
    %c0_i32_0 = arith.constant 0 : i32
    return %arg0, %c0_i32 : i32, i32
  }
}

module attributes {stable_mosaic.version = 11 : i64} {
  func.func @_matmul_partial_stats_kernel(%arg0: i32, %arg1: memref<512x128xbf16, #tpu.memory_space<vmem>>, %arg2: memref<128x128xbf16, #tpu.memory_space<vmem>>, %arg3: memref<512x128xf32, #tpu.memory_space<vmem>>, %arg4: memref<1x2x128xf32, #tpu.memory_space<vmem>>) attributes {dimension_semantics = [#tpu.dimension_semantics<parallel>], iteration_bounds = array<i64: 1>, scalar_prefetch = 0 : i64, scratch_operands = 0 : i64, tpu.core_type = #tpu.core_type<tc>, window_params = [{transform_indices = @transform_0, window_bounds = array<i64: 512, 128>}, {pipeline_mode = #tpu.pipeline_mode<synchronous>, transform_indices = @transform_1, window_bounds = array<i64: 128, 128>}, {transform_indices = @transform_2, window_bounds = array<i64: 512, 128>}, {transform_indices = @transform_3, window_bounds = array<i64: 1, 2, 128>}]} {
    %c0 = arith.constant 0 : index
    %c0_0 = arith.constant 0 : index
    %0 = vector.load %arg1[%c0, %c0_0] : memref<512x128xbf16, #tpu.memory_space<vmem>>, vector<512x128xbf16>
    %c0_1 = arith.constant 0 : index
    %c0_2 = arith.constant 0 : index
    %1 = vector.load %arg2[%c0_1, %c0_2] : memref<128x128xbf16, #tpu.memory_space<vmem>>, vector<128x128xbf16>
    %cst = arith.constant dense<0.000000e+00> : vector<512x128xf32>
    %2 = tpu.matmul %0, %1, %cst {dimension_numbers = #tpu.dot_dimension_numbers<[1], [0], [0], [1], [0, 0, 1, 1], [], []>} : vector<512x128xbf16>, vector<128x128xbf16>, vector<512x128xf32> -> vector<512x128xf32>
    %c0_3 = arith.constant 0 : index
    %c0_4 = arith.constant 0 : index
    %3 = vector.load %arg3[%c0_3, %c0_4] : memref<512x128xf32, #tpu.memory_space<vmem>>, vector<512x128xf32>
    tpu.vector_store %arg3[%c0_3, %c0_4], %2 {strides = array<i32>} : memref<512x128xf32, #tpu.memory_space<vmem>>, vector<512x128xf32>,
    %cst_5 = arith.constant dense<0.000000e+00> : vector<128xf32>
    %4 = vector.multi_reduction <add>, %2, %cst_5 [0] : vector<512x128xf32> to vector<128xf32>
    %5 = vector.shape_cast %4 : vector<128xf32> to vector<1x128xf32>
    %6 = arith.mulf %2, %2 : vector<512x128xf32>
    %cst_6 = arith.constant dense<0.000000e+00> : vector<128xf32>
    %7 = vector.multi_reduction <add>, %6, %cst_6 [0] : vector<512x128xf32> to vector<128xf32>
    %8 = vector.shape_cast %7 : vector<128xf32> to vector<1x128xf32>
    %9 = tpu.concatenate %5, %8 in 0 : vector<1x128xf32>, vector<1x128xf32> -> vector<2x128xf32>
    %c0_7 = arith.constant 0 : index
    %c0_8 = arith.constant 0 : index
    %c0_9 = arith.constant 0 : index
    %10 = vector.load %arg4[%c0_7, %c0_8, %c0_9] : memref<1x2x128xf32, #tpu.memory_space<vmem>>, vector<1x2x128xf32>
    %11 = vector.shape_cast %10 : vector<1x2x128xf32> to vector<2x128xf32>
    %12 = vector.shape_cast %9 : vector<2x128xf32> to vector<1x2x128xf32>
    tpu.vector_store %arg4[%c0_7, %c0_8, %c0_9], %12 {strides = array<i32>} : memref<1x2x128xf32, #tpu.memory_space<vmem>>, vector<1x2x128xf32>,
    return
  }
  func.func @transform_0(%arg0: i32) -> (i32, i32) {
    %c0_i32 = arith.constant 0 : i32
    %c0_i32_0 = arith.constant 0 : i32
    return %arg0, %c0_i32 : i32, i32
  }
  func.func @transform_1(%arg0: i32) -> (i32, i32) {
    %c0_i32 = arith.constant 0 : i32
    %c0_i32_0 = arith.constant 0 : i32
    %c0_i32_1 = arith.constant 0 : i32
    return %c0_i32, %c0_i32_0 : i32, i32
  }
  func.func @transform_2(%arg0: i32) -> (i32, i32) {
    %c0_i32 = arith.constant 0 : i32
    %c0_i32_0 = arith.constant 0 : i32
    return %arg0, %c0_i32 : i32, i32
  }
  func.func @transform_3(%arg0: i32) -> (i32, i32, i32) {
    %c0_i32 = arith.constant 0 : i32
    %c0_i32_0 = arith.constant 0 : i32
    %c0_i32_1 = arith.constant 0 : i32
    return %arg0, %c0_i32, %c0_i32_0 : i32, i32, i32
  }
}

module attributes {stable_mosaic.version = 11 : i64} {
  func.func @kernel(%arg0: i32, %arg1: memref<512x128xf32, #tpu.memory_space<vmem>>, %arg2: memref<2x128xf32, #tpu.memory_space<vmem>>, %arg3: memref<1x128xf32, #tpu.memory_space<vmem>>, %arg4: memref<1x128xf32, #tpu.memory_space<vmem>>, %arg5: memref<512x128xf32, #tpu.memory_space<vmem>>) attributes {dimension_semantics = [#tpu.dimension_semantics<parallel>], iteration_bounds = array<i64: 1>, scalar_prefetch = 0 : i64, scratch_operands = 0 : i64, tpu.core_type = #tpu.core_type<tc>, window_params = [{transform_indices = @transform_0, window_bounds = array<i64: 512, 128>}, {pipeline_mode = #tpu.pipeline_mode<synchronous>, transform_indices = @transform_1, window_bounds = array<i64: 2, 128>}, {pipeline_mode = #tpu.pipeline_mode<synchronous>, transform_indices = @transform_2, window_bounds = array<i64: 1, 128>}, {pipeline_mode = #tpu.pipeline_mode<synchronous>, transform_indices = @transform_3, window_bounds = array<i64: 1, 128>}, {transform_indices = @transform_4, window_bounds = array<i64: 512, 128>}]} {
    %c0 = arith.constant 0 : index
    %c0_0 = arith.constant 0 : index
    %0 = vector.load %arg2[%c0, %c0_0] : memref<2x128xf32, #tpu.memory_space<vmem>>, vector<2x128xf32>
    %1 = vector.extract_strided_slice %0 {offsets = [0, 0], sizes = [1, 128], strides = [1, 1]} : vector<2x128xf32> to vector<1x128xf32>
    %cst = arith.constant 0.001953125 : f32
    %2 = vector.broadcast %cst : f32 to vector<1x128xf32>
    %3 = arith.mulf %1, %2 : vector<1x128xf32>
    %4 = vector.extract_strided_slice %0 {offsets = [1, 0], sizes = [1, 128], strides = [1, 1]} : vector<2x128xf32> to vector<1x128xf32>
    %cst_1 = arith.constant 0.001953125 : f32
    %5 = vector.broadcast %cst_1 : f32 to vector<1x128xf32>
    %6 = arith.mulf %4, %5 : vector<1x128xf32>
    %7 = arith.mulf %3, %3 : vector<1x128xf32>
    %8 = arith.subf %6, %7 : vector<1x128xf32>
    %cst_2 = arith.constant 9.99999974E-6 : f32
    %9 = vector.broadcast %cst_2 : f32 to vector<1x128xf32>
    %10 = arith.addf %8, %9 : vector<1x128xf32>
    %11 = math.rsqrt %10 : vector<1x128xf32>
    %c0_3 = arith.constant 0 : index
    %c0_4 = arith.constant 0 : index
    %12 = vector.load %arg3[%c0_3, %c0_4] : memref<1x128xf32, #tpu.memory_space<vmem>>, vector<1x128xf32>
    %13 = arith.mulf %12, %11 : vector<1x128xf32>
    %c0_5 = arith.constant 0 : index
    %c0_6 = arith.constant 0 : index
    %14 = vector.load %arg4[%c0_5, %c0_6] : memref<1x128xf32, #tpu.memory_space<vmem>>, vector<1x128xf32>
    %15 = arith.mulf %3, %13 : vector<1x128xf32>
    %16 = arith.subf %14, %15 : vector<1x128xf32>
    %c0_7 = arith.constant 0 : index
    %c0_8 = arith.constant 0 : index
    %17 = vector.load %arg1[%c0_7, %c0_8] : memref<512x128xf32, #tpu.memory_space<vmem>>, vector<512x128xf32>
    %18 = vector.broadcast %13 : vector<1x128xf32> to vector<512x128xf32>
    %19 = arith.mulf %17, %18 : vector<512x128xf32>
    %20 = vector.broadcast %16 : vector<1x128xf32> to vector<512x128xf32>
    %21 = arith.addf %19, %20 : vector<512x128xf32>
    %cst_9 = arith.constant 0.000000e+00 : f32
    %22 = vector.broadcast %cst_9 : f32 to vector<512x128xf32>
    %23 = arith.cmpf ogt, %21, %22 : vector<512x128xf32>
    %cst_10 = arith.constant 2.000000e-01 : f32
    %24 = vector.broadcast %cst_10 : f32 to vector<512x128xf32>
    %25 = arith.mulf %24, %21 : vector<512x128xf32>
    %26 = arith.select %23, %21, %25 : vector<512x128xi1>, vector<512x128xf32>
    %c0_11 = arith.constant 0 : index
    %c0_12 = arith.constant 0 : index
    %27 = vector.load %arg5[%c0_11, %c0_12] : memref<512x128xf32, #tpu.memory_space<vmem>>, vector<512x128xf32>
    tpu.vector_store %arg5[%c0_11, %c0_12], %26 {strides = array<i32>} : memref<512x128xf32, #tpu.memory_space<vmem>>, vector<512x128xf32>,
    return
  }
  func.func @transform_0(%arg0: i32) -> (i32, i32) {
    %c0_i32 = arith.constant 0 : i32
    %c0_i32_0 = arith.constant 0 : i32
    return %arg0, %c0_i32 : i32, i32
  }
  func.func @transform_1(%arg0: i32) -> (i32, i32) {
    %c0_i32 = arith.constant 0 : i32
    %c0_i32_0 = arith.constant 0 : i32
    %c0_i32_1 = arith.constant 0 : i32
    return %c0_i32, %c0_i32_0 : i32, i32
  }
  func.func @transform_2(%arg0: i32) -> (i32, i32) {
    %c0_i32 = arith.constant 0 : i32
    %c0_i32_0 = arith.constant 0 : i32
    %c0_i32_1 = arith.constant 0 : i32
    return %c0_i32, %c0_i32_0 : i32, i32
  }
  func.func @transform_3(%arg0: i32) -> (i32, i32) {
    %c0_i32 = arith.constant 0 : i32
    %c0_i32_0 = arith.constant 0 : i32
    %c0_i32_1 = arith.constant 0 : i32
    return %c0_i32, %c0_i32_0 : i32, i32
  }
  func.func @transform_4(%arg0: i32) -> (i32, i32) {
    %c0_i32 = arith.constant 0 : i32
    %c0_i32_0 = arith.constant 0 : i32
    return %arg0, %c0_i32 : i32, i32
  }
}

module attributes {stable_mosaic.version = 11 : i64} {
  func.func @_matmul_partial_stats_kernel(%arg0: i32, %arg1: memref<128x256xbf16, #tpu.memory_space<vmem>>, %arg2: memref<256x128xbf16, #tpu.memory_space<vmem>>, %arg3: memref<128x128xf32, #tpu.memory_space<vmem>>, %arg4: memref<1x2x128xf32, #tpu.memory_space<vmem>>) attributes {dimension_semantics = [#tpu.dimension_semantics<parallel>], iteration_bounds = array<i64: 1>, scalar_prefetch = 0 : i64, scratch_operands = 0 : i64, tpu.core_type = #tpu.core_type<tc>, window_params = [{transform_indices = @transform_0, window_bounds = array<i64: 128, 256>}, {pipeline_mode = #tpu.pipeline_mode<synchronous>, transform_indices = @transform_1, window_bounds = array<i64: 256, 128>}, {transform_indices = @transform_2, window_bounds = array<i64: 128, 128>}, {transform_indices = @transform_3, window_bounds = array<i64: 1, 2, 128>}]} {
    %c0 = arith.constant 0 : index
    %c0_0 = arith.constant 0 : index
    %0 = vector.load %arg1[%c0, %c0_0] : memref<128x256xbf16, #tpu.memory_space<vmem>>, vector<128x256xbf16>
    %c0_1 = arith.constant 0 : index
    %c0_2 = arith.constant 0 : index
    %1 = vector.load %arg2[%c0_1, %c0_2] : memref<256x128xbf16, #tpu.memory_space<vmem>>, vector<256x128xbf16>
    %cst = arith.constant dense<0.000000e+00> : vector<128x128xf32>
    %2 = tpu.matmul %0, %1, %cst {dimension_numbers = #tpu.dot_dimension_numbers<[1], [0], [0], [1], [0, 0, 1, 1], [], []>} : vector<128x256xbf16>, vector<256x128xbf16>, vector<128x128xf32> -> vector<128x128xf32>
    %c0_3 = arith.constant 0 : index
    %c0_4 = arith.constant 0 : index
    %3 = vector.load %arg3[%c0_3, %c0_4] : memref<128x128xf32, #tpu.memory_space<vmem>>, vector<128x128xf32>
    tpu.vector_store %arg3[%c0_3, %c0_4], %2 {strides = array<i32>} : memref<128x128xf32, #tpu.memory_space<vmem>>, vector<128x128xf32>,
    %cst_5 = arith.constant dense<0.000000e+00> : vector<128xf32>
    %4 = vector.multi_reduction <add>, %2, %cst_5 [0] : vector<128x128xf32> to vector<128xf32>
    %5 = vector.shape_cast %4 : vector<128xf32> to vector<1x128xf32>
    %6 = arith.mulf %2, %2 : vector<128x128xf32>
    %cst_6 = arith.constant dense<0.000000e+00> : vector<128xf32>
    %7 = vector.multi_reduction <add>, %6, %cst_6 [0] : vector<128x128xf32> to vector<128xf32>
    %8 = vector.shape_cast %7 : vector<128xf32> to vector<1x128xf32>
    %9 = tpu.concatenate %5, %8 in 0 : vector<1x128xf32>, vector<1x128xf32> -> vector<2x128xf32>
    %c0_7 = arith.constant 0 : index
    %c0_8 = arith.constant 0 : index
    %c0_9 = arith.constant 0 : index
    %10 = vector.load %arg4[%c0_7, %c0_8, %c0_9] : memref<1x2x128xf32, #tpu.memory_space<vmem>>, vector<1x2x128xf32>
    %11 = vector.shape_cast %10 : vector<1x2x128xf32> to vector<2x128xf32>
    %12 = vector.shape_cast %9 : vector<2x128xf32> to vector<1x2x128xf32>
    tpu.vector_store %arg4[%c0_7, %c0_8, %c0_9], %12 {strides = array<i32>} : memref<1x2x128xf32, #tpu.memory_space<vmem>>, vector<1x2x128xf32>,
    return
  }
  func.func @transform_0(%arg0: i32) -> (i32, i32) {
    %c0_i32 = arith.constant 0 : i32
    %c0_i32_0 = arith.constant 0 : i32
    return %arg0, %c0_i32 : i32, i32
  }
  func.func @transform_1(%arg0: i32) -> (i32, i32) {
    %c0_i32 = arith.constant 0 : i32
    %c0_i32_0 = arith.constant 0 : i32
    %c0_i32_1 = arith.constant 0 : i32
    return %c0_i32, %c0_i32_0 : i32, i32
  }
  func.func @transform_2(%arg0: i32) -> (i32, i32) {
    %c0_i32 = arith.constant 0 : i32
    %c0_i32_0 = arith.constant 0 : i32
    return %arg0, %c0_i32 : i32, i32
  }
  func.func @transform_3(%arg0: i32) -> (i32, i32, i32) {
    %c0_i32 = arith.constant 0 : i32
    %c0_i32_0 = arith.constant 0 : i32
    %c0_i32_1 = arith.constant 0 : i32
    return %arg0, %c0_i32, %c0_i32_0 : i32, i32, i32
  }
}

module attributes {stable_mosaic.version = 11 : i64} {
  func.func @kernel(%arg0: i32, %arg1: memref<128x128xf32, #tpu.memory_space<vmem>>, %arg2: memref<2x128xf32, #tpu.memory_space<vmem>>, %arg3: memref<1x128xf32, #tpu.memory_space<vmem>>, %arg4: memref<1x128xf32, #tpu.memory_space<vmem>>, %arg5: memref<128x128xf32, #tpu.memory_space<vmem>>) attributes {dimension_semantics = [#tpu.dimension_semantics<parallel>], iteration_bounds = array<i64: 1>, scalar_prefetch = 0 : i64, scratch_operands = 0 : i64, tpu.core_type = #tpu.core_type<tc>, window_params = [{transform_indices = @transform_0, window_bounds = array<i64: 128, 128>}, {pipeline_mode = #tpu.pipeline_mode<synchronous>, transform_indices = @transform_1, window_bounds = array<i64: 2, 128>}, {pipeline_mode = #tpu.pipeline_mode<synchronous>, transform_indices = @transform_2, window_bounds = array<i64: 1, 128>}, {pipeline_mode = #tpu.pipeline_mode<synchronous>, transform_indices = @transform_3, window_bounds = array<i64: 1, 128>}, {transform_indices = @transform_4, window_bounds = array<i64: 128, 128>}]} {
    %c0 = arith.constant 0 : index
    %c0_0 = arith.constant 0 : index
    %0 = vector.load %arg2[%c0, %c0_0] : memref<2x128xf32, #tpu.memory_space<vmem>>, vector<2x128xf32>
    %1 = vector.extract_strided_slice %0 {offsets = [0, 0], sizes = [1, 128], strides = [1, 1]} : vector<2x128xf32> to vector<1x128xf32>
    %cst = arith.constant 7.812500e-03 : f32
    %2 = vector.broadcast %cst : f32 to vector<1x128xf32>
    %3 = arith.mulf %1, %2 : vector<1x128xf32>
    %4 = vector.extract_strided_slice %0 {offsets = [1, 0], sizes = [1, 128], strides = [1, 1]} : vector<2x128xf32> to vector<1x128xf32>
    %cst_1 = arith.constant 7.812500e-03 : f32
    %5 = vector.broadcast %cst_1 : f32 to vector<1x128xf32>
    %6 = arith.mulf %4, %5 : vector<1x128xf32>
    %7 = arith.mulf %3, %3 : vector<1x128xf32>
    %8 = arith.subf %6, %7 : vector<1x128xf32>
    %cst_2 = arith.constant 9.99999974E-6 : f32
    %9 = vector.broadcast %cst_2 : f32 to vector<1x128xf32>
    %10 = arith.addf %8, %9 : vector<1x128xf32>
    %11 = math.rsqrt %10 : vector<1x128xf32>
    %c0_3 = arith.constant 0 : index
    %c0_4 = arith.constant 0 : index
    %12 = vector.load %arg3[%c0_3, %c0_4] : memref<1x128xf32, #tpu.memory_space<vmem>>, vector<1x128xf32>
    %13 = arith.mulf %12, %11 : vector<1x128xf32>
    %c0_5 = arith.constant 0 : index
    %c0_6 = arith.constant 0 : index
    %14 = vector.load %arg4[%c0_5, %c0_6] : memref<1x128xf32, #tpu.memory_space<vmem>>, vector<1x128xf32>
    %15 = arith.mulf %3, %13 : vector<1x128xf32>
    %16 = arith.subf %14, %15 : vector<1x128xf32>
    %c0_7 = arith.constant 0 : index
    %c0_8 = arith.constant 0 : index
    %17 = vector.load %arg1[%c0_7, %c0_8] : memref<128x128xf32, #tpu.memory_space<vmem>>, vector<128x128xf32>
    %18 = vector.broadcast %13 : vector<1x128xf32> to vector<128x128xf32>
    %19 = arith.mulf %17, %18 : vector<128x128xf32>
    %20 = vector.broadcast %16 : vector<1x128xf32> to vector<128x128xf32>
    %21 = arith.addf %19, %20 : vector<128x128xf32>
    %cst_9 = arith.constant 0.000000e+00 : f32
    %22 = vector.broadcast %cst_9 : f32 to vector<128x128xf32>
    %23 = arith.cmpf ogt, %21, %22 : vector<128x128xf32>
    %cst_10 = arith.constant 2.000000e-01 : f32
    %24 = vector.broadcast %cst_10 : f32 to vector<128x128xf32>
    %25 = arith.mulf %24, %21 : vector<128x128xf32>
    %26 = arith.select %23, %21, %25 : vector<128x128xi1>, vector<128x128xf32>
    %c0_11 = arith.constant 0 : index
    %c0_12 = arith.constant 0 : index
    %27 = vector.load %arg5[%c0_11, %c0_12] : memref<128x128xf32, #tpu.memory_space<vmem>>, vector<128x128xf32>
    tpu.vector_store %arg5[%c0_11, %c0_12], %26 {strides = array<i32>} : memref<128x128xf32, #tpu.memory_space<vmem>>, vector<128x128xf32>,
    return
  }
  func.func @transform_0(%arg0: i32) -> (i32, i32) {
    %c0_i32 = arith.constant 0 : i32
    %c0_i32_0 = arith.constant 0 : i32
    return %arg0, %c0_i32 : i32, i32
  }
  func.func @transform_1(%arg0: i32) -> (i32, i32) {
    %c0_i32 = arith.constant 0 : i32
    %c0_i32_0 = arith.constant 0 : i32
    %c0_i32_1 = arith.constant 0 : i32
    return %c0_i32, %c0_i32_0 : i32, i32
  }
  func.func @transform_2(%arg0: i32) -> (i32, i32) {
    %c0_i32 = arith.constant 0 : i32
    %c0_i32_0 = arith.constant 0 : i32
    %c0_i32_1 = arith.constant 0 : i32
    return %c0_i32, %c0_i32_0 : i32, i32
  }
  func.func @transform_3(%arg0: i32) -> (i32, i32) {
    %c0_i32 = arith.constant 0 : i32
    %c0_i32_0 = arith.constant 0 : i32
    %c0_i32_1 = arith.constant 0 : i32
    return %c0_i32, %c0_i32_0 : i32, i32
  }
  func.func @transform_4(%arg0: i32) -> (i32, i32) {
    %c0_i32 = arith.constant 0 : i32
    %c0_i32_0 = arith.constant 0 : i32
    return %arg0, %c0_i32 : i32, i32
  }
}

module attributes {stable_mosaic.version = 11 : i64} {
  func.func @_matmul_partial_stats_kernel(%arg0: i32, %arg1: memref<32x512xbf16, #tpu.memory_space<vmem>>, %arg2: memref<512x128xbf16, #tpu.memory_space<vmem>>, %arg3: memref<32x128xf32, #tpu.memory_space<vmem>>, %arg4: memref<1x2x128xf32, #tpu.memory_space<vmem>>) attributes {dimension_semantics = [#tpu.dimension_semantics<parallel>], iteration_bounds = array<i64: 1>, scalar_prefetch = 0 : i64, scratch_operands = 0 : i64, tpu.core_type = #tpu.core_type<tc>, window_params = [{transform_indices = @transform_0, window_bounds = array<i64: 32, 512>}, {pipeline_mode = #tpu.pipeline_mode<synchronous>, transform_indices = @transform_1, window_bounds = array<i64: 512, 128>}, {transform_indices = @transform_2, window_bounds = array<i64: 32, 128>}, {transform_indices = @transform_3, window_bounds = array<i64: 1, 2, 128>}]} {
    %c0 = arith.constant 0 : index
    %c0_0 = arith.constant 0 : index
    %0 = vector.load %arg1[%c0, %c0_0] : memref<32x512xbf16, #tpu.memory_space<vmem>>, vector<32x512xbf16>
    %c0_1 = arith.constant 0 : index
    %c0_2 = arith.constant 0 : index
    %1 = vector.load %arg2[%c0_1, %c0_2] : memref<512x128xbf16, #tpu.memory_space<vmem>>, vector<512x128xbf16>
    %cst = arith.constant dense<0.000000e+00> : vector<32x128xf32>
    %2 = tpu.matmul %0, %1, %cst {dimension_numbers = #tpu.dot_dimension_numbers<[1], [0], [0], [1], [0, 0, 1, 1], [], []>} : vector<32x512xbf16>, vector<512x128xbf16>, vector<32x128xf32> -> vector<32x128xf32>
    %c0_3 = arith.constant 0 : index
    %c0_4 = arith.constant 0 : index
    %3 = vector.load %arg3[%c0_3, %c0_4] : memref<32x128xf32, #tpu.memory_space<vmem>>, vector<32x128xf32>
    tpu.vector_store %arg3[%c0_3, %c0_4], %2 {strides = array<i32>} : memref<32x128xf32, #tpu.memory_space<vmem>>, vector<32x128xf32>,
    %cst_5 = arith.constant dense<0.000000e+00> : vector<128xf32>
    %4 = vector.multi_reduction <add>, %2, %cst_5 [0] : vector<32x128xf32> to vector<128xf32>
    %5 = vector.shape_cast %4 : vector<128xf32> to vector<1x128xf32>
    %6 = arith.mulf %2, %2 : vector<32x128xf32>
    %cst_6 = arith.constant dense<0.000000e+00> : vector<128xf32>
    %7 = vector.multi_reduction <add>, %6, %cst_6 [0] : vector<32x128xf32> to vector<128xf32>
    %8 = vector.shape_cast %7 : vector<128xf32> to vector<1x128xf32>
    %9 = tpu.concatenate %5, %8 in 0 : vector<1x128xf32>, vector<1x128xf32> -> vector<2x128xf32>
    %c0_7 = arith.constant 0 : index
    %c0_8 = arith.constant 0 : index
    %c0_9 = arith.constant 0 : index
    %10 = vector.load %arg4[%c0_7, %c0_8, %c0_9] : memref<1x2x128xf32, #tpu.memory_space<vmem>>, vector<1x2x128xf32>
    %11 = vector.shape_cast %10 : vector<1x2x128xf32> to vector<2x128xf32>
    %12 = vector.shape_cast %9 : vector<2x128xf32> to vector<1x2x128xf32>
    tpu.vector_store %arg4[%c0_7, %c0_8, %c0_9], %12 {strides = array<i32>} : memref<1x2x128xf32, #tpu.memory_space<vmem>>, vector<1x2x128xf32>,
    return
  }
  func.func @transform_0(%arg0: i32) -> (i32, i32) {
    %c0_i32 = arith.constant 0 : i32
    %c0_i32_0 = arith.constant 0 : i32
    return %arg0, %c0_i32 : i32, i32
  }
  func.func @transform_1(%arg0: i32) -> (i32, i32) {
    %c0_i32 = arith.constant 0 : i32
    %c0_i32_0 = arith.constant 0 : i32
    %c0_i32_1 = arith.constant 0 : i32
    return %c0_i32, %c0_i32_0 : i32, i32
  }
  func.func @transform_2(%arg0: i32) -> (i32, i32) {
    %c0_i32 = arith.constant 0 : i32
    %c0_i32_0 = arith.constant 0 : i32
    return %arg0, %c0_i32 : i32, i32
  }
  func.func @transform_3(%arg0: i32) -> (i32, i32, i32) {
    %c0_i32 = arith.constant 0 : i32
    %c0_i32_0 = arith.constant 0 : i32
    %c0_i32_1 = arith.constant 0 : i32
    return %arg0, %c0_i32, %c0_i32_0 : i32, i32, i32
  }
}

module attributes {stable_mosaic.version = 11 : i64} {
  func.func @kernel(%arg0: i32, %arg1: memref<32x128xf32, #tpu.memory_space<vmem>>, %arg2: memref<2x128xf32, #tpu.memory_space<vmem>>, %arg3: memref<1x128xf32, #tpu.memory_space<vmem>>, %arg4: memref<1x128xf32, #tpu.memory_space<vmem>>, %arg5: memref<32x128xf32, #tpu.memory_space<vmem>>) attributes {dimension_semantics = [#tpu.dimension_semantics<parallel>], iteration_bounds = array<i64: 1>, scalar_prefetch = 0 : i64, scratch_operands = 0 : i64, tpu.core_type = #tpu.core_type<tc>, window_params = [{transform_indices = @transform_0, window_bounds = array<i64: 32, 128>}, {pipeline_mode = #tpu.pipeline_mode<synchronous>, transform_indices = @transform_1, window_bounds = array<i64: 2, 128>}, {pipeline_mode = #tpu.pipeline_mode<synchronous>, transform_indices = @transform_2, window_bounds = array<i64: 1, 128>}, {pipeline_mode = #tpu.pipeline_mode<synchronous>, transform_indices = @transform_3, window_bounds = array<i64: 1, 128>}, {transform_indices = @transform_4, window_bounds = array<i64: 32, 128>}]} {
    %c0 = arith.constant 0 : index
    %c0_0 = arith.constant 0 : index
    %0 = vector.load %arg2[%c0, %c0_0] : memref<2x128xf32, #tpu.memory_space<vmem>>, vector<2x128xf32>
    %1 = vector.extract_strided_slice %0 {offsets = [0, 0], sizes = [1, 128], strides = [1, 1]} : vector<2x128xf32> to vector<1x128xf32>
    %cst = arith.constant 3.125000e-02 : f32
    %2 = vector.broadcast %cst : f32 to vector<1x128xf32>
    %3 = arith.mulf %1, %2 : vector<1x128xf32>
    %4 = vector.extract_strided_slice %0 {offsets = [1, 0], sizes = [1, 128], strides = [1, 1]} : vector<2x128xf32> to vector<1x128xf32>
    %cst_1 = arith.constant 3.125000e-02 : f32
    %5 = vector.broadcast %cst_1 : f32 to vector<1x128xf32>
    %6 = arith.mulf %4, %5 : vector<1x128xf32>
    %7 = arith.mulf %3, %3 : vector<1x128xf32>
    %8 = arith.subf %6, %7 : vector<1x128xf32>
    %cst_2 = arith.constant 9.99999974E-6 : f32
    %9 = vector.broadcast %cst_2 : f32 to vector<1x128xf32>
    %10 = arith.addf %8, %9 : vector<1x128xf32>
    %11 = math.rsqrt %10 : vector<1x128xf32>
    %c0_3 = arith.constant 0 : index
    %c0_4 = arith.constant 0 : index
    %12 = vector.load %arg3[%c0_3, %c0_4] : memref<1x128xf32, #tpu.memory_space<vmem>>, vector<1x128xf32>
    %13 = arith.mulf %12, %11 : vector<1x128xf32>
    %c0_5 = arith.constant 0 : index
    %c0_6 = arith.constant 0 : index
    %14 = vector.load %arg4[%c0_5, %c0_6] : memref<1x128xf32, #tpu.memory_space<vmem>>, vector<1x128xf32>
    %15 = arith.mulf %3, %13 : vector<1x128xf32>
    %16 = arith.subf %14, %15 : vector<1x128xf32>
    %c0_7 = arith.constant 0 : index
    %c0_8 = arith.constant 0 : index
    %17 = vector.load %arg1[%c0_7, %c0_8] : memref<32x128xf32, #tpu.memory_space<vmem>>, vector<32x128xf32>
    %18 = vector.broadcast %13 : vector<1x128xf32> to vector<32x128xf32>
    %19 = arith.mulf %17, %18 : vector<32x128xf32>
    %20 = vector.broadcast %16 : vector<1x128xf32> to vector<32x128xf32>
    %21 = arith.addf %19, %20 : vector<32x128xf32>
    %cst_9 = arith.constant 0.000000e+00 : f32
    %22 = vector.broadcast %cst_9 : f32 to vector<32x128xf32>
    %23 = arith.cmpf ogt, %21, %22 : vector<32x128xf32>
    %cst_10 = arith.constant 2.000000e-01 : f32
    %24 = vector.broadcast %cst_10 : f32 to vector<32x128xf32>
    %25 = arith.mulf %24, %21 : vector<32x128xf32>
    %26 = arith.select %23, %21, %25 : vector<32x128xi1>, vector<32x128xf32>
    %c0_11 = arith.constant 0 : index
    %c0_12 = arith.constant 0 : index
    %27 = vector.load %arg5[%c0_11, %c0_12] : memref<32x128xf32, #tpu.memory_space<vmem>>, vector<32x128xf32>
    tpu.vector_store %arg5[%c0_11, %c0_12], %26 {strides = array<i32>} : memref<32x128xf32, #tpu.memory_space<vmem>>, vector<32x128xf32>,
    return
  }
  func.func @transform_0(%arg0: i32) -> (i32, i32) {
    %c0_i32 = arith.constant 0 : i32
    %c0_i32_0 = arith.constant 0 : i32
    return %arg0, %c0_i32 : i32, i32
  }
  func.func @transform_1(%arg0: i32) -> (i32, i32) {
    %c0_i32 = arith.constant 0 : i32
    %c0_i32_0 = arith.constant 0 : i32
    %c0_i32_1 = arith.constant 0 : i32
    return %c0_i32, %c0_i32_0 : i32, i32
  }
  func.func @transform_2(%arg0: i32) -> (i32, i32) {
    %c0_i32 = arith.constant 0 : i32
    %c0_i32_0 = arith.constant 0 : i32
    %c0_i32_1 = arith.constant 0 : i32
    return %c0_i32, %c0_i32_0 : i32, i32
  }
  func.func @transform_3(%arg0: i32) -> (i32, i32) {
    %c0_i32 = arith.constant 0 : i32
    %c0_i32_0 = arith.constant 0 : i32
    %c0_i32_1 = arith.constant 0 : i32
    return %c0_i32, %c0_i32_0 : i32, i32
  }
  func.func @transform_4(%arg0: i32) -> (i32, i32) {
    %c0_i32 = arith.constant 0 : i32
    %c0_i32_0 = arith.constant 0 : i32
    return %arg0, %c0_i32 : i32, i32
  }
}

module attributes {stable_mosaic.version = 11 : i64} {
  func.func @kernel(%arg0: i32, %arg1: memref<8x1024xbf16, #tpu.memory_space<vmem>>, %arg2: memref<1024x128xbf16, #tpu.memory_space<vmem>>, %arg3: memref<1x128xf32, #tpu.memory_space<vmem>>, %arg4: memref<8x128xf32, #tpu.memory_space<vmem>>) attributes {dimension_semantics = [#tpu.dimension_semantics<parallel>], iteration_bounds = array<i64: 1>, scalar_prefetch = 0 : i64, scratch_operands = 0 : i64, tpu.core_type = #tpu.core_type<tc>, window_params = [{transform_indices = @transform_0, window_bounds = array<i64: 8, 1024>}, {pipeline_mode = #tpu.pipeline_mode<synchronous>, transform_indices = @transform_1, window_bounds = array<i64: 1024, 128>}, {pipeline_mode = #tpu.pipeline_mode<synchronous>, transform_indices = @transform_2, window_bounds = array<i64: 1, 128>}, {transform_indices = @transform_3, window_bounds = array<i64: 8, 128>}]} {
    %c0 = arith.constant 0 : index
    %c0_0 = arith.constant 0 : index
    %0 = vector.load %arg1[%c0, %c0_0] : memref<8x1024xbf16, #tpu.memory_space<vmem>>, vector<8x1024xbf16>
    %c0_1 = arith.constant 0 : index
    %c0_2 = arith.constant 0 : index
    %1 = vector.load %arg2[%c0_1, %c0_2] : memref<1024x128xbf16, #tpu.memory_space<vmem>>, vector<1024x128xbf16>
    %cst = arith.constant dense<0.000000e+00> : vector<8x128xf32>
    %2 = tpu.matmul %0, %1, %cst {dimension_numbers = #tpu.dot_dimension_numbers<[1], [0], [0], [1], [0, 0, 1, 1], [], []>} : vector<8x1024xbf16>, vector<1024x128xbf16>, vector<8x128xf32> -> vector<8x128xf32>
    %c0_3 = arith.constant 0 : index
    %c0_4 = arith.constant 0 : index
    %3 = vector.load %arg3[%c0_3, %c0_4] : memref<1x128xf32, #tpu.memory_space<vmem>>, vector<1x128xf32>
    %4 = vector.broadcast %3 : vector<1x128xf32> to vector<8x128xf32>
    %5 = arith.addf %2, %4 : vector<8x128xf32>
    %c0_5 = arith.constant 0 : index
    %c0_6 = arith.constant 0 : index
    %6 = vector.load %arg4[%c0_5, %c0_6] : memref<8x128xf32, #tpu.memory_space<vmem>>, vector<8x128xf32>
    tpu.vector_store %arg4[%c0_5, %c0_6], %5 {strides = array<i32>} : memref<8x128xf32, #tpu.memory_space<vmem>>, vector<8x128xf32>,
    return
  }
  func.func @transform_0(%arg0: i32) -> (i32, i32) {
    %c0_i32 = arith.constant 0 : i32
    %c0_i32_0 = arith.constant 0 : i32
    return %arg0, %c0_i32 : i32, i32
  }
  func.func @transform_1(%arg0: i32) -> (i32, i32) {
    %c0_i32 = arith.constant 0 : i32
    %c0_i32_0 = arith.constant 0 : i32
    %c0_i32_1 = arith.constant 0 : i32
    return %c0_i32, %c0_i32_0 : i32, i32
  }
  func.func @transform_2(%arg0: i32) -> (i32, i32) {
    %c0_i32 = arith.constant 0 : i32
    %c0_i32_0 = arith.constant 0 : i32
    %c0_i32_1 = arith.constant 0 : i32
    return %c0_i32, %c0_i32_0 : i32, i32
  }
  func.func @transform_3(%arg0: i32) -> (i32, i32) {
    %c0_i32 = arith.constant 0 : i32
    %c0_i32_0 = arith.constant 0 : i32
    return %arg0, %c0_i32 : i32, i32
  }
}

</mosaic_0001>

<bundles_post_ra>
// kernel: forward.8
= control target key start
LH: loop header
LB: loop body
LE: loop exit
PB: predicated region body
PF: predicated region fallthrough
CT: control target
= control target key end

     0   :  { %s1327_s9 = smov 0   ;;  %s1472_s0 = inlined_call_operand.vmem [shape: bf16[2048,128], index: 0, kind: input, shape index: {}]   ;;  %s1473_s1 = inlined_call_operand.vmem [shape: bf16[128,128], index: 1, kind: input, shape index: {}]   ;;  %s1474_s2 = inlined_call_operand.vmem [shape: f32[2048,128], index: 2, kind: output, shape index: {}]  }
   0x1 LB: > { %s1069_s10 = sadd.s32 4294967295, %s1310_s9   ;;  %p1073_p0 = scmp.ge.s32.totalorder %s1310_s9, 1  ;;  %s1310_s9 = sphi %s1327_s9, %s12_s9  }
   0x2   : > { %p113_p1 = scmp.lt.s32.totalorder %s1310_s9, 5 }
   0x4   : > { %p114_p2 = pnand %p1073_p0, %p113_p1 }
   0x5   : > { %v1264_v0 = vld [vmem:[%s1473_s1] sm:$0xff] (!%p114_p2)   ;;  %s1074_s13 = sshll.u32 (!%p114_p2), %s1069_s10, 6  ;;  %v1265_v1 = vld [vmem:[%s1473_s1 + $0x8] sm:$0xff] (!%p114_p2)   ;;  %v1266_v2 = vld [vmem:[%s1473_s1 + $0x10] sm:$0xff] (!%p114_p2)  }
   0x6   : > { %117 = sbr.rel (%p114_p2) target bundleno = 316 (0x13c), region = 28  ;;  %p136_p3 = scmp.lt.s32.totalorder (!%p114_p2), %s1074_s13, 255  ;;  %1160 = vmatprep.subr.bf16.mxu0 (!%p114_p2), %v1264_v0  ;;  %1240 = vmatprep.subr.bf16.mxu1 (!%p114_p2), %v1264_v0  ;;  %v1267_v3 = vld [vmem:[%s1473_s1 + $0x18] sm:$0xff] (!%p114_p2)   ;;  %v1268_v6 = vld [vmem:[%s1473_s1 + $0x20] sm:$0xff] (!%p114_p2)   ;;  %v1269_v7 = vld [vmem:[%s1473_s1 + $0x28] sm:$0xff] (!%p114_p2)  }
   0x7   : > { %1161 = vmatpush3.bf16.msra.mxu0 (!%p114_p2), %v1264_v0  ;;  %1248 = vmatpush3.bf16.msra.mxu1 (!%p114_p2), %v1264_v0  ;;  %v1270_v8 = vld [vmem:[%s1473_s1 + $0x30] sm:$0xff] (!%p114_p2)   ;;  %v1271_v9 = vld [vmem:[%s1473_s1 + $0x38] sm:$0xff] (!%p114_p2)  }
   0x8   : > { %1162 = vmatprep.subr.bf16.mxu0 (!%p114_p2), %v1265_v1  ;;  %1241 = vmatprep.subr.bf16.mxu1 (!%p114_p2), %v1265_v1 }
   0xb   : > { %1163 = vmatpush3.bf16.msra.mxu0 (!%p114_p2), %v1265_v1  ;;  %1249 = vmatpush3.bf16.msra.mxu1 (!%p114_p2), %v1265_v1 }
   0xc   : > { %1164 = vmatprep.subr.bf16.mxu0 (!%p114_p2), %v1266_v2  ;;  %1242 = vmatprep.subr.bf16.mxu1 (!%p114_p2), %v1266_v2 }
   0xd   : > { %s1476_s13 = smov (!%p136_p3, %s1074_s13), 255 }
   0xe   : > { %s1075_s18 = sshll.u32 %s1476_s13, 2  ;;  %s1077_s4 = sshll.u32 %s1476_s13, 3 }
   0xf   : > { %s1350_s21 = scalar_lea.vmem %s1472_s0, %s1075_s18  ;;  %1165 = vmatpush3.bf16.msra.mxu0 %v1266_v2  ;;  %1250 = vmatpush3.bf16.msra.mxu1 %v1266_v2  ;;  %s1403_s7 = scalar_lea.vmem %s1474_s2, %s1077_s4 }
  0x10   : > { %v1272_v4 = vld [vmem:[%s1350_s21] sm:$0xff]   ;;  %1166 = vmatprep.subr.bf16.mxu0 %v1267_v3  ;;  %1243 = vmatprep.subr.bf16.mxu1 %v1267_v3  ;;  %v1274_v10 = vld [vmem:[%s1350_s21 + $0x8] sm:$0xff]   ;;  %v1276_v12 = vld [vmem:[%s1350_s21 + $0x10] sm:$0xff]  }
  0x11   : > { %v1273_v5 = vld [vmem:[%s1350_s21 + $0x80] sm:$0xff]   ;;  %1176 = vmatprep.mubr.bf16.mxu0 %v1272_v4  ;;  %v1275_v11 = vld [vmem:[%s1350_s21 + $0x88] sm:$0xff]   ;;  %v1277_v13 = vld [vmem:[%s1350_s21 + $0x90] sm:$0xff]  }
  0x12   : > { %1208 = vmatprep.mubr.bf16.mxu1 %v1273_v5  ;;  %v1278_v14 = vld [vmem:[%s1350_s21 + $0x18] sm:$0xff]   ;;  %v1280_v16 = vld [vmem:[%s1350_s21 + $0x20] sm:$0xff]   ;;  %v1282_v18 = vld [vmem:[%s1350_s21 + $0x28] sm:$0xff]  }
  0x13   : > { %1167 = vmatpush3.bf16.msra.mxu0 %v1267_v3  ;;  %1251 = vmatpush3.bf16.msra.mxu1 %v1267_v3  ;;  %v1279_v15 = vld [vmem:[%s1350_s21 + $0x98] sm:$0xff]   ;;  %v1281_v17 = vld [vmem:[%s1350_s21 + $0xa0] sm:$0xff]   ;;  %v1283_v19 = vld [vmem:[%s1350_s21 + $0xa8] sm:$0xff]  }
  0x14   : > { %1168 = vmatprep.subr.bf16.mxu0 %v1268_v6  ;;  %1244 = vmatprep.subr.bf16.mxu1 %v1268_v6  ;;  %v1284_v20 = vld [vmem:[%s1350_s21 + $0x30] sm:$0xff]   ;;  %v1286_v22 = vld [vmem:[%s1350_s21 + $0x38] sm:$0xff]   ;;  %v1288_v24 = vld [vmem:[%s1350_s21 + $0x40] sm:$0xff]  }
  0x15   : > { %v1285_v21 = vld [vmem:[%s1350_s21 + $0xb0] sm:$0xff]   ;;  %v1287_v23 = vld [vmem:[%s1350_s21 + $0xb8] sm:$0xff]   ;;  %v1289_v25 = vld [vmem:[%s1350_s21 + $0xc0] sm:$0xff]  }
  0x16   : > { %v1290_v26 = vld [vmem:[%s1350_s21 + $0x48] sm:$0xff]   ;;  %v1292_v28 = vld [vmem:[%s1350_s21 + $0x50] sm:$0xff]   ;;  %v1294_v30 = vld [vmem:[%s1350_s21 + $0x58] sm:$0xff]  }
  0x17   : > { %1169 = vmatpush3.bf16.msra.mxu0 %v1268_v6  ;;  %1252 = vmatpush3.bf16.msra.mxu1 %v1268_v6  ;;  %v1291_v27 = vld [vmem:[%s1350_s21 + $0xc8] sm:$0xff]   ;;  %v1293_v29 = vld [vmem:[%s1350_s21 + $0xd0] sm:$0xff]   ;;  %v1295_v31 = vld [vmem:[%s1350_s21 + $0xd8] sm:$0xff]  }
  0x18   : > { %1170 = vmatprep.subr.bf16.mxu0 %v1269_v7  ;;  %1245 = vmatprep.subr.bf16.mxu1 %v1269_v7  ;;  %v1296_v32 = vld [vmem:[%s1350_s21 + $0x60] sm:$0xff]   ;;  %v1298_v34 = vld [vmem:[%s1350_s21 + $0x68] sm:$0xff]   ;;  %v1300_v36 = vld [vmem:[%s1350_s21 + $0x70] sm:$0xff]  }
  0x19   : > { %v1297_v33 = vld [vmem:[%s1350_s21 + $0xe0] sm:$0xff]   ;;  %v1299_v35 = vld [vmem:[%s1350_s21 + $0xe8] sm:$0xff]   ;;  %v1301_v37 = vld [vmem:[%s1350_s21 + $0xf0] sm:$0xff]  }
  0x1a   : > { %v1302_v38 = vld [vmem:[%s1350_s21 + $0x78] sm:$0xff]  }
  0x1b   : > { %1171 = vmatpush3.bf16.msra.mxu0 %v1269_v7  ;;  %1253 = vmatpush3.bf16.msra.mxu1 %v1269_v7  ;;  %v1303_v39 = vld [vmem:[%s1350_s21 + $0xf8] sm:$0xff]  }
  0x1c   : > { %1172 = vmatprep.subr.bf16.mxu0 %v1270_v8  ;;  %1246 = vmatprep.subr.bf16.mxu1 %v1270_v8 }
  0x1f   : > { %1173 = vmatpush3.bf16.msra.mxu0 %v1270_v8  ;;  %1254 = vmatpush3.bf16.msra.mxu1 %v1270_v8 }
  0x20   : > { %1174 = vmatprep.subr.bf16.mxu0 %v1271_v9  ;;  %1247 = vmatprep.subr.bf16.mxu1 %v1271_v9 }
  0x23   : > { %1175 = vmatpush3.bf16.msra.mxu0 %v1271_v9  ;;  %1255 = vmatpush3.bf16.msra.mxu1 %v1271_v9 }
  0x26   : > { %1177 = vmatmul.mubr.bf16.vlgmr.msra.gmra.mrb[0].mxu0 %v1274_v10  ;;  %1209 = vmatmul.mubr.bf16.vlgmr.msra.gmra.mrb[0].mxu1 %v1275_v11 }
  0x27   : > { %1180 = vmatprep.mubr.bf16.mxu0 %v1276_v12  ;;  %1212 = vmatprep.mubr.bf16.mxu1 %v1277_v13 }
  0x2e   : > { %1181 = vmatmul.mubr.bf16.gmra.mrb[4].mxu0 %v1278_v14  ;;  %1213 = vmatmul.mubr.bf16.gmra.mrb[4].mxu1 %v1279_v15 }
  0x2f   : > { %1184 = vmatprep.mubr.bf16.mxu0 %v1280_v16  ;;  %1216 = vmatprep.mubr.bf16.mxu1 %v1281_v17 }
  0x36   : > { %1185 = vmatmul.mubr.bf16.gmra.mrb[8].mxu0 %v1282_v18  ;;  %1217 = vmatmul.mubr.bf16.gmra.mrb[8].mxu1 %v1283_v19 }
  0x37   : > { %1188 = vmatprep.mubr.bf16.mxu0 %v1284_v20  ;;  %1220 = vmatprep.mubr.bf16.mxu1 %v1285_v21 }
  0x3e   : > { %1189 = vmatmul.mubr.bf16.gmra.mrb[12].mxu0 %v1286_v22  ;;  %1221 = vmatmul.mubr.bf16.gmra.mrb[12].mxu1 %v1287_v23 }
  0x3f   : > { %1192 = vmatprep.mubr.bf16.mxu0 %v1288_v24  ;;  %1224 = vmatprep.mubr.bf16.mxu1 %v1289_v25 }
  0x46   : > { %1193 = vmatmul.mubr.bf16.gmra.mrb[16].mxu0 %v1290_v26  ;;  %1225 = vmatmul.mubr.bf16.gmra.mrb[16].mxu1 %v1291_v27 }
  0x47   : > { %1196 = vmatprep.mubr.bf16.mxu0 %v1292_v28  ;;  %1228 = vmatprep.mubr.bf16.mxu1 %v1293_v29 }
  0x4e   : > { %1197 = vmatmul.mubr.bf16.gmra.mrb[20].mxu0 %v1294_v30  ;;  %1229 = vmatmul.mubr.bf16.gmra.mrb[20].mxu1 %v1295_v31 }
  0x4f   : > { %1200 = vmatprep.mubr.bf16.mxu0 %v1296_v32  ;;  %1232 = vmatprep.mubr.bf16.mxu1 %v1297_v33 }
  0x56   : > { %1201 = vmatmul.mubr.bf16.gmra.mrb[24].mxu0 %v1298_v34  ;;  %1233 = vmatmul.mubr.bf16.gmra.mrb[24].mxu1 %v1299_v35 }
  0x57   : > { %1204 = vmatprep.mubr.bf16.mxu0 %v1300_v36  ;;  %1236 = vmatprep.mubr.bf16.mxu1 %v1301_v37 }
  0x5e   : > { %1205 = vmatmul.mubr.bf16.gmra.mrb[28].mxu0 %v1302_v38  ;;  %1237 = vmatmul.mubr.bf16.gmra.mrb[28].mxu1 %v1303_v39 }
  0xf9   : > { %v1178_v40 = vpop.f32.mrb[0].mxu0  ;;  %v1210_v41 = vpop.f32.mrb[0].mxu1 }
  0xfa   : > { %vm759_vm0 = vcmp.gt.f32.partialorder %v1178_v40, 0.0  ;;  %v823_v42 = vmul.f32 0.2, %v1178_v40  ;;  %vm791_vm1 = vcmp.gt.f32.partialorder %v1210_v41, 0.0  ;;  %v855_v43 = vmul.f32 0.2, %v1210_v41 }
  0xfb   : > { %v502_v44 = vpop.f32.mrb[1].mxu0  ;;  %v630_v45 = vpop.f32.mrb[1].mxu1 }
  0xfc   : > { %v887_v46 = vsel %vm759_vm0, %v1178_v40, %v823_v42  ;;  %v919_v47 = vsel %vm791_vm1, %v1210_v41, %v855_v43  ;;  %vm757_vm2 = vcmp.gt.f32.partialorder %v502_v44, 0.0  ;;  %v821_v48 = vmul.f32 0.2, %v502_v44  ;;  %v1179_v49 = vpop.f32.mrb[2].mxu0  ;;  %v1211_v50 = vpop.f32.mrb[2].mxu1 }
  0xfd   : > { %951 = vst [vmem:[%s1403_s7 + $0x10] sm:$0xff] %v887_v46  ;;  %983 = vst [vmem:[%s1403_s7 + $0x110] sm:$0xff] %v919_v47  ;;  %vm789_vm3 = vcmp.gt.f32.partialorder %v630_v45, 0.0  ;;  %v853_v51 = vmul.f32 0.2, %v630_v45  ;;  %vm760_vm4 = vcmp.gt.f32.partialorder %v1179_v49, 0.0 }
  0xfe   : > { %v824_v52 = vmul.f32 0.2, %v1179_v49  ;;  %v885_v53 = vsel %vm757_vm2, %v502_v44, %v821_v48  ;;  %vm792_vm5 = vcmp.gt.f32.partialorder %v1211_v50, 0.0  ;;  %v856_v54 = vmul.f32 0.2, %v1211_v50  ;;  %v505_v55 = vpop.f32.mrb[3].mxu0 }
  0xff   : > { %v633_v56 = vpop.f32.mrb[3].mxu1  ;;  %949 = vst [vmem:[%s1403_s7] sm:$0xff] %v885_v53  ;;  %v917_v57 = vsel %vm789_vm3, %v630_v45, %v853_v51  ;;  %vm758_vm6 = vcmp.gt.f32.partialorder %v505_v55, 0.0  ;;  %v822_v59 = vmul.f32 0.2, %v505_v55 }
 0x100   : > { %v888_v58 = vsel %vm760_vm4, %v1179_v49, %v824_v52  ;;  %981 = vst [vmem:[%s1403_s7 + $0x100] sm:$0xff] %v917_v57  ;;  %v920_v60 = vsel %vm792_vm5, %v1211_v50, %v856_v54  ;;  %vm790_vm7 = vcmp.gt.f32.partialorder %v633_v56, 0.0  ;;  %v854_v61 = vmul.f32 0.2, %v633_v56 }
 0x101   : > { %952 = vst [vmem:[%s1403_s7 + $0x18] sm:$0xff] %v888_v58  ;;  %984 = vst [vmem:[%s1403_s7 + $0x118] sm:$0xff] %v920_v60  ;;  %v886_v62 = vsel %vm758_vm6, %v505_v55, %v822_v59  ;;  %v1182_v63 = vpop.f32.mrb[4].mxu0  ;;  %v1214_v0 = vpop.f32.mrb[4].mxu1 }
 0x102   : > { %950 = vst [vmem:[%s1403_s7 + $0x8] sm:$0xff] %v886_v62  ;;  %v918_v1 = vsel %vm790_vm7, %v633_v56, %v854_v61  ;;  %vm763_vm8 = vcmp.gt.f32.partialorder %v1182_v63, 0.0  ;;  %v827_v2 = vmul.f32 0.2, %v1182_v63  ;;  %vm795_vm9 = vcmp.gt.f32.partialorder %v1214_v0, 0.0  ;;  %v518_v3 = vpop.f32.mrb[5].mxu0 }
 0x103   : > { %v646_v4 = vpop.f32.mrb[5].mxu1  ;;  %982 = vst [vmem:[%s1403_s7 + $0x108] sm:$0xff] %v918_v1  ;;  %v859_v5 = vmul.f32 0.2, %v1214_v0  ;;  %vm761_vm10 = vcmp.gt.f32.partialorder %v518_v3, 0.0  ;;  %v1183_v9 = vpop.f32.mrb[6].mxu0 }
 0x104   : > { %v825_v6 = vmul.f32 0.2, %v518_v3  ;;  %vm793_vm11 = vcmp.gt.f32.partialorder %v646_v4, 0.0  ;;  %v891_v7 = vsel %vm763_vm8, %v1182_v63, %v827_v2  ;;  %v857_v8 = vmul.f32 0.2, %v646_v4  ;;  %v1215_v10 = vpop.f32.mrb[6].mxu1 }
 0x105   : > { %955 = vst [vmem:[%s1403_s7 + $0x30] sm:$0xff] %v891_v7  ;;  %v923_v11 = vsel %vm795_vm9, %v1214_v0, %v859_v5  ;;  %vm764_vm12 = vcmp.gt.f32.partialorder %v1183_v9, 0.0  ;;  %v828_v13 = vmul.f32 0.2, %v1183_v9  ;;  %v521_v14 = vpop.f32.mrb[7].mxu0  ;;  %v649_v15 = vpop.f32.mrb[7].mxu1 }
 0x106   : > { %v889_v12 = vsel %vm761_vm10, %v518_v3, %v825_v6  ;;  %987 = vst [vmem:[%s1403_s7 + $0x130] sm:$0xff] %v923_v11  ;;  %v921_v16 = vsel %vm793_vm11, %v646_v4, %v857_v8  ;;  %vm796_vm13 = vcmp.gt.f32.partialorder %v1215_v10, 0.0  ;;  %v860_v17 = vmul.f32 0.2, %v1215_v10 }
 0x107   : > { %953 = vst [vmem:[%s1403_s7 + $0x20] sm:$0xff] %v889_v12  ;;  %vm762_vm14 = vcmp.gt.f32.partialorder %v521_v14, 0.0  ;;  %985 = vst [vmem:[%s1403_s7 + $0x120] sm:$0xff] %v921_v16  ;;  %v892_v18 = vsel %vm764_vm12, %v1183_v9, %v828_v13  ;;  %v826_v19 = vmul.f32 0.2, %v521_v14  ;;  %vm794_vm15 = vcmp.gt.f32.partialorder %v649_v15, 0.0 }
 0x108   : > { %v858_v20 = vmul.f32 0.2, %v649_v15  ;;  %956 = vst [vmem:[%s1403_s7 + $0x38] sm:$0xff] %v892_v18  ;;  %v924_v21 = vsel %vm796_vm13, %v1215_v10, %v860_v17 }
 0x109   : > { %988 = vst [vmem:[%s1403_s7 + $0x138] sm:$0xff] %v924_v21  ;;  %v890_v22 = vsel %vm762_vm14, %v521_v14, %v826_v19  ;;  %v1186_v24 = vpop.f32.mrb[8].mxu0  ;;  %v1218_v25 = vpop.f32.mrb[8].mxu1 }
 0x10a   : > { %v922_v23 = vsel %vm794_vm15, %v649_v15, %v858_v20  ;;  %954 = vst [vmem:[%s1403_s7 + $0x28] sm:$0xff] %v890_v22  ;;  %vm767_vm0 = vcmp.gt.f32.partialorder %v1186_v24, 0.0  ;;  %v831_v26 = vmul.f32 0.2, %v1186_v24  ;;  %vm799_vm1 = vcmp.gt.f32.partialorder %v1218_v25, 0.0  ;;  %v534_v28 = vpop.f32.mrb[9].mxu0 }
 0x10b   : > { %986 = vst [vmem:[%s1403_s7 + $0x128] sm:$0xff] %v922_v23  ;;  %v863_v27 = vmul.f32 0.2, %v1218_v25  ;;  %v662_v29 = vpop.f32.mrb[9].mxu1  ;;  %vm765_vm2 = vcmp.gt.f32.partialorder %v534_v28, 0.0  ;;  %v1187_v33 = vpop.f32.mrb[10].mxu0 }
 0x10c   : > { %v895_v30 = vsel %vm767_vm0, %v1186_v24, %v831_v26  ;;  %v829_v32 = vmul.f32 0.2, %v534_v28  ;;  %v1219_v34 = vpop.f32.mrb[10].mxu1  ;;  %vm797_vm3 = vcmp.gt.f32.partialorder %v662_v29, 0.0  ;;  %v861_v35 = vmul.f32 0.2, %v662_v29 }
 0x10d   : > { %v927_v31 = vsel %vm799_vm1, %v1218_v25, %v863_v27  ;;  %959 = vst [vmem:[%s1403_s7 + $0x50] sm:$0xff] %v895_v30  ;;  %vm768_vm4 = vcmp.gt.f32.partialorder %v1187_v33, 0.0  ;;  %v832_v36 = vmul.f32 0.2, %v1187_v33  ;;  %vm800_vm5 = vcmp.gt.f32.partialorder %v1219_v34, 0.0  ;;  %v537_v39 = vpop.f32.mrb[11].mxu0 }
 0x10e   : > { %991 = vst [vmem:[%s1403_s7 + $0x150] sm:$0xff] %v927_v31  ;;  %v893_v37 = vsel %vm765_vm2, %v534_v28, %v829_v32  ;;  %v864_v38 = vmul.f32 0.2, %v1219_v34  ;;  %v665_v40 = vpop.f32.mrb[11].mxu1  ;;  %v925_v41 = vsel %vm797_vm3, %v662_v29, %v861_v35  ;;  %vm766_vm6 = vcmp.gt.f32.partialorder %v537_v39, 0.0 }
 0x10f   : > { %957 = vst [vmem:[%s1403_s7 + $0x40] sm:$0xff] %v893_v37  ;;  %v896_v42 = vsel %vm768_vm4, %v1187_v33, %v832_v36  ;;  %v830_v43 = vmul.f32 0.2, %v537_v39  ;;  %989 = vst [vmem:[%s1403_s7 + $0x140] sm:$0xff] %v925_v41  ;;  %vm798_vm7 = vcmp.gt.f32.partialorder %v665_v40, 0.0 }
 0x110   : > { %960 = vst [vmem:[%s1403_s7 + $0x58] sm:$0xff] %v896_v42  ;;  %v928_v44 = vsel %vm800_vm5, %v1219_v34, %v864_v38  ;;  %v862_v45 = vmul.f32 0.2, %v665_v40 }
 0x111   : > { %992 = vst [vmem:[%s1403_s7 + $0x158] sm:$0xff] %v928_v44  ;;  %v894_v46 = vsel %vm766_vm6, %v537_v39, %v830_v43  ;;  %v1190_v47 = vpop.f32.mrb[12].mxu0  ;;  %v1222_v48 = vpop.f32.mrb[12].mxu1 }
 0x112   : > { %958 = vst [vmem:[%s1403_s7 + $0x48] sm:$0xff] %v894_v46  ;;  %v926_v49 = vsel %vm798_vm7, %v665_v40, %v862_v45  ;;  %vm771_vm8 = vcmp.gt.f32.partialorder %v1190_v47, 0.0  ;;  %v835_v50 = vmul.f32 0.2, %v1190_v47  ;;  %vm803_vm9 = vcmp.gt.f32.partialorder %v1222_v48, 0.0  ;;  %v550_v51 = vpop.f32.mrb[13].mxu0 }
 0x113   : > { %v678_v52 = vpop.f32.mrb[13].mxu1  ;;  %990 = vst [vmem:[%s1403_s7 + $0x148] sm:$0xff] %v926_v49  ;;  %v867_v53 = vmul.f32 0.2, %v1222_v48  ;;  %vm769_vm10 = vcmp.gt.f32.partialorder %v550_v51, 0.0  ;;  %v1191_v57 = vpop.f32.mrb[14].mxu0 }
 0x114   : > { %v833_v54 = vmul.f32 0.2, %v550_v51  ;;  %vm801_vm11 = vcmp.gt.f32.partialorder %v678_v52, 0.0  ;;  %v899_v55 = vsel %vm771_vm8, %v1190_v47, %v835_v50  ;;  %v865_v56 = vmul.f32 0.2, %v678_v52  ;;  %v1223_v58 = vpop.f32.mrb[14].mxu1 }
 0x115   : > { %963 = vst [vmem:[%s1403_s7 + $0x70] sm:$0xff] %v899_v55  ;;  %v931_v59 = vsel %vm803_vm9, %v1222_v48, %v867_v53  ;;  %vm772_vm12 = vcmp.gt.f32.partialorder %v1191_v57, 0.0  ;;  %v836_v61 = vmul.f32 0.2, %v1191_v57  ;;  %v553_v62 = vpop.f32.mrb[15].mxu0  ;;  %v681_v63 = vpop.f32.mrb[15].mxu1 }
 0x116   : > { %v897_v60 = vsel %vm769_vm10, %v550_v51, %v833_v54  ;;  %995 = vst [vmem:[%s1403_s7 + $0x170] sm:$0xff] %v931_v59  ;;  %v929_v0 = vsel %vm801_vm11, %v678_v52, %v865_v56  ;;  %vm804_vm13 = vcmp.gt.f32.partialorder %v1223_v58, 0.0  ;;  %v868_v1 = vmul.f32 0.2, %v1223_v58 }
 0x117   : > { %961 = vst [vmem:[%s1403_s7 + $0x60] sm:$0xff] %v897_v60  ;;  %vm770_vm14 = vcmp.gt.f32.partialorder %v553_v62, 0.0  ;;  %993 = vst [vmem:[%s1403_s7 + $0x160] sm:$0xff] %v929_v0  ;;  %v900_v2 = vsel %vm772_vm12, %v1191_v57, %v836_v61  ;;  %v834_v3 = vmul.f32 0.2, %v553_v62  ;;  %vm802_vm15 = vcmp.gt.f32.partialorder %v681_v63, 0.0 }
 0x118   : > { %v866_v4 = vmul.f32 0.2, %v681_v63  ;;  %964 = vst [vmem:[%s1403_s7 + $0x78] sm:$0xff] %v900_v2  ;;  %v932_v5 = vsel %vm804_vm13, %v1223_v58, %v868_v1 }
 0x119   : > { %996 = vst [vmem:[%s1403_s7 + $0x178] sm:$0xff] %v932_v5  ;;  %v898_v6 = vsel %vm770_vm14, %v553_v62, %v834_v3  ;;  %v1194_v8 = vpop.f32.mrb[16].mxu0  ;;  %v1226_v9 = vpop.f32.mrb[16].mxu1 }
 0x11a   : > { %v930_v7 = vsel %vm802_vm15, %v681_v63, %v866_v4  ;;  %962 = vst [vmem:[%s1403_s7 + $0x68] sm:$0xff] %v898_v6  ;;  %vm775_vm0 = vcmp.gt.f32.partialorder %v1194_v8, 0.0  ;;  %v839_v10 = vmul.f32 0.2, %v1194_v8  ;;  %vm807_vm1 = vcmp.gt.f32.partialorder %v1226_v9, 0.0  ;;  %v566_v12 = vpop.f32.mrb[17].mxu0 }
 0x11b   : > { %994 = vst [vmem:[%s1403_s7 + $0x168] sm:$0xff] %v930_v7  ;;  %v871_v11 = vmul.f32 0.2, %v1226_v9  ;;  %v694_v13 = vpop.f32.mrb[17].mxu1  ;;  %vm773_vm2 = vcmp.gt.f32.partialorder %v566_v12, 0.0  ;;  %v1195_v17 = vpop.f32.mrb[18].mxu0 }
 0x11c   : > { %v903_v14 = vsel %vm775_vm0, %v1194_v8, %v839_v10  ;;  %v837_v16 = vmul.f32 0.2, %v566_v12  ;;  %v1227_v18 = vpop.f32.mrb[18].mxu1  ;;  %vm805_vm3 = vcmp.gt.f32.partialorder %v694_v13, 0.0  ;;  %v869_v19 = vmul.f32 0.2, %v694_v13 }
 0x11d   : > { %v935_v15 = vsel %vm807_vm1, %v1226_v9, %v871_v11  ;;  %967 = vst [vmem:[%s1403_s7 + $0x90] sm:$0xff] %v903_v14  ;;  %vm776_vm4 = vcmp.gt.f32.partialorder %v1195_v17, 0.0  ;;  %v840_v20 = vmul.f32 0.2, %v1195_v17  ;;  %vm808_vm5 = vcmp.gt.f32.partialorder %v1227_v18, 0.0  ;;  %v569_v23 = vpop.f32.mrb[19].mxu0 }
 0x11e   : > { %999 = vst [vmem:[%s1403_s7 + $0x190] sm:$0xff] %v935_v15  ;;  %v901_v21 = vsel %vm773_vm2, %v566_v12, %v837_v16  ;;  %v872_v22 = vmul.f32 0.2, %v1227_v18  ;;  %v697_v24 = vpop.f32.mrb[19].mxu1  ;;  %v933_v25 = vsel %vm805_vm3, %v694_v13, %v869_v19  ;;  %vm774_vm6 = vcmp.gt.f32.partialorder %v569_v23, 0.0 }
 0x11f   : > { %965 = vst [vmem:[%s1403_s7 + $0x80] sm:$0xff] %v901_v21  ;;  %v904_v26 = vsel %vm776_vm4, %v1195_v17, %v840_v20  ;;  %v838_v27 = vmul.f32 0.2, %v569_v23  ;;  %997 = vst [vmem:[%s1403_s7 + $0x180] sm:$0xff] %v933_v25  ;;  %vm806_vm7 = vcmp.gt.f32.partialorder %v697_v24, 0.0 }
 0x120   : > { %968 = vst [vmem:[%s1403_s7 + $0x98] sm:$0xff] %v904_v26  ;;  %v936_v28 = vsel %vm808_vm5, %v1227_v18, %v872_v22  ;;  %v870_v29 = vmul.f32 0.2, %v697_v24 }
 0x121   : > { %1000 = vst [vmem:[%s1403_s7 + $0x198] sm:$0xff] %v936_v28  ;;  %v902_v30 = vsel %vm774_vm6, %v569_v23, %v838_v27  ;;  %v1198_v31 = vpop.f32.mrb[20].mxu0  ;;  %v1230_v32 = vpop.f32.mrb[20].mxu1 }
 0x122   : > { %966 = vst [vmem:[%s1403_s7 + $0x88] sm:$0xff] %v902_v30  ;;  %v934_v33 = vsel %vm806_vm7, %v697_v24, %v870_v29  ;;  %vm779_vm8 = vcmp.gt.f32.partialorder %v1198_v31, 0.0  ;;  %v843_v34 = vmul.f32 0.2, %v1198_v31  ;;  %vm811_vm9 = vcmp.gt.f32.partialorder %v1230_v32, 0.0  ;;  %v582_v35 = vpop.f32.mrb[21].mxu0 }
 0x123   : > { %v710_v36 = vpop.f32.mrb[21].mxu1  ;;  %998 = vst [vmem:[%s1403_s7 + $0x188] sm:$0xff] %v934_v33  ;;  %v875_v37 = vmul.f32 0.2, %v1230_v32  ;;  %vm777_vm10 = vcmp.gt.f32.partialorder %v582_v35, 0.0  ;;  %v1199_v41 = vpop.f32.mrb[22].mxu0 }
 0x124   : > { %v841_v38 = vmul.f32 0.2, %v582_v35  ;;  %vm809_vm11 = vcmp.gt.f32.partialorder %v710_v36, 0.0  ;;  %v907_v39 = vsel %vm779_vm8, %v1198_v31, %v843_v34  ;;  %v873_v40 = vmul.f32 0.2, %v710_v36  ;;  %v1231_v42 = vpop.f32.mrb[22].mxu1 }
 0x125   : > { %971 = vst [vmem:[%s1403_s7 + $0xb0] sm:$0xff] %v907_v39  ;;  %v939_v43 = vsel %vm811_vm9, %v1230_v32, %v875_v37  ;;  %vm780_vm12 = vcmp.gt.f32.partialorder %v1199_v41, 0.0  ;;  %v844_v45 = vmul.f32 0.2, %v1199_v41  ;;  %v585_v46 = vpop.f32.mrb[23].mxu0  ;;  %v713_v47 = vpop.f32.mrb[23].mxu1 }
 0x126   : > { %v905_v44 = vsel %vm777_vm10, %v582_v35, %v841_v38  ;;  %1003 = vst [vmem:[%s1403_s7 + $0x1b0] sm:$0xff] %v939_v43  ;;  %v937_v48 = vsel %vm809_vm11, %v710_v36, %v873_v40  ;;  %vm812_vm13 = vcmp.gt.f32.partialorder %v1231_v42, 0.0  ;;  %v876_v49 = vmul.f32 0.2, %v1231_v42 }
 0x127   : > { %969 = vst [vmem:[%s1403_s7 + $0xa0] sm:$0xff] %v905_v44  ;;  %vm778_vm14 = vcmp.gt.f32.partialorder %v585_v46, 0.0  ;;  %1001 = vst [vmem:[%s1403_s7 + $0x1a0] sm:$0xff] %v937_v48  ;;  %v908_v50 = vsel %vm780_vm12, %v1199_v41, %v844_v45  ;;  %v842_v51 = vmul.f32 0.2, %v585_v46  ;;  %vm810_vm15 = vcmp.gt.f32.partialorder %v713_v47, 0.0 }
 0x128   : > { %v874_v52 = vmul.f32 0.2, %v713_v47  ;;  %972 = vst [vmem:[%s1403_s7 + $0xb8] sm:$0xff] %v908_v50  ;;  %v940_v53 = vsel %vm812_vm13, %v1231_v42, %v876_v49 }
 0x129   : > { %1004 = vst [vmem:[%s1403_s7 + $0x1b8] sm:$0xff] %v940_v53  ;;  %v906_v54 = vsel %vm778_vm14, %v585_v46, %v842_v51  ;;  %v1202_v56 = vpop.f32.mrb[24].mxu0  ;;  %v1234_v57 = vpop.f32.mrb[24].mxu1 }
 0x12a   : > { %v938_v55 = vsel %vm810_vm15, %v713_v47, %v874_v52  ;;  %970 = vst [vmem:[%s1403_s7 + $0xa8] sm:$0xff] %v906_v54  ;;  %vm783_vm0 = vcmp.gt.f32.partialorder %v1202_v56, 0.0  ;;  %v847_v58 = vmul.f32 0.2, %v1202_v56  ;;  %vm815_vm1 = vcmp.gt.f32.partialorder %v1234_v57, 0.0  ;;  %v598_v60 = vpop.f32.mrb[25].mxu0 }
 0x12b   : > { %1002 = vst [vmem:[%s1403_s7 + $0x1a8] sm:$0xff] %v938_v55  ;;  %v879_v59 = vmul.f32 0.2, %v1234_v57  ;;  %v726_v61 = vpop.f32.mrb[25].mxu1  ;;  %vm781_vm2 = vcmp.gt.f32.partialorder %v598_v60, 0.0  ;;  %v1203_v1 = vpop.f32.mrb[26].mxu0 }
 0x12c   : > { %v911_v62 = vsel %vm783_vm0, %v1202_v56, %v847_v58  ;;  %v845_v0 = vmul.f32 0.2, %v598_v60  ;;  %v1235_v2 = vpop.f32.mrb[26].mxu1  ;;  %vm813_vm3 = vcmp.gt.f32.partialorder %v726_v61, 0.0  ;;  %v877_v3 = vmul.f32 0.2, %v726_v61 }
 0x12d   : > { %v943_v63 = vsel %vm815_vm1, %v1234_v57, %v879_v59  ;;  %975 = vst [vmem:[%s1403_s7 + $0xd0] sm:$0xff] %v911_v62  ;;  %vm784_vm4 = vcmp.gt.f32.partialorder %v1203_v1, 0.0  ;;  %v848_v4 = vmul.f32 0.2, %v1203_v1  ;;  %vm816_vm5 = vcmp.gt.f32.partialorder %v1235_v2, 0.0  ;;  %v601_v7 = vpop.f32.mrb[27].mxu0 }
 0x12e   : > { %1007 = vst [vmem:[%s1403_s7 + $0x1d0] sm:$0xff] %v943_v63  ;;  %v909_v5 = vsel %vm781_vm2, %v598_v60, %v845_v0  ;;  %v880_v6 = vmul.f32 0.2, %v1235_v2  ;;  %v729_v8 = vpop.f32.mrb[27].mxu1  ;;  %v941_v9 = vsel %vm813_vm3, %v726_v61, %v877_v3  ;;  %vm782_vm6 = vcmp.gt.f32.partialorder %v601_v7, 0.0 }
 0x12f   : > { %973 = vst [vmem:[%s1403_s7 + $0xc0] sm:$0xff] %v909_v5  ;;  %v912_v10 = vsel %vm784_vm4, %v1203_v1, %v848_v4  ;;  %v846_v11 = vmul.f32 0.2, %v601_v7  ;;  %1005 = vst [vmem:[%s1403_s7 + $0x1c0] sm:$0xff] %v941_v9  ;;  %vm814_vm7 = vcmp.gt.f32.partialorder %v729_v8, 0.0 }
 0x130   : > { %976 = vst [vmem:[%s1403_s7 + $0xd8] sm:$0xff] %v912_v10  ;;  %v944_v12 = vsel %vm816_vm5, %v1235_v2, %v880_v6  ;;  %v878_v13 = vmul.f32 0.2, %v729_v8 }
 0x131   : > { %1008 = vst [vmem:[%s1403_s7 + $0x1d8] sm:$0xff] %v944_v12  ;;  %v910_v14 = vsel %vm782_vm6, %v601_v7, %v846_v11  ;;  %v1206_v15 = vpop.f32.mrb[28].mxu0  ;;  %v1238_v16 = vpop.f32.mrb[28].mxu1 }
 0x132   : > { %974 = vst [vmem:[%s1403_s7 + $0xc8] sm:$0xff] %v910_v14  ;;  %v942_v17 = vsel %vm814_vm7, %v729_v8, %v878_v13  ;;  %vm787_vm8 = vcmp.gt.f32.partialorder %v1206_v15, 0.0  ;;  %v851_v18 = vmul.f32 0.2, %v1206_v15  ;;  %vm819_vm9 = vcmp.gt.f32.partialorder %v1238_v16, 0.0  ;;  %v614_v19 = vpop.f32.mrb[29].mxu0 }
 0x133   : > { %v742_v20 = vpop.f32.mrb[29].mxu1  ;;  %1006 = vst [vmem:[%s1403_s7 + $0x1c8] sm:$0xff] %v942_v17  ;;  %v883_v21 = vmul.f32 0.2, %v1238_v16  ;;  %vm785_vm10 = vcmp.gt.f32.partialorder %v614_v19, 0.0  ;;  %v1207_v25 = vpop.f32.mrb[30].mxu0 }
 0x134   : > { %v849_v22 = vmul.f32 0.2, %v614_v19  ;;  %vm817_vm11 = vcmp.gt.f32.partialorder %v742_v20, 0.0  ;;  %v915_v23 = vsel %vm787_vm8, %v1206_v15, %v851_v18  ;;  %v881_v24 = vmul.f32 0.2, %v742_v20  ;;  %v1239_v26 = vpop.f32.mrb[30].mxu1 }
 0x135   : > { %979 = vst [vmem:[%s1403_s7 + $0xf0] sm:$0xff] %v915_v23  ;;  %v947_v27 = vsel %vm819_vm9, %v1238_v16, %v883_v21  ;;  %vm788_vm12 = vcmp.gt.f32.partialorder %v1207_v25, 0.0  ;;  %v852_v29 = vmul.f32 0.2, %v1207_v25  ;;  %v617_v30 = vpop.f32.mrb[31].mxu0  ;;  %v745_v31 = vpop.f32.mrb[31].mxu1 }
 0x136   : > { %v913_v28 = vsel %vm785_vm10, %v614_v19, %v849_v22  ;;  %1011 = vst [vmem:[%s1403_s7 + $0x1f0] sm:$0xff] %v947_v27  ;;  %v945_v32 = vsel %vm817_vm11, %v742_v20, %v881_v24  ;;  %vm820_vm13 = vcmp.gt.f32.partialorder %v1239_v26, 0.0  ;;  %v884_v33 = vmul.f32 0.2, %v1239_v26 }
 0x137   : > { %977 = vst [vmem:[%s1403_s7 + $0xe0] sm:$0xff] %v913_v28  ;;  %vm786_vm14 = vcmp.gt.f32.partialorder %v617_v30, 0.0  ;;  %1009 = vst [vmem:[%s1403_s7 + $0x1e0] sm:$0xff] %v945_v32  ;;  %v916_v34 = vsel %vm788_vm12, %v1207_v25, %v852_v29  ;;  %v850_v35 = vmul.f32 0.2, %v617_v30  ;;  %vm818_vm15 = vcmp.gt.f32.partialorder %v745_v31, 0.0 }
 0x138   : > { %v882_v36 = vmul.f32 0.2, %v745_v31  ;;  %980 = vst [vmem:[%s1403_s7 + $0xf8] sm:$0xff] %v916_v34  ;;  %v948_v37 = vsel %vm820_vm13, %v1239_v26, %v884_v33 }
 0x139   : > { %1012 = vst [vmem:[%s1403_s7 + $0x1f8] sm:$0xff] %v948_v37  ;;  %v914_v38 = vsel %vm786_vm14, %v617_v30, %v850_v35 }
 0x13a   : > { %v946_v39 = vsel %vm818_vm15, %v745_v31, %v882_v36  ;;  %978 = vst [vmem:[%s1403_s7 + $0xe8] sm:$0xff] %v914_v38 }
 0x13b   : > { %1010 = vst [vmem:[%s1403_s7 + $0x1e8] sm:$0xff] %v946_v39 }
 0x13c PF: > { %s12_s9 = sadd.s32 1, %s1310_s9  }
 0x13d   : > { %p9_p4 = scmp.ge.s32.totalorder %s12_s9, 6  }
 0x13f   :  { %11 = sbr.rel (!%p9_p4) target bundleno = 1 (0x1), region = 58 }

// kernel: forward.9
= control target key start
LH: loop header
LB: loop body
LE: loop exit
PB: predicated region body
PF: predicated region fallthrough
CT: control target
= control target key end

     0   :  { %vm889_vm0 = vcmask 1040384   ;;  %s1643_s1 = inlined_call_operand.vmem [shape: bf16[128,128], index: 1, kind: input, shape index: {}]   ;;  %s1644_s0 = inlined_call_operand.vmem [shape: bf16[512,128], index: 0, kind: input, shape index: {}]   ;;  %s1645_s2 = inlined_call_operand.vmem [shape: f32[512,128], index: 2, kind: output, shape index: {0}]   ;;  %s1646_s3 = inlined_call_operand.vmem [shape: f32[1,2,128], index: 3, kind: output, shape index: {1}]  }
   0x1   :  { %v1076_v0 = vld [vmem:[%s1643_s1] sm:$0xff]   ;;  %v1077_v1 = vld [vmem:[%s1643_s1 + $0x8] sm:$0xff]   ;;  %v1078_v2 = vld [vmem:[%s1643_s1 + $0x10] sm:$0xff]  }
   0x2   :  { %980 = vmatprep.subr.bf16.mxu0 %v1076_v0  ;;  %1060 = vmatprep.subr.bf16.mxu1 %v1076_v0  ;;  %v1079_v3 = vld [vmem:[%s1643_s1 + $0x18] sm:$0xff]   ;;  %v1084_v4 = vld [vmem:[%s1644_s0] sm:$0xff]   ;;  %v1081_v6 = vld [vmem:[%s1643_s1 + $0x28] sm:$0xff]  }
   0x3   :  { %981 = vmatpush3.bf16.msra.mxu0 %v1076_v0  ;;  %1068 = vmatpush3.bf16.msra.mxu1 %v1076_v0  ;;  %v1080_v5 = vld [vmem:[%s1643_s1 + $0x20] sm:$0xff]   ;;  %v1082_v7 = vld [vmem:[%s1643_s1 + $0x30] sm:$0xff]   ;;  %v1083_v8 = vld [vmem:[%s1643_s1 + $0x38] sm:$0xff]  }
   0x4   :  { %982 = vmatprep.subr.bf16.mxu0 %v1077_v1  ;;  %1061 = vmatprep.subr.bf16.mxu1 %v1077_v1  ;;  %v1100_v9 = vld [vmem:[%s1644_s0 + $0x80] sm:$0xff]   ;;  %v1085_v10 = vld [vmem:[%s1644_s0 + $0x8] sm:$0xff]   ;;  %v1086_v11 = vld [vmem:[%s1644_s0 + $0x10] sm:$0xff]  }
   0x5   :  { %996 = vmatprep.mubr.bf16.mxu0 %v1084_v4  ;;  %1028 = vmatprep.mubr.bf16.mxu1 %v1100_v9  ;;  %v1101_v12 = vld [vmem:[%s1644_s0 + $0x88] sm:$0xff]   ;;  %v1102_v13 = vld [vmem:[%s1644_s0 + $0x90] sm:$0xff]   ;;  %v1087_v14 = vld [vmem:[%s1644_s0 + $0x18] sm:$0xff]  }
   0x6   :  { %v1088_v15 = vld [vmem:[%s1644_s0 + $0x20] sm:$0xff]   ;;  %v1103_v16 = vld [vmem:[%s1644_s0 + $0x98] sm:$0xff]   ;;  %v1089_v18 = vld [vmem:[%s1644_s0 + $0x28] sm:$0xff]  }
   0x7   :  { %983 = vmatpush3.bf16.msra.mxu0 %v1077_v1  ;;  %1069 = vmatpush3.bf16.msra.mxu1 %v1077_v1  ;;  %v1104_v17 = vld [vmem:[%s1644_s0 + $0xa0] sm:$0xff]   ;;  %v1105_v19 = vld [vmem:[%s1644_s0 + $0xa8] sm:$0xff]   ;;  %v1090_v20 = vld [vmem:[%s1644_s0 + $0x30] sm:$0xff]  }
   0x8   :  { %984 = vmatprep.subr.bf16.mxu0 %v1078_v2  ;;  %1062 = vmatprep.subr.bf16.mxu1 %v1078_v2  ;;  %v1106_v21 = vld [vmem:[%s1644_s0 + $0xb0] sm:$0xff]   ;;  %v1091_v22 = vld [vmem:[%s1644_s0 + $0x38] sm:$0xff]   ;;  %v1092_v24 = vld [vmem:[%s1644_s0 + $0x40] sm:$0xff]  }
   0x9   :  { %v1107_v23 = vld [vmem:[%s1644_s0 + $0xb8] sm:$0xff]   ;;  %v1108_v25 = vld [vmem:[%s1644_s0 + $0xc0] sm:$0xff]   ;;  %v1093_v26 = vld [vmem:[%s1644_s0 + $0x48] sm:$0xff]  }
   0xa   :  { %v1109_v27 = vld [vmem:[%s1644_s0 + $0xc8] sm:$0xff]   ;;  %v1094_v28 = vld [vmem:[%s1644_s0 + $0x50] sm:$0xff]   ;;  %v1095_v30 = vld [vmem:[%s1644_s0 + $0x58] sm:$0xff]  }
   0xb   :  { %985 = vmatpush3.bf16.msra.mxu0 %v1078_v2  ;;  %1070 = vmatpush3.bf16.msra.mxu1 %v1078_v2  ;;  %v1110_v29 = vld [vmem:[%s1644_s0 + $0xd0] sm:$0xff]   ;;  %v1111_v31 = vld [vmem:[%s1644_s0 + $0xd8] sm:$0xff]   ;;  %v1096_v32 = vld [vmem:[%s1644_s0 + $0x60] sm:$0xff]  }
   0xc   :  { %986 = vmatprep.subr.bf16.mxu0 %v1079_v3  ;;  %1063 = vmatprep.subr.bf16.mxu1 %v1079_v3  ;;  %v1112_v33 = vld [vmem:[%s1644_s0 + $0xe0] sm:$0xff]   ;;  %v1097_v34 = vld [vmem:[%s1644_s0 + $0x68] sm:$0xff]   ;;  %v1098_v36 = vld [vmem:[%s1644_s0 + $0x70] sm:$0xff]  }
   0xd   :  { %v1113_v35 = vld [vmem:[%s1644_s0 + $0xe8] sm:$0xff]   ;;  %v1114_v37 = vld [vmem:[%s1644_s0 + $0xf0] sm:$0xff]   ;;  %v1099_v38 = vld [vmem:[%s1644_s0 + $0x78] sm:$0xff]  }
   0xe   :  { %v1115_v39 = vld [vmem:[%s1644_s0 + $0xf8] sm:$0xff]  }
   0xf   :  { %987 = vmatpush3.bf16.msra.mxu0 %v1079_v3  ;;  %1071 = vmatpush3.bf16.msra.mxu1 %v1079_v3 }
  0x10   :  { %988 = vmatprep.subr.bf16.mxu0 %v1080_v5  ;;  %1064 = vmatprep.subr.bf16.mxu1 %v1080_v5 }
  0x13   :  { %989 = vmatpush3.bf16.msra.mxu0 %v1080_v5  ;;  %1072 = vmatpush3.bf16.msra.mxu1 %v1080_v5 }
  0x14   :  { %990 = vmatprep.subr.bf16.mxu0 %v1081_v6  ;;  %1065 = vmatprep.subr.bf16.mxu1 %v1081_v6 }
  0x17   :  { %991 = vmatpush3.bf16.msra.mxu0 %v1081_v6  ;;  %1073 = vmatpush3.bf16.msra.mxu1 %v1081_v6 }
  0x18   :  { %992 = vmatprep.subr.bf16.mxu0 %v1082_v7  ;;  %1066 = vmatprep.subr.bf16.mxu1 %v1082_v7 }
  0x1b   :  { %993 = vmatpush3.bf16.msra.mxu0 %v1082_v7  ;;  %1074 = vmatpush3.bf16.msra.mxu1 %v1082_v7 }
  0x1c   :  { %994 = vmatprep.subr.bf16.mxu0 %v1083_v8  ;;  %1067 = vmatprep.subr.bf16.mxu1 %v1083_v8 }
  0x1f   :  { %995 = vmatpush3.bf16.msra.mxu0 %v1083_v8  ;;  %1075 = vmatpush3.bf16.msra.mxu1 %v1083_v8 }
  0x22   :  { %997 = vmatmul.mubr.bf16.vlgmr.msra.gmra.mrb[0].mxu0 %v1085_v10  ;;  %1029 = vmatmul.mubr.bf16.vlgmr.msra.gmra.mrb[0].mxu1 %v1101_v12 }
  0x23   :  { %1000 = vmatprep.mubr.bf16.mxu0 %v1086_v11  ;;  %1032 = vmatprep.mubr.bf16.mxu1 %v1102_v13 }
  0x2a   :  { %1001 = vmatmul.mubr.bf16.gmra.mrb[4].mxu0 %v1087_v14  ;;  %1033 = vmatmul.mubr.bf16.gmra.mrb[4].mxu1 %v1103_v16 }
  0x2b   :  { %1004 = vmatprep.mubr.bf16.mxu0 %v1088_v15  ;;  %1036 = vmatprep.mubr.bf16.mxu1 %v1104_v17 }
  0x32   :  { %1005 = vmatmul.mubr.bf16.gmra.mrb[8].mxu0 %v1089_v18  ;;  %1037 = vmatmul.mubr.bf16.gmra.mrb[8].mxu1 %v1105_v19 }
  0x33   :  { %1008 = vmatprep.mubr.bf16.mxu0 %v1090_v20  ;;  %1040 = vmatprep.mubr.bf16.mxu1 %v1106_v21 }
  0x3a   :  { %1009 = vmatmul.mubr.bf16.gmra.mrb[12].mxu0 %v1091_v22  ;;  %1041 = vmatmul.mubr.bf16.gmra.mrb[12].mxu1 %v1107_v23 }
  0x3b   :  { %1012 = vmatprep.mubr.bf16.mxu0 %v1092_v24  ;;  %1044 = vmatprep.mubr.bf16.mxu1 %v1108_v25 }
  0x42   :  { %1013 = vmatmul.mubr.bf16.gmra.mrb[16].mxu0 %v1093_v26  ;;  %1045 = vmatmul.mubr.bf16.gmra.mrb[16].mxu1 %v1109_v27 }
  0x43   :  { %1016 = vmatprep.mubr.bf16.mxu0 %v1094_v28  ;;  %1048 = vmatprep.mubr.bf16.mxu1 %v1110_v29 }
  0x4a   :  { %1017 = vmatmul.mubr.bf16.gmra.mrb[20].mxu0 %v1095_v30  ;;  %1049 = vmatmul.mubr.bf16.gmra.mrb[20].mxu1 %v1111_v31 }
  0x4b   :  { %1020 = vmatprep.mubr.bf16.mxu0 %v1096_v32  ;;  %1052 = vmatprep.mubr.bf16.mxu1 %v1112_v33 }
  0x52   :  { %1021 = vmatmul.mubr.bf16.gmra.mrb[24].mxu0 %v1097_v34  ;;  %1053 = vmatmul.mubr.bf16.gmra.mrb[24].mxu1 %v1113_v35 }
  0x53   :  { %1024 = vmatprep.mubr.bf16.mxu0 %v1098_v36  ;;  %1056 = vmatprep.mubr.bf16.mxu1 %v1114_v37 }
  0x5a   :  { %1025 = vmatmul.mubr.bf16.gmra.mrb[28].mxu0 %v1099_v38  ;;  %1057 = vmatmul.mubr.bf16.gmra.mrb[28].mxu1 %v1115_v39 }
  0xf5   :  { %v998_v40 = vpop.f32.mrb[0].mxu0  ;;  %v1256_v41 = vpop.f32.mrb[0].mxu1 }
  0xf6   :  { %625 = vst [vmem:[%s1645_s2 + $0x10] sm:$0xff] %v998_v40  ;;  %v368_v42 = vpop.f32.mrb[1].mxu0  ;;  %657 = vst [vmem:[%s1645_s2 + $0x110] sm:$0xff] %v1256_v41  ;;  %v1265_v43 = vpop.f32.mrb[1].mxu1  ;;  %v758_v51 = vmul.f32 %v998_v40, %v998_v40 }
  0xf7   :  { %623 = vst [vmem:[%s1645_s2] sm:$0xff] %v368_v42  ;;  %v999_v44 = vpop.f32.mrb[2].mxu0  ;;  %655 = vst [vmem:[%s1645_s2 + $0x100] sm:$0xff] %v1265_v43  ;;  %v1274_v45 = vpop.f32.mrb[2].mxu1  ;;  %v756_v48 = vmul.f32 %v368_v42, %v368_v42 }
  0xf8   :  { %626 = vst [vmem:[%s1645_s2 + $0x18] sm:$0xff] %v999_v44  ;;  %v371_v46 = vpop.f32.mrb[3].mxu0  ;;  %658 = vst [vmem:[%s1645_s2 + $0x118] sm:$0xff] %v1274_v45  ;;  %v1283_v47 = vpop.f32.mrb[3].mxu1  ;;  %v759_v54 = vmul.f32 %v999_v44, %v999_v44 }
  0xf9   :  { %624 = vst [vmem:[%s1645_s2 + $0x8] sm:$0xff] %v371_v46  ;;  %v687_v49 = vadd.f32 %v371_v46, %v368_v42  ;;  %v757_v50 = vmul.f32 %v371_v46, %v371_v46  ;;  %656 = vst [vmem:[%s1645_s2 + $0x108] sm:$0xff] %v1283_v47 }
  0xfb   :  { %v688_v52 = vadd.f32 %v998_v40, %v687_v49  ;;  %v820_v53 = vadd.f32 %v757_v50, %v756_v48 }
  0xfd   :  { %v821_v55 = vadd.f32 %v820_v53, %v758_v51  ;;  %v1002_v56 = vpop.f32.mrb[4].mxu0  ;;  %v689_v57 = vadd.f32 %v999_v44, %v688_v52  ;;  %v1292_v58 = vpop.f32.mrb[4].mxu1 }
  0xfe   :  { %629 = vst [vmem:[%s1645_s2 + $0x30] sm:$0xff] %v1002_v56  ;;  %v384_v59 = vpop.f32.mrb[5].mxu0  ;;  %661 = vst [vmem:[%s1645_s2 + $0x130] sm:$0xff] %v1292_v58  ;;  %v1301_v60 = vpop.f32.mrb[5].mxu1  ;;  %v762_v7 = vmul.f32 %v1002_v56, %v1002_v56 }
  0xff   :  { %627 = vst [vmem:[%s1645_s2 + $0x20] sm:$0xff] %v384_v59  ;;  %v690_v61 = vadd.f32 %v689_v57, %v384_v59  ;;  %v760_v62 = vmul.f32 %v384_v59, %v384_v59  ;;  %v822_v63 = vadd.f32 %v821_v55, %v759_v54  ;;  %v1003_v0 = vpop.f32.mrb[6].mxu0  ;;  %659 = vst [vmem:[%s1645_s2 + $0x120] sm:$0xff] %v1301_v60  ;;  %v1310_v1 = vpop.f32.mrb[6].mxu1 }
 0x100   :  { %630 = vst [vmem:[%s1645_s2 + $0x38] sm:$0xff] %v1003_v0  ;;  %v387_v2 = vpop.f32.mrb[7].mxu0  ;;  %662 = vst [vmem:[%s1645_s2 + $0x138] sm:$0xff] %v1310_v1  ;;  %v1319_v3 = vpop.f32.mrb[7].mxu1  ;;  %v763_v10 = vmul.f32 %v1003_v0, %v1003_v0 }
 0x101   :  { %v823_v4 = vadd.f32 %v822_v63, %v760_v62  ;;  %628 = vst [vmem:[%s1645_s2 + $0x28] sm:$0xff] %v387_v2  ;;  %v691_v5 = vadd.f32 %v690_v61, %v387_v2  ;;  %v761_v6 = vmul.f32 %v387_v2, %v387_v2  ;;  %660 = vst [vmem:[%s1645_s2 + $0x128] sm:$0xff] %v1319_v3 }
 0x103   :  { %v692_v8 = vadd.f32 %v1002_v56, %v691_v5  ;;  %v824_v9 = vadd.f32 %v823_v4, %v761_v6 }
 0x105   :  { %v825_v11 = vadd.f32 %v824_v9, %v762_v7  ;;  %v1006_v12 = vpop.f32.mrb[8].mxu0  ;;  %v693_v13 = vadd.f32 %v1003_v0, %v692_v8  ;;  %v1328_v14 = vpop.f32.mrb[8].mxu1 }
 0x106   :  { %633 = vst [vmem:[%s1645_s2 + $0x50] sm:$0xff] %v1006_v12  ;;  %v400_v15 = vpop.f32.mrb[9].mxu0  ;;  %665 = vst [vmem:[%s1645_s2 + $0x150] sm:$0xff] %v1328_v14  ;;  %v1337_v16 = vpop.f32.mrb[9].mxu1  ;;  %v766_v27 = vmul.f32 %v1006_v12, %v1006_v12 }
 0x107   :  { %631 = vst [vmem:[%s1645_s2 + $0x40] sm:$0xff] %v400_v15  ;;  %v694_v17 = vadd.f32 %v693_v13, %v400_v15  ;;  %v764_v18 = vmul.f32 %v400_v15, %v400_v15  ;;  %v826_v19 = vadd.f32 %v825_v11, %v763_v10  ;;  %v1007_v20 = vpop.f32.mrb[10].mxu0  ;;  %663 = vst [vmem:[%s1645_s2 + $0x140] sm:$0xff] %v1337_v16  ;;  %v1346_v21 = vpop.f32.mrb[10].mxu1 }
 0x108   :  { %634 = vst [vmem:[%s1645_s2 + $0x58] sm:$0xff] %v1007_v20  ;;  %v403_v22 = vpop.f32.mrb[11].mxu0  ;;  %666 = vst [vmem:[%s1645_s2 + $0x158] sm:$0xff] %v1346_v21  ;;  %v1355_v23 = vpop.f32.mrb[11].mxu1  ;;  %v767_v30 = vmul.f32 %v1007_v20, %v1007_v20 }
 0x109   :  { %v827_v24 = vadd.f32 %v826_v19, %v764_v18  ;;  %632 = vst [vmem:[%s1645_s2 + $0x48] sm:$0xff] %v403_v22  ;;  %v695_v25 = vadd.f32 %v694_v17, %v403_v22  ;;  %v765_v26 = vmul.f32 %v403_v22, %v403_v22  ;;  %664 = vst [vmem:[%s1645_s2 + $0x148] sm:$0xff] %v1355_v23 }
 0x10b   :  { %v696_v28 = vadd.f32 %v1006_v12, %v695_v25  ;;  %v828_v29 = vadd.f32 %v827_v24, %v765_v26 }
 0x10d   :  { %v829_v31 = vadd.f32 %v828_v29, %v766_v27  ;;  %v1010_v32 = vpop.f32.mrb[12].mxu0  ;;  %v697_v33 = vadd.f32 %v1007_v20, %v696_v28  ;;  %v1364_v34 = vpop.f32.mrb[12].mxu1 }
 0x10e   :  { %637 = vst [vmem:[%s1645_s2 + $0x70] sm:$0xff] %v1010_v32  ;;  %v416_v35 = vpop.f32.mrb[13].mxu0  ;;  %669 = vst [vmem:[%s1645_s2 + $0x170] sm:$0xff] %v1364_v34  ;;  %v1373_v36 = vpop.f32.mrb[13].mxu1  ;;  %v770_v51 = vmul.f32 %v1010_v32, %v1010_v32 }
 0x10f   :  { %635 = vst [vmem:[%s1645_s2 + $0x60] sm:$0xff] %v416_v35  ;;  %v698_v37 = vadd.f32 %v697_v33, %v416_v35  ;;  %v768_v38 = vmul.f32 %v416_v35, %v416_v35  ;;  %v830_v39 = vadd.f32 %v829_v31, %v767_v30  ;;  %v1011_v40 = vpop.f32.mrb[14].mxu0  ;;  %667 = vst [vmem:[%s1645_s2 + $0x160] sm:$0xff] %v1373_v36  ;;  %v1382_v42 = vpop.f32.mrb[14].mxu1 }
 0x110   :  { %638 = vst [vmem:[%s1645_s2 + $0x78] sm:$0xff] %v1011_v40  ;;  %v419_v44 = vpop.f32.mrb[15].mxu0  ;;  %670 = vst [vmem:[%s1645_s2 + $0x178] sm:$0xff] %v1382_v42  ;;  %v1391_v46 = vpop.f32.mrb[15].mxu1  ;;  %v771_v54 = vmul.f32 %v1011_v40, %v1011_v40 }
 0x111   :  { %v831_v48 = vadd.f32 %v830_v39, %v768_v38  ;;  %636 = vst [vmem:[%s1645_s2 + $0x68] sm:$0xff] %v419_v44  ;;  %v699_v49 = vadd.f32 %v698_v37, %v419_v44  ;;  %v769_v50 = vmul.f32 %v419_v44, %v419_v44  ;;  %668 = vst [vmem:[%s1645_s2 + $0x168] sm:$0xff] %v1391_v46 }
 0x113   :  { %v700_v52 = vadd.f32 %v1010_v32, %v699_v49  ;;  %v832_v53 = vadd.f32 %v831_v48, %v769_v50 }
 0x115   :  { %v833_v55 = vadd.f32 %v832_v53, %v770_v51  ;;  %v1014_v56 = vpop.f32.mrb[16].mxu0  ;;  %v701_v57 = vadd.f32 %v1011_v40, %v700_v52  ;;  %v1400_v59 = vpop.f32.mrb[16].mxu1 }
 0x116   :  { %641 = vst [vmem:[%s1645_s2 + $0x90] sm:$0xff] %v1014_v56  ;;  %v432_v61 = vpop.f32.mrb[17].mxu0  ;;  %673 = vst [vmem:[%s1645_s2 + $0x190] sm:$0xff] %v1400_v59  ;;  %v1409_v62 = vpop.f32.mrb[17].mxu1  ;;  %v774_v11 = vmul.f32 %v1014_v56, %v1014_v56 }
 0x117   :  { %639 = vst [vmem:[%s1645_s2 + $0x80] sm:$0xff] %v432_v61  ;;  %v702_v63 = vadd.f32 %v701_v57, %v432_v61  ;;  %v772_v0 = vmul.f32 %v432_v61, %v432_v61  ;;  %v834_v2 = vadd.f32 %v833_v55, %v771_v54  ;;  %v1015_v4 = vpop.f32.mrb[18].mxu0  ;;  %671 = vst [vmem:[%s1645_s2 + $0x180] sm:$0xff] %v1409_v62  ;;  %v1418_v5 = vpop.f32.mrb[18].mxu1 }
 0x118   :  { %642 = vst [vmem:[%s1645_s2 + $0x98] sm:$0xff] %v1015_v4  ;;  %v435_v6 = vpop.f32.mrb[19].mxu0  ;;  %674 = vst [vmem:[%s1645_s2 + $0x198] sm:$0xff] %v1418_v5  ;;  %v1427_v7 = vpop.f32.mrb[19].mxu1  ;;  %v775_v15 = vmul.f32 %v1015_v4, %v1015_v4 }
 0x119   :  { %v835_v8 = vadd.f32 %v834_v2, %v772_v0  ;;  %640 = vst [vmem:[%s1645_s2 + $0x88] sm:$0xff] %v435_v6  ;;  %v703_v9 = vadd.f32 %v702_v63, %v435_v6  ;;  %v773_v10 = vmul.f32 %v435_v6, %v435_v6  ;;  %672 = vst [vmem:[%s1645_s2 + $0x188] sm:$0xff] %v1427_v7 }
 0x11b   :  { %v704_v12 = vadd.f32 %v1014_v56, %v703_v9  ;;  %v836_v13 = vadd.f32 %v835_v8, %v773_v10 }
 0x11d   :  { %v837_v17 = vadd.f32 %v836_v13, %v774_v11  ;;  %v1018_v18 = vpop.f32.mrb[20].mxu0  ;;  %v705_v19 = vadd.f32 %v1015_v4, %v704_v12  ;;  %v1436_v20 = vpop.f32.mrb[20].mxu1 }
 0x11e   :  { %645 = vst [vmem:[%s1645_s2 + $0xb0] sm:$0xff] %v1018_v18  ;;  %v448_v22 = vpop.f32.mrb[21].mxu0  ;;  %677 = vst [vmem:[%s1645_s2 + $0x1b0] sm:$0xff] %v1436_v20  ;;  %v1445_v24 = vpop.f32.mrb[21].mxu1  ;;  %v778_v37 = vmul.f32 %v1018_v18, %v1018_v18 }
 0x11f   :  { %643 = vst [vmem:[%s1645_s2 + $0xa0] sm:$0xff] %v448_v22  ;;  %v706_v25 = vadd.f32 %v705_v19, %v448_v22  ;;  %v776_v26 = vmul.f32 %v448_v22, %v448_v22  ;;  %v838_v27 = vadd.f32 %v837_v17, %v775_v15  ;;  %v1019_v28 = vpop.f32.mrb[22].mxu0  ;;  %675 = vst [vmem:[%s1645_s2 + $0x1a0] sm:$0xff] %v1445_v24  ;;  %v1454_v29 = vpop.f32.mrb[22].mxu1 }
 0x120   :  { %646 = vst [vmem:[%s1645_s2 + $0xb8] sm:$0xff] %v1019_v28  ;;  %v451_v30 = vpop.f32.mrb[23].mxu0  ;;  %678 = vst [vmem:[%s1645_s2 + $0x1b8] sm:$0xff] %v1454_v29  ;;  %v1463_v31 = vpop.f32.mrb[23].mxu1  ;;  %v779_v40 = vmul.f32 %v1019_v28, %v1019_v28 }
 0x121   :  { %v839_v32 = vadd.f32 %v838_v27, %v776_v26  ;;  %644 = vst [vmem:[%s1645_s2 + $0xa8] sm:$0xff] %v451_v30  ;;  %v707_v33 = vadd.f32 %v706_v25, %v451_v30  ;;  %v777_v35 = vmul.f32 %v451_v30, %v451_v30  ;;  %676 = vst [vmem:[%s1645_s2 + $0x1a8] sm:$0xff] %v1463_v31 }
 0x123   :  { %v708_v38 = vadd.f32 %v1018_v18, %v707_v33  ;;  %v840_v39 = vadd.f32 %v839_v32, %v777_v35 }
 0x125   :  { %v841_v44 = vadd.f32 %v840_v39, %v778_v37  ;;  %v1022_v48 = vpop.f32.mrb[24].mxu0  ;;  %v709_v49 = vadd.f32 %v1019_v28, %v708_v38  ;;  %v1472_v50 = vpop.f32.mrb[24].mxu1 }
 0x126   :  { %649 = vst [vmem:[%s1645_s2 + $0xd0] sm:$0xff] %v1022_v48  ;;  %v464_v51 = vpop.f32.mrb[25].mxu0  ;;  %681 = vst [vmem:[%s1645_s2 + $0x1d0] sm:$0xff] %v1472_v50  ;;  %v1481_v52 = vpop.f32.mrb[25].mxu1  ;;  %v782_v6 = vmul.f32 %v1022_v48, %v1022_v48 }
 0x127   :  { %647 = vst [vmem:[%s1645_s2 + $0xc0] sm:$0xff] %v464_v51  ;;  %v710_v53 = vadd.f32 %v709_v49, %v464_v51  ;;  %v780_v54 = vmul.f32 %v464_v51, %v464_v51  ;;  %v842_v55 = vadd.f32 %v841_v44, %v779_v40  ;;  %v1023_v56 = vpop.f32.mrb[26].mxu0  ;;  %679 = vst [vmem:[%s1645_s2 + $0x1c0] sm:$0xff] %v1481_v52  ;;  %v1490_v57 = vpop.f32.mrb[26].mxu1 }
 0x128   :  { %650 = vst [vmem:[%s1645_s2 + $0xd8] sm:$0xff] %v1023_v56  ;;  %v467_v61 = vpop.f32.mrb[27].mxu0  ;;  %682 = vst [vmem:[%s1645_s2 + $0x1d8] sm:$0xff] %v1490_v57  ;;  %v1499_v63 = vpop.f32.mrb[27].mxu1  ;;  %v783_v10 = vmul.f32 %v1023_v56, %v1023_v56  ;;  %v788_v49 = vmul.f32 %v1265_v43, %v1265_v43 }
 0x129   :  { %v843_v0 = vadd.f32 %v842_v55, %v780_v54  ;;  %648 = vst [vmem:[%s1645_s2 + $0xc8] sm:$0xff] %v467_v61  ;;  %v711_v2 = vadd.f32 %v710_v53, %v467_v61  ;;  %v781_v4 = vmul.f32 %v467_v61, %v467_v61  ;;  %680 = vst [vmem:[%s1645_s2 + $0x1c8] sm:$0xff] %v1499_v63 }
 0x12a   :  { %v790_v61 = vmul.f32 %v1256_v41, %v1256_v41 }
 0x12b   :  { %v712_v8 = vadd.f32 %v1022_v48, %v711_v2  ;;  %v844_v9 = vadd.f32 %v843_v0, %v781_v4  ;;  %v791_v4 = vmul.f32 %v1274_v45, %v1274_v45 }
 0x12d   :  { %v845_v11 = vadd.f32 %v844_v9, %v782_v6  ;;  %v1026_v12 = vpop.f32.mrb[28].mxu0  ;;  %v713_v13 = vadd.f32 %v1023_v56, %v712_v8  ;;  %v1508_v15 = vpop.f32.mrb[28].mxu1  ;;  %v789_v56 = vmul.f32 %v1283_v47, %v1283_v47 }
 0x12e   :  { %653 = vst [vmem:[%s1645_s2 + $0xf0] sm:$0xff] %v1026_v12  ;;  %v480_v17 = vpop.f32.mrb[29].mxu0  ;;  %685 = vst [vmem:[%s1645_s2 + $0x1f0] sm:$0xff] %v1508_v15  ;;  %v1517_v18 = vpop.f32.mrb[29].mxu1  ;;  %v786_v37 = vmul.f32 %v1026_v12, %v1026_v12 }
 0x12f   :  { %651 = vst [vmem:[%s1645_s2 + $0xe0] sm:$0xff] %v480_v17  ;;  %v714_v19 = vadd.f32 %v713_v13, %v480_v17  ;;  %v784_v22 = vmul.f32 %v480_v17, %v480_v17  ;;  %v846_v25 = vadd.f32 %v845_v11, %v783_v10  ;;  %v1027_v26 = vpop.f32.mrb[30].mxu0  ;;  %683 = vst [vmem:[%s1645_s2 + $0x1e0] sm:$0xff] %v1517_v18  ;;  %v1526_v27 = vpop.f32.mrb[30].mxu1 }
 0x130   :  { %654 = vst [vmem:[%s1645_s2 + $0xf8] sm:$0xff] %v1027_v26  ;;  %v483_v28 = vpop.f32.mrb[31].mxu0  ;;  %686 = vst [vmem:[%s1645_s2 + $0x1f8] sm:$0xff] %v1526_v27  ;;  %v1535_v30 = vpop.f32.mrb[31].mxu1  ;;  %v787_v40 = vmul.f32 %v1027_v26, %v1027_v26 }
 0x131   :  { %v847_v32 = vadd.f32 %v846_v25, %v784_v22  ;;  %652 = vst [vmem:[%s1645_s2 + $0xe8] sm:$0xff] %v483_v28  ;;  %v715_v33 = vadd.f32 %v714_v19, %v483_v28  ;;  %v785_v35 = vmul.f32 %v483_v28, %v483_v28  ;;  %684 = vst [vmem:[%s1645_s2 + $0x1e8] sm:$0xff] %v1535_v30 }
 0x133   :  { %v716_v38 = vadd.f32 %v1026_v12, %v715_v33  ;;  %v848_v39 = vadd.f32 %v847_v32, %v785_v35  ;;  %v793_v12 = vmul.f32 %v1319_v3, %v1319_v3  ;;  %v797_v32 = vmul.f32 %v1355_v23, %v1355_v23 }
 0x135   :  { %v849_v44 = vadd.f32 %v848_v39, %v786_v37  ;;  %v717_v48 = vadd.f32 %v1027_v26, %v716_v38 }
 0x137   :  { %v718_v51 = vadd.f32 %v717_v48, %v1265_v43  ;;  %v850_v53 = vadd.f32 %v849_v44, %v787_v40  ;;  %v792_v43 = vmul.f32 %v1301_v60, %v1301_v60  ;;  %v801_v48 = vmul.f32 %v1391_v46, %v1391_v46 }
 0x139   :  { %v851_v54 = vadd.f32 %v850_v53, %v788_v49  ;;  %v719_v55 = vadd.f32 %v718_v51, %v1283_v47 }
 0x13b   :  { %v720_v0 = vadd.f32 %v1256_v41, %v719_v55  ;;  %v852_v2 = vadd.f32 %v851_v54, %v789_v56  ;;  %v794_v41 = vmul.f32 %v1292_v58, %v1292_v58 }
 0x13d   :  { %v853_v6 = vadd.f32 %v852_v2, %v790_v61  ;;  %v721_v8 = vadd.f32 %v1274_v45, %v720_v0  ;;  %v795_v45 = vmul.f32 %v1310_v1, %v1310_v1  ;;  %v805_v0 = vmul.f32 %v1427_v7, %v1427_v7 }
 0x13f   :  { %v722_v9 = vadd.f32 %v721_v8, %v1301_v60  ;;  %v854_v10 = vadd.f32 %v853_v6, %v791_v4  ;;  %v796_v60 = vmul.f32 %v1337_v16, %v1337_v16 }
 0x141   :  { %v855_v11 = vadd.f32 %v854_v10, %v792_v43  ;;  %v723_v47 = vadd.f32 %v722_v9, %v1319_v3 }
 0x143   :  { %v724_v13 = vadd.f32 %v1292_v58, %v723_v47  ;;  %v856_v17 = vadd.f32 %v855_v11, %v793_v12  ;;  %v798_v58 = vmul.f32 %v1328_v14, %v1328_v14  ;;  %v809_v11 = vmul.f32 %v1463_v31, %v1463_v31 }
 0x145   :  { %v857_v19 = vadd.f32 %v856_v17, %v794_v41  ;;  %v725_v22 = vadd.f32 %v1310_v1, %v724_v13  ;;  %v799_v1 = vmul.f32 %v1346_v21, %v1346_v21 }
 0x147   :  { %v726_v25 = vadd.f32 %v725_v22, %v1337_v16  ;;  %v858_v26 = vadd.f32 %v857_v19, %v795_v45  ;;  %v800_v16 = vmul.f32 %v1373_v36, %v1373_v36  ;;  %v813_v22 = vmul.f32 %v1499_v63, %v1499_v63 }
 0x149   :  { %v859_v28 = vadd.f32 %v858_v26, %v796_v60  ;;  %v727_v3 = vadd.f32 %v726_v25, %v1355_v23 }
 0x14b   :  { %v728_v33 = vadd.f32 %v1328_v14, %v727_v3  ;;  %v860_v35 = vadd.f32 %v859_v28, %v797_v32  ;;  %v802_v14 = vmul.f32 %v1364_v34, %v1364_v34 }
 0x14d   :  { %v861_v37 = vadd.f32 %v860_v35, %v798_v58  ;;  %v729_v38 = vadd.f32 %v1346_v21, %v728_v33  ;;  %v803_v21 = vmul.f32 %v1382_v42, %v1382_v42  ;;  %v817_v33 = vmul.f32 %v1535_v30, %v1535_v30 }
 0x14f   :  { %v730_v39 = vadd.f32 %v729_v38, %v1373_v36  ;;  %v862_v40 = vadd.f32 %v861_v37, %v799_v1  ;;  %v804_v36 = vmul.f32 %v1409_v62, %v1409_v62 }
 0x151   :  { %v863_v44 = vadd.f32 %v862_v40, %v800_v16  ;;  %v731_v23 = vadd.f32 %v730_v39, %v1391_v46 }
 0x153   :  { %v732_v49 = vadd.f32 %v1364_v34, %v731_v23  ;;  %v864_v51 = vadd.f32 %v863_v44, %v801_v48  ;;  %v806_v34 = vmul.f32 %v1400_v59, %v1400_v59 }
 0x155   :  { %v865_v53 = vadd.f32 %v864_v51, %v802_v14  ;;  %v733_v54 = vadd.f32 %v1382_v42, %v732_v49  ;;  %v807_v42 = vmul.f32 %v1418_v5, %v1418_v5 }
 0x157   :  { %v734_v55 = vadd.f32 %v733_v54, %v1409_v62  ;;  %v866_v56 = vadd.f32 %v865_v53, %v803_v21  ;;  %v808_v62 = vmul.f32 %v1445_v24, %v1445_v24 }
 0x159   :  { %v867_v61 = vadd.f32 %v866_v56, %v804_v36  ;;  %v735_v46 = vadd.f32 %v734_v55, %v1427_v7 }
 0x15b   :  { %v736_v2 = vadd.f32 %v1400_v59, %v735_v46  ;;  %v868_v4 = vadd.f32 %v867_v61, %v805_v0  ;;  %v810_v59 = vmul.f32 %v1436_v20, %v1436_v20 }
 0x15d   :  { %v869_v6 = vadd.f32 %v868_v4, %v806_v34  ;;  %v737_v8 = vadd.f32 %v1418_v5, %v736_v2  ;;  %v811_v5 = vmul.f32 %v1454_v29, %v1454_v29 }
 0x15f   :  { %v738_v43 = vadd.f32 %v737_v8, %v1445_v24  ;;  %v870_v9 = vadd.f32 %v869_v6, %v807_v42  ;;  %v812_v24 = vmul.f32 %v1481_v52, %v1481_v52 }
 0x161   :  { %v871_v10 = vadd.f32 %v870_v9, %v808_v62  ;;  %v739_v7 = vadd.f32 %v738_v43, %v1463_v31 }
 0x163   :  { %v740_v47 = vadd.f32 %v1436_v20, %v739_v7  ;;  %v872_v12 = vadd.f32 %v871_v10, %v809_v11  ;;  %v814_v20 = vmul.f32 %v1472_v50, %v1472_v50 }
 0x165   :  { %v873_v41 = vadd.f32 %v872_v12, %v810_v59  ;;  %v741_v13 = vadd.f32 %v1454_v29, %v740_v47  ;;  %v815_v29 = vmul.f32 %v1490_v57, %v1490_v57 }
 0x167   :  { %v742_v17 = vadd.f32 %v741_v13, %v1481_v52  ;;  %v874_v45 = vadd.f32 %v873_v41, %v811_v5  ;;  %v816_v52 = vmul.f32 %v1517_v18, %v1517_v18 }
 0x169   :  { %v875_v19 = vadd.f32 %v874_v45, %v812_v24  ;;  %v743_v31 = vadd.f32 %v742_v17, %v1499_v63 }
 0x16b   :  { %v744_v60 = vadd.f32 %v1472_v50, %v743_v31  ;;  %v876_v25 = vadd.f32 %v875_v19, %v813_v22  ;;  %v818_v50 = vmul.f32 %v1508_v15, %v1508_v15 }
 0x16d   :  { %v877_v26 = vadd.f32 %v876_v25, %v814_v20  ;;  %v745_v28 = vadd.f32 %v1490_v57, %v744_v60  ;;  %v819_v57 = vmul.f32 %v1526_v27, %v1526_v27 }
 0x16f   :  { %v746_v3 = vadd.f32 %v745_v28, %v1517_v18  ;;  %v878_v32 = vadd.f32 %v877_v26, %v815_v29 }
 0x171   :  { %v879_v58 = vadd.f32 %v878_v32, %v816_v52  ;;  %v747_v63 = vadd.f32 %v746_v3, %v1535_v30 }
 0x173   :  { %v748_v35 = vadd.f32 %v1508_v15, %v747_v63  ;;  %v880_v1 = vadd.f32 %v879_v58, %v817_v33 }
 0x175   :  { %v749_v37 = vadd.f32 %v1526_v27, %v748_v35  ;;  %v881_v38 = vadd.f32 %v880_v1, %v818_v50 }
 0x177   :  { %v750_v18 = vrot.slane %v749_v37, 4  ;;  %v882_v16 = vadd.f32 %v881_v38, %v819_v57 }
 0x179   :  { %v751_v39 = vadd.f32 %v750_v18, %v749_v37  ;;  %v883_v40 = vrot.slane %v882_v16, 4 }
 0x17b   :  { %v752_v44 = vrot.slane %v751_v39, 2  ;;  %v884_v23 = vadd.f32 %v883_v40, %v882_v16 }
 0x17d   :  { %v753_v48 = vadd.f32 %v752_v44, %v751_v39  ;;  %v885_v30 = vrot.slane %v884_v23, 2 }
 0x17f   :  { %v754_v14 = vrot.slane %v753_v48, 1  ;;  %v886_v49 = vadd.f32 %v885_v30, %v884_v23 }
 0x181   :  { %v887_v51 = vrot.slane %v886_v49, 1  ;;  %v755_v15 = vadd.f32 %v754_v14, %v753_v48 }
 0x183   :  { %v888_v21 = vadd.f32 %v887_v51, %v886_v49 }
 0x185   :  { %v890_v53 = vsel %vm889_vm0, %v755_v15, %v888_v21 }
 0x186   :  { %891 = vst [vmem:[%s1646_s3] sm:$0x3] %v890_v53 }

// kernel: forward.10
= control target key start
LH: loop header
LB: loop body
LE: loop exit
PB: predicated region body
PF: predicated region fallthrough
CT: control target
= control target key end

     0   :  { %v515_v6 = vmov 1966171168   ;;  %v31_v8 = vlaneseq  ;;  %s1069_s1 = inlined_call_operand.vmem [shape: f32[2,128], index: 1, kind: input, shape index: {}]   ;;  %s1070_s2 = inlined_call_operand.vmem [shape: f32[1,128], index: 2, kind: input, shape index: {}]   ;;  %s1071_s0 = inlined_call_operand.vmem [shape: f32[512,128], index: 0, kind: input, shape index: {}]   ;;  %s1072_s3 = inlined_call_operand.vmem [shape: f32[1,128], index: 3, kind: input, shape index: {}]   ;;  %s1073_s4 = inlined_call_operand.vmem [shape: f32[512,128], index: 4, kind: output, shape index: {}]  }
   0x1   :  { %v17_v0 = vld [vmem:[%s1069_s1] sm:$0x3]  ;;  %v29_v7 = vunpack.c.l.s4 %v515_v6  ;;  %v49_v21 = vld [vmem:[%s1071_s0 + $0x8] sm:$0xff]  ;;  %v50_v22 = vld [vmem:[%s1071_s0 + $0x10] sm:$0xff] }
   0x2   :  { %v18_v1 = vmul.f32 0.001953125, %v17_v0  ;;  %v32_v10 = vshrl.u32 %v31_v8, 7  ;;  %v26_v15 = vld [vmem:[%s1070_s2] sm:$0x1]  ;;  %v51_v23 = vld [vmem:[%s1071_s0 + $0x18] sm:$0xff]  ;;  %v53_v27 = vld [vmem:[%s1071_s0 + $0x28] sm:$0xff] }
   0x3   :  { %v30_v9 = vunpack.c.0.s8 %v29_v7  ;;  %v45_v19 = vld [vmem:[%s1072_s3] sm:$0x1]  ;;  %v54_v28 = vld [vmem:[%s1071_s0 + $0x30] sm:$0xff]  ;;  %v55_v29 = vld [vmem:[%s1071_s0 + $0x38] sm:$0xff] }
   0x4   :  { %v19_v2 = vmul.f32 %v18_v1, %v18_v1  ;;  %v115_v17 = vsub.s32 0, %v32_v10  ;;  %v48_v20 = vld [vmem:[%s1071_s0] sm:$0xff]  ;;  %v57_v31 = vld [vmem:[%s1071_s0 + $0x48] sm:$0xff]  ;;  %v58_v32 = vld [vmem:[%s1071_s0 + $0x50] sm:$0xff] }
   0x5   :  { %v33_v11 = vsub.s32 %v30_v9, %v32_v10  ;;  %v52_v24 = vld [vmem:[%s1071_s0 + $0x20] sm:$0xff]  ;;  %v59_v37 = vld [vmem:[%s1071_s0 + $0x58] sm:$0xff]  ;;  %v61_v39 = vld [vmem:[%s1071_s0 + $0x68] sm:$0xff] }
   0x6   :  { %v21_v3 = vrot.slane %v19_v2, 7  ;;  %v56_v30 = vld [vmem:[%s1071_s0 + $0x40] sm:$0xff] }
   0x7   :  { %v60_v38 = vld [vmem:[%s1071_s0 + $0x60] sm:$0xff] }
   0x8   :  { %v23_v4 = vsub.f32 %v18_v1, %v21_v3 }
   0xa   :  { %v24_v5 = vadd.f32 1e-05, %v23_v4 }
   0xc   :  { %513 = vrsqrt.f32 %v24_v5 }
  0x16   :  { %v514_v12 = vpop.eup %513 }
  0x17   :  { %v34_v13 = vrot.slane %v514_v12, %v33_v11 }
  0x19   :  { %v35_v14 = vcombine.high %v34_v13, %v34_v13 }
  0x1b   :  { %v42_v16 = vrot.slane %v35_v14, %v33_v11 }
  0x1d   :  { %v44_v18 = vmul.f32 %v42_v16, %v26_v15  ;;  %v62_v16 = vld [vmem:[%s1071_s0 + $0x70] sm:$0xff] }
  0x1f   :  { %v46_v25 = vmul.f32 %v44_v18, %v18_v1  ;;  %v565_v26 = vrot.slane %v44_v18, %v115_v17 }
  0x21   :  { %v47_v33 = vsub.f32 %v45_v19, %v46_v25  ;;  %v118_v34 = vmul.f32 %v565_v26, %v48_v20  ;;  %v119_v35 = vmul.f32 %v565_v26, %v49_v21  ;;  %v120_v36 = vmul.f32 %v565_v26, %v50_v22  ;;  %v63_v19 = vld [vmem:[%s1071_s0 + $0x78] sm:$0xff]  ;;  %v64_v20 = vld [vmem:[%s1071_s0 + $0x80] sm:$0xff] }
  0x22   :  { %v121_v40 = vmul.f32 %v565_v26, %v51_v23  ;;  %v122_v41 = vmul.f32 %v565_v26, %v52_v24  ;;  %v123_v42 = vmul.f32 %v565_v26, %v53_v27  ;;  %v124_v43 = vmul.f32 %v565_v26, %v54_v28  ;;  %v65_v27 = vld [vmem:[%s1071_s0 + $0x88] sm:$0xff] }
  0x23   :  { %v601_v44 = vrot.slane %v47_v33, %v115_v17  ;;  %v125_v45 = vmul.f32 %v565_v26, %v55_v29  ;;  %v126_v46 = vmul.f32 %v565_v26, %v56_v30  ;;  %v127_v47 = vmul.f32 %v565_v26, %v57_v31  ;;  %v67_v33 = vld [vmem:[%s1071_s0 + $0x98] sm:$0xff] }
  0x24   :  { %v128_v48 = vmul.f32 %v565_v26, %v58_v32  ;;  %v129_v49 = vmul.f32 %v565_v26, %v59_v37  ;;  %v130_v50 = vmul.f32 %v565_v26, %v60_v38  ;;  %v610_v51 = vmul.f32 %v565_v26, %v61_v39  ;;  %v66_v32 = vld [vmem:[%s1071_s0 + $0x90] sm:$0xff] }
  0x25   :  { %v188_v52 = vadd.f32 %v601_v44, %v118_v34  ;;  %v189_v53 = vadd.f32 %v601_v44, %v119_v35  ;;  %v190_v54 = vadd.f32 %v601_v44, %v120_v36  ;;  %v191_v55 = vadd.f32 %v601_v44, %v121_v40 }
  0x26   :  { %v192_v56 = vadd.f32 %v601_v44, %v122_v41  ;;  %v193_v57 = vadd.f32 %v601_v44, %v123_v42  ;;  %v194_v58 = vadd.f32 %v601_v44, %v124_v43  ;;  %v195_v59 = vadd.f32 %v601_v44, %v125_v45 }
  0x27   :  { %vm252_vm0 = vcmp.gt.f32.partialorder %v188_v52, 0.0  ;;  %v316_v60 = vmul.f32 0.2, %v188_v52  ;;  %vm253_vm1 = vcmp.gt.f32.partialorder %v189_v53, 0.0  ;;  %v317_v61 = vmul.f32 0.2, %v189_v53 }
  0x28   :  { %vm254_vm2 = vcmp.gt.f32.partialorder %v190_v54, 0.0  ;;  %v318_v62 = vmul.f32 0.2, %v190_v54  ;;  %vm255_vm3 = vcmp.gt.f32.partialorder %v191_v55, 0.0  ;;  %v319_v63 = vmul.f32 0.2, %v191_v55 }
  0x29   :  { %v380_v0 = vsel %vm252_vm0, %v188_v52, %v316_v60  ;;  %v381_v1 = vsel %vm253_vm1, %v189_v53, %v317_v61  ;;  %vm256_vm4 = vcmp.gt.f32.partialorder %v192_v56, 0.0  ;;  %v320_v2 = vmul.f32 0.2, %v192_v56  ;;  %v71_v61 = vld [vmem:[%s1071_s0 + $0xb8] sm:$0xff] }
  0x2a   :  { %444 = vst [vmem:[%s1073_s4] sm:$0xff] %v380_v0  ;;  %445 = vst [vmem:[%s1073_s4 + $0x8] sm:$0xff] %v381_v1  ;;  %v382_v3 = vsel %vm254_vm2, %v190_v54, %v318_v62  ;;  %v383_v4 = vsel %vm255_vm3, %v191_v55, %v319_v63  ;;  %vm257_vm5 = vcmp.gt.f32.partialorder %v193_v57, 0.0  ;;  %v321_v5 = vmul.f32 0.2, %v193_v57  ;;  %v72_v62 = vld [vmem:[%s1071_s0 + $0xc0] sm:$0xff] }
  0x2b   :  { %446 = vst [vmem:[%s1073_s4 + $0x10] sm:$0xff] %v382_v3  ;;  %447 = vst [vmem:[%s1073_s4 + $0x18] sm:$0xff] %v383_v4  ;;  %v384_v6 = vsel %vm256_vm4, %v192_v56, %v320_v2  ;;  %vm258_vm6 = vcmp.gt.f32.partialorder %v194_v58, 0.0  ;;  %v322_v7 = vmul.f32 0.2, %v194_v58  ;;  %vm259_vm7 = vcmp.gt.f32.partialorder %v195_v59, 0.0 }
  0x2c   :  { %448 = vst [vmem:[%s1073_s4 + $0x20] sm:$0xff] %v384_v6  ;;  %v385_v8 = vsel %vm257_vm5, %v193_v57, %v321_v5  ;;  %v323_v9 = vmul.f32 0.2, %v195_v59  ;;  %v196_v10 = vadd.f32 %v601_v44, %v126_v46  ;;  %v197_v11 = vadd.f32 %v601_v44, %v127_v47  ;;  %v70_v56 = vld [vmem:[%s1071_s0 + $0xb0] sm:$0xff] }
  0x2d   :  { %449 = vst [vmem:[%s1073_s4 + $0x28] sm:$0xff] %v385_v8  ;;  %v386_v12 = vsel %vm258_vm6, %v194_v58, %v322_v7  ;;  %v198_v13 = vadd.f32 %v601_v44, %v128_v48  ;;  %v199_v14 = vadd.f32 %v601_v44, %v129_v49  ;;  %v200_v15 = vadd.f32 %v601_v44, %v130_v50  ;;  %v68_v49 = vld [vmem:[%s1071_s0 + $0xa0] sm:$0xff]  ;;  %v69_v50 = vld [vmem:[%s1071_s0 + $0xa8] sm:$0xff] }
  0x2e   :  { %450 = vst [vmem:[%s1073_s4 + $0x30] sm:$0xff] %v386_v12  ;;  %v387_v17 = vsel %vm259_vm7, %v195_v59, %v323_v9  ;;  %vm260_vm8 = vcmp.gt.f32.partialorder %v196_v10, 0.0  ;;  %v324_v18 = vmul.f32 0.2, %v196_v10  ;;  %vm261_vm9 = vcmp.gt.f32.partialorder %v197_v11, 0.0  ;;  %v73_v9 = vld [vmem:[%s1071_s0 + $0xc8] sm:$0xff] }
  0x2f   :  { %451 = vst [vmem:[%s1073_s4 + $0x38] sm:$0xff] %v387_v17  ;;  %v325_v21 = vmul.f32 0.2, %v197_v11  ;;  %vm262_vm10 = vcmp.gt.f32.partialorder %v198_v13, 0.0  ;;  %v326_v22 = vmul.f32 0.2, %v198_v13  ;;  %v201_v30 = vadd.f32 %v601_v44, %v610_v51 }
  0x30   :  { %vm263_vm11 = vcmp.gt.f32.partialorder %v199_v14, 0.0  ;;  %v388_v23 = vsel %vm260_vm8, %v196_v10, %v324_v18  ;;  %v327_v24 = vmul.f32 0.2, %v199_v14  ;;  %vm264_vm12 = vcmp.gt.f32.partialorder %v200_v15, 0.0 }
  0x31   :  { %v328_v25 = vmul.f32 0.2, %v200_v15  ;;  %452 = vst [vmem:[%s1073_s4 + $0x40] sm:$0xff] %v388_v23  ;;  %v389_v28 = vsel %vm261_vm9, %v197_v11, %v325_v21  ;;  %v390_v29 = vsel %vm262_vm10, %v198_v13, %v326_v22  ;;  %v132_v31 = vmul.f32 %v565_v26, %v62_v16  ;;  %v74_v16 = vld [vmem:[%s1071_s0 + $0xd0] sm:$0xff]  ;;  %v76_v21 = vld [vmem:[%s1071_s0 + $0xe0] sm:$0xff]  ;;  %v77_v22 = vld [vmem:[%s1071_s0 + $0xe8] sm:$0xff] }
  0x32   :  { %453 = vst [vmem:[%s1073_s4 + $0x48] sm:$0xff] %v389_v28  ;;  %454 = vst [vmem:[%s1073_s4 + $0x50] sm:$0xff] %v390_v29  ;;  %v391_v34 = vsel %vm263_vm11, %v199_v14, %v327_v24  ;;  %v133_v36 = vmul.f32 %v565_v26, %v63_v19  ;;  %v134_v37 = vmul.f32 %v565_v26, %v64_v20  ;;  %vm265_vm13 = vcmp.gt.f32.partialorder %v201_v30, 0.0  ;;  %v75_v20 = vld [vmem:[%s1071_s0 + $0xd8] sm:$0xff] }
  0x33   :  { %v392_v35 = vsel %vm264_vm12, %v200_v15, %v328_v25  ;;  %455 = vst [vmem:[%s1073_s4 + $0x58] sm:$0xff] %v391_v34  ;;  %v329_v38 = vmul.f32 0.2, %v201_v30  ;;  %v202_v39 = vadd.f32 %v601_v44, %v132_v31  ;;  %v135_v40 = vmul.f32 %v565_v26, %v65_v27 }
  0x34   :  { %456 = vst [vmem:[%s1073_s4 + $0x60] sm:$0xff] %v392_v35  ;;  %v203_v41 = vadd.f32 %v601_v44, %v133_v36  ;;  %v204_v42 = vadd.f32 %v601_v44, %v134_v37  ;;  %v136_v43 = vmul.f32 %v565_v26, %v66_v32  ;;  %v137_v45 = vmul.f32 %v565_v26, %v67_v33  ;;  %v79_v35 = vld [vmem:[%s1071_s0 + $0xf8] sm:$0xff] }
  0x35   :  { %v393_v46 = vsel %vm265_vm13, %v201_v30, %v329_v38  ;;  %vm266_vm14 = vcmp.gt.f32.partialorder %v202_v39, 0.0  ;;  %v330_v47 = vmul.f32 0.2, %v202_v39  ;;  %v205_v48 = vadd.f32 %v601_v44, %v135_v40  ;;  %v78_v30 = vld [vmem:[%s1071_s0 + $0xf0] sm:$0xff] }
  0x36   :  { %457 = vst [vmem:[%s1073_s4 + $0x68] sm:$0xff] %v393_v46  ;;  %vm267_vm15 = vcmp.gt.f32.partialorder %v203_v41, 0.0  ;;  %v331_v51 = vmul.f32 0.2, %v203_v41  ;;  %vm268_vm0 = vcmp.gt.f32.partialorder %v204_v42, 0.0  ;;  %v206_v55 = vadd.f32 %v601_v44, %v136_v43 }
  0x37   :  { %v332_v52 = vmul.f32 0.2, %v204_v42  ;;  %v394_v53 = vsel %vm266_vm14, %v202_v39, %v330_v47  ;;  %vm269_vm1 = vcmp.gt.f32.partialorder %v205_v48, 0.0  ;;  %v333_v54 = vmul.f32 0.2, %v205_v48  ;;  %v80_v47 = vld [vmem:[%s1071_s0 + $0x100] sm:$0xff] }
  0x38   :  { %458 = vst [vmem:[%s1073_s4 + $0x70] sm:$0xff] %v394_v53  ;;  %v395_v57 = vsel %vm267_vm15, %v203_v41, %v331_v51  ;;  %v207_v59 = vadd.f32 %v601_v44, %v137_v45  ;;  %v138_v60 = vmul.f32 %v565_v26, %v68_v49  ;;  %vm270_vm2 = vcmp.gt.f32.partialorder %v206_v55, 0.0 }
  0x39   :  { %v396_v58 = vsel %vm268_vm0, %v204_v42, %v332_v52  ;;  %459 = vst [vmem:[%s1073_s4 + $0x78] sm:$0xff] %v395_v57  ;;  %v397_v63 = vsel %vm269_vm1, %v205_v48, %v333_v54  ;;  %v334_v0 = vmul.f32 0.2, %v206_v55  ;;  %v139_v1 = vmul.f32 %v565_v26, %v69_v50  ;;  %v81_v48 = vld [vmem:[%s1071_s0 + $0x108] sm:$0xff]  ;;  %v82_v54 = vld [vmem:[%s1071_s0 + $0x110] sm:$0xff] }
  0x3a   :  { %460 = vst [vmem:[%s1073_s4 + $0x80] sm:$0xff] %v396_v58  ;;  %461 = vst [vmem:[%s1073_s4 + $0x88] sm:$0xff] %v397_v63  ;;  %vm271_vm3 = vcmp.gt.f32.partialorder %v207_v59, 0.0  ;;  %v335_v2 = vmul.f32 0.2, %v207_v59  ;;  %v208_v3 = vadd.f32 %v601_v44, %v138_v60  ;;  %v140_v4 = vmul.f32 %v565_v26, %v70_v56  ;;  %v84_v60 = vld [vmem:[%s1071_s0 + $0x120] sm:$0xff] }
  0x3b   :  { %v398_v5 = vsel %vm270_vm2, %v206_v55, %v334_v0  ;;  %v209_v6 = vadd.f32 %v601_v44, %v139_v1  ;;  %v141_v7 = vmul.f32 %v565_v26, %v71_v61  ;;  %v142_v8 = vmul.f32 %v565_v26, %v72_v62 }
  0x3c   :  { %462 = vst [vmem:[%s1073_s4 + $0x90] sm:$0xff] %v398_v5  ;;  %v399_v10 = vsel %vm271_vm3, %v207_v59, %v335_v2  ;;  %vm272_vm4 = vcmp.gt.f32.partialorder %v208_v3, 0.0  ;;  %v336_v11 = vmul.f32 0.2, %v208_v3  ;;  %v210_v12 = vadd.f32 %v601_v44, %v140_v4  ;;  %v83_v59 = vld [vmem:[%s1071_s0 + $0x118] sm:$0xff] }
  0x3d   :  { %463 = vst [vmem:[%s1073_s4 + $0x98] sm:$0xff] %v399_v10  ;;  %vm273_vm5 = vcmp.gt.f32.partialorder %v209_v6, 0.0  ;;  %v337_v13 = vmul.f32 0.2, %v209_v6  ;;  %v211_v14 = vadd.f32 %v601_v44, %v141_v7  ;;  %v212_v15 = vadd.f32 %v601_v44, %v142_v8  ;;  %v85_v7 = vld [vmem:[%s1071_s0 + $0x128] sm:$0xff] }
  0x3e   :  { %v400_v17 = vsel %vm272_vm4, %v208_v3, %v336_v11  ;;  %vm274_vm6 = vcmp.gt.f32.partialorder %v210_v12, 0.0  ;;  %v338_v18 = vmul.f32 0.2, %v210_v12  ;;  %v143_v19 = vmul.f32 %v565_v26, %v73_v9 }
  0x3f   :  { %464 = vst [vmem:[%s1073_s4 + $0xa0] sm:$0xff] %v400_v17  ;;  %v401_v23 = vsel %vm273_vm5, %v209_v6, %v337_v13  ;;  %vm275_vm7 = vcmp.gt.f32.partialorder %v211_v14, 0.0  ;;  %v339_v24 = vmul.f32 0.2, %v211_v14  ;;  %vm276_vm8 = vcmp.gt.f32.partialorder %v212_v15, 0.0 }
  0x40   :  { %465 = vst [vmem:[%s1073_s4 + $0xa8] sm:$0xff] %v401_v23  ;;  %v402_v25 = vsel %vm274_vm6, %v210_v12, %v338_v18  ;;  %v340_v27 = vmul.f32 0.2, %v212_v15  ;;  %v213_v28 = vadd.f32 %v601_v44, %v143_v19  ;;  %v144_v29 = vmul.f32 %v565_v26, %v74_v16  ;;  %v87_v18 = vld [vmem:[%s1071_s0 + $0x138] sm:$0xff]  ;;  %v88_v19 = vld [vmem:[%s1071_s0 + $0x140] sm:$0xff] }
  0x41   :  { %466 = vst [vmem:[%s1073_s4 + $0xb0] sm:$0xff] %v402_v25  ;;  %v403_v31 = vsel %vm275_vm7, %v211_v14, %v339_v24  ;;  %v145_v32 = vmul.f32 %v565_v26, %v75_v20  ;;  %v146_v33 = vmul.f32 %v565_v26, %v76_v21  ;;  %v147_v34 = vmul.f32 %v565_v26, %v77_v22  ;;  %v86_v14 = vld [vmem:[%s1071_s0 + $0x130] sm:$0xff]  ;;  %v89_v20 = vld [vmem:[%s1071_s0 + $0x148] sm:$0xff] }
  0x42   :  { %467 = vst [vmem:[%s1073_s4 + $0xb8] sm:$0xff] %v403_v31  ;;  %v404_v36 = vsel %vm276_vm8, %v212_v15, %v340_v27  ;;  %vm277_vm9 = vcmp.gt.f32.partialorder %v213_v28, 0.0  ;;  %v341_v37 = vmul.f32 0.2, %v213_v28  ;;  %v214_v38 = vadd.f32 %v601_v44, %v144_v29 }
  0x43   :  { %468 = vst [vmem:[%s1073_s4 + $0xc0] sm:$0xff] %v404_v36  ;;  %v215_v39 = vadd.f32 %v601_v44, %v145_v32  ;;  %v216_v40 = vadd.f32 %v601_v44, %v146_v33  ;;  %v217_v41 = vadd.f32 %v601_v44, %v147_v34  ;;  %v148_v42 = vmul.f32 %v565_v26, %v78_v30  ;;  %v91_v33 = vld [vmem:[%s1071_s0 + $0x158] sm:$0xff] }
  0x44   :  { %v405_v43 = vsel %vm277_vm9, %v213_v28, %v341_v37  ;;  %vm278_vm10 = vcmp.gt.f32.partialorder %v214_v38, 0.0  ;;  %v342_v45 = vmul.f32 0.2, %v214_v38  ;;  %v149_v46 = vmul.f32 %v565_v26, %v79_v35  ;;  %v90_v28 = vld [vmem:[%s1071_s0 + $0x150] sm:$0xff] }
  0x45   :  { %469 = vst [vmem:[%s1073_s4 + $0xc8] sm:$0xff] %v405_v43  ;;  %vm279_vm11 = vcmp.gt.f32.partialorder %v215_v39, 0.0  ;;  %v343_v49 = vmul.f32 0.2, %v215_v39  ;;  %vm280_vm12 = vcmp.gt.f32.partialorder %v216_v40, 0.0  ;;  %vm281_vm13 = vcmp.gt.f32.partialorder %v217_v41, 0.0 }
  0x46   :  { %v344_v50 = vmul.f32 0.2, %v216_v40  ;;  %v406_v51 = vsel %vm278_vm10, %v214_v38, %v342_v45  ;;  %v345_v52 = vmul.f32 0.2, %v217_v41  ;;  %v218_v53 = vadd.f32 %v601_v44, %v148_v42  ;;  %v92_v45 = vld [vmem:[%s1071_s0 + $0x160] sm:$0xff] }
  0x47   :  { %470 = vst [vmem:[%s1073_s4 + $0xd0] sm:$0xff] %v406_v51  ;;  %v407_v55 = vsel %vm279_vm11, %v215_v39, %v343_v49  ;;  %v219_v57 = vadd.f32 %v601_v44, %v149_v46  ;;  %v150_v58 = vmul.f32 %v565_v26, %v80_v47  ;;  %v151_v63 = vmul.f32 %v565_v26, %v81_v48  ;;  %v93_v46 = vld [vmem:[%s1071_s0 + $0x168] sm:$0xff] }
  0x48   :  { %v408_v56 = vsel %vm280_vm12, %v216_v40, %v344_v50  ;;  %471 = vst [vmem:[%s1073_s4 + $0xd8] sm:$0xff] %v407_v55  ;;  %v409_v61 = vsel %vm281_vm13, %v217_v41, %v345_v52  ;;  %vm282_vm14 = vcmp.gt.f32.partialorder %v218_v53, 0.0  ;;  %v346_v62 = vmul.f32 0.2, %v218_v53  ;;  %v94_v52 = vld [vmem:[%s1071_s0 + $0x170] sm:$0xff] }
  0x49   :  { %472 = vst [vmem:[%s1073_s4 + $0xe0] sm:$0xff] %v408_v56  ;;  %473 = vst [vmem:[%s1073_s4 + $0xe8] sm:$0xff] %v409_v61  ;;  %vm283_vm15 = vcmp.gt.f32.partialorder %v219_v57, 0.0  ;;  %v347_v0 = vmul.f32 0.2, %v219_v57  ;;  %v220_v1 = vadd.f32 %v601_v44, %v150_v58  ;;  %v152_v2 = vmul.f32 %v565_v26, %v82_v54  ;;  %v96_v58 = vld [vmem:[%s1071_s0 + $0x180] sm:$0xff] }
  0x4a   :  { %v410_v3 = vsel %vm282_vm14, %v218_v53, %v346_v62  ;;  %v221_v4 = vadd.f32 %v601_v44, %v151_v63  ;;  %v153_v5 = vmul.f32 %v565_v26, %v83_v59  ;;  %v154_v6 = vmul.f32 %v565_v26, %v84_v60 }
  0x4b   :  { %474 = vst [vmem:[%s1073_s4 + $0xf0] sm:$0xff] %v410_v3  ;;  %v411_v8 = vsel %vm283_vm15, %v219_v57, %v347_v0  ;;  %vm284_vm0 = vcmp.gt.f32.partialorder %v220_v1, 0.0  ;;  %v348_v9 = vmul.f32 0.2, %v220_v1  ;;  %v222_v10 = vadd.f32 %v601_v44, %v152_v2  ;;  %v95_v57 = vld [vmem:[%s1071_s0 + $0x178] sm:$0xff] }
  0x4c   :  { %475 = vst [vmem:[%s1073_s4 + $0xf8] sm:$0xff] %v411_v8  ;;  %vm285_vm1 = vcmp.gt.f32.partialorder %v221_v4, 0.0  ;;  %v349_v11 = vmul.f32 0.2, %v221_v4  ;;  %v223_v12 = vadd.f32 %v601_v44, %v153_v5  ;;  %v224_v13 = vadd.f32 %v601_v44, %v154_v6  ;;  %v97_v5 = vld [vmem:[%s1071_s0 + $0x188] sm:$0xff] }
  0x4d   :  { %v412_v15 = vsel %vm284_vm0, %v220_v1, %v348_v9  ;;  %vm286_vm2 = vcmp.gt.f32.partialorder %v222_v10, 0.0  ;;  %v350_v16 = vmul.f32 0.2, %v222_v10  ;;  %v155_v17 = vmul.f32 %v565_v26, %v85_v7 }
  0x4e   :  { %476 = vst [vmem:[%s1073_s4 + $0x100] sm:$0xff] %v412_v15  ;;  %v413_v21 = vsel %vm285_vm1, %v221_v4, %v349_v11  ;;  %vm287_vm3 = vcmp.gt.f32.partialorder %v223_v12, 0.0  ;;  %v351_v22 = vmul.f32 0.2, %v223_v12  ;;  %vm288_vm4 = vcmp.gt.f32.partialorder %v224_v13, 0.0 }
  0x4f   :  { %477 = vst [vmem:[%s1073_s4 + $0x108] sm:$0xff] %v413_v21  ;;  %v414_v23 = vsel %vm286_vm2, %v222_v10, %v350_v16  ;;  %v352_v24 = vmul.f32 0.2, %v224_v13  ;;  %v225_v25 = vadd.f32 %v601_v44, %v155_v17  ;;  %v156_v27 = vmul.f32 %v565_v26, %v86_v14  ;;  %v99_v16 = vld [vmem:[%s1071_s0 + $0x198] sm:$0xff]  ;;  %v100_v17 = vld [vmem:[%s1071_s0 + $0x1a0] sm:$0xff] }
  0x50   :  { %478 = vst [vmem:[%s1073_s4 + $0x110] sm:$0xff] %v414_v23  ;;  %v415_v29 = vsel %vm287_vm3, %v223_v12, %v351_v22  ;;  %v157_v30 = vmul.f32 %v565_v26, %v87_v18  ;;  %v158_v31 = vmul.f32 %v565_v26, %v88_v19  ;;  %v159_v32 = vmul.f32 %v565_v26, %v89_v20  ;;  %v98_v12 = vld [vmem:[%s1071_s0 + $0x190] sm:$0xff]  ;;  %v101_v18 = vld [vmem:[%s1071_s0 + $0x1a8] sm:$0xff] }
  0x51   :  { %479 = vst [vmem:[%s1073_s4 + $0x118] sm:$0xff] %v415_v29  ;;  %v416_v34 = vsel %vm288_vm4, %v224_v13, %v352_v24  ;;  %vm289_vm5 = vcmp.gt.f32.partialorder %v225_v25, 0.0  ;;  %v353_v35 = vmul.f32 0.2, %v225_v25  ;;  %v226_v36 = vadd.f32 %v601_v44, %v156_v27 }
  0x52   :  { %480 = vst [vmem:[%s1073_s4 + $0x120] sm:$0xff] %v416_v34  ;;  %v227_v37 = vadd.f32 %v601_v44, %v157_v30  ;;  %v228_v38 = vadd.f32 %v601_v44, %v158_v31  ;;  %v229_v39 = vadd.f32 %v601_v44, %v159_v32  ;;  %v160_v40 = vmul.f32 %v565_v26, %v90_v28  ;;  %v103_v31 = vld [vmem:[%s1071_s0 + $0x1b8] sm:$0xff] }
  0x53   :  { %v417_v41 = vsel %vm289_vm5, %v225_v25, %v353_v35  ;;  %vm290_vm6 = vcmp.gt.f32.partialorder %v226_v36, 0.0  ;;  %v354_v42 = vmul.f32 0.2, %v226_v36  ;;  %v161_v43 = vmul.f32 %v565_v26, %v91_v33  ;;  %v102_v25 = vld [vmem:[%s1071_s0 + $0x1b0] sm:$0xff] }
  0x54   :  { %481 = vst [vmem:[%s1073_s4 + $0x128] sm:$0xff] %v417_v41  ;;  %vm291_vm7 = vcmp.gt.f32.partialorder %v227_v37, 0.0  ;;  %v355_v47 = vmul.f32 0.2, %v227_v37  ;;  %vm292_vm8 = vcmp.gt.f32.partialorder %v228_v38, 0.0  ;;  %vm293_vm9 = vcmp.gt.f32.partialorder %v229_v39, 0.0 }
  0x55   :  { %v356_v48 = vmul.f32 0.2, %v228_v38  ;;  %v418_v49 = vsel %vm290_vm6, %v226_v36, %v354_v42  ;;  %v357_v50 = vmul.f32 0.2, %v229_v39  ;;  %v230_v51 = vadd.f32 %v601_v44, %v160_v40  ;;  %v104_v42 = vld [vmem:[%s1071_s0 + $0x1c0] sm:$0xff] }
  0x56   :  { %482 = vst [vmem:[%s1073_s4 + $0x130] sm:$0xff] %v418_v49  ;;  %v419_v53 = vsel %vm291_vm7, %v227_v37, %v355_v47  ;;  %v231_v55 = vadd.f32 %v601_v44, %v161_v43  ;;  %v162_v56 = vmul.f32 %v565_v26, %v92_v45  ;;  %v163_v61 = vmul.f32 %v565_v26, %v93_v46  ;;  %v105_v43 = vld [vmem:[%s1071_s0 + $0x1c8] sm:$0xff] }
  0x57   :  { %v420_v54 = vsel %vm292_vm8, %v228_v38, %v356_v48  ;;  %483 = vst [vmem:[%s1073_s4 + $0x138] sm:$0xff] %v419_v53  ;;  %v421_v59 = vsel %vm293_vm9, %v229_v39, %v357_v50  ;;  %vm294_vm10 = vcmp.gt.f32.partialorder %v230_v51, 0.0  ;;  %v358_v60 = vmul.f32 0.2, %v230_v51  ;;  %v106_v50 = vld [vmem:[%s1071_s0 + $0x1d0] sm:$0xff] }
  0x58   :  { %484 = vst [vmem:[%s1073_s4 + $0x140] sm:$0xff] %v420_v54  ;;  %485 = vst [vmem:[%s1073_s4 + $0x148] sm:$0xff] %v421_v59  ;;  %vm295_vm11 = vcmp.gt.f32.partialorder %v231_v55, 0.0  ;;  %v359_v62 = vmul.f32 0.2, %v231_v55  ;;  %v232_v63 = vadd.f32 %v601_v44, %v162_v56  ;;  %v164_v0 = vmul.f32 %v565_v26, %v94_v52  ;;  %v108_v56 = vld [vmem:[%s1071_s0 + $0x1e0] sm:$0xff] }
  0x59   :  { %v422_v1 = vsel %vm294_vm10, %v230_v51, %v358_v60  ;;  %v233_v2 = vadd.f32 %v601_v44, %v163_v61  ;;  %v165_v3 = vmul.f32 %v565_v26, %v95_v57  ;;  %v166_v4 = vmul.f32 %v565_v26, %v96_v58 }
  0x5a   :  { %486 = vst [vmem:[%s1073_s4 + $0x150] sm:$0xff] %v422_v1  ;;  %v423_v6 = vsel %vm295_vm11, %v231_v55, %v359_v62  ;;  %vm296_vm12 = vcmp.gt.f32.partialorder %v232_v63, 0.0  ;;  %v360_v7 = vmul.f32 0.2, %v232_v63  ;;  %v234_v8 = vadd.f32 %v601_v44, %v164_v0  ;;  %v107_v55 = vld [vmem:[%s1071_s0 + $0x1d8] sm:$0xff] }
  0x5b   :  { %487 = vst [vmem:[%s1073_s4 + $0x158] sm:$0xff] %v423_v6  ;;  %vm297_vm13 = vcmp.gt.f32.partialorder %v233_v2, 0.0  ;;  %v361_v9 = vmul.f32 0.2, %v233_v2  ;;  %v235_v10 = vadd.f32 %v601_v44, %v165_v3  ;;  %v236_v11 = vadd.f32 %v601_v44, %v166_v4  ;;  %v109_v3 = vld [vmem:[%s1071_s0 + $0x1e8] sm:$0xff] }
  0x5c   :  { %v424_v13 = vsel %vm296_vm12, %v232_v63, %v360_v7  ;;  %vm298_vm14 = vcmp.gt.f32.partialorder %v234_v8, 0.0  ;;  %v362_v14 = vmul.f32 0.2, %v234_v8  ;;  %v167_v15 = vmul.f32 %v565_v26, %v97_v5 }
  0x5d   :  { %488 = vst [vmem:[%s1073_s4 + $0x160] sm:$0xff] %v424_v13  ;;  %v425_v19 = vsel %vm297_vm13, %v233_v2, %v361_v9  ;;  %vm299_vm15 = vcmp.gt.f32.partialorder %v235_v10, 0.0  ;;  %v363_v20 = vmul.f32 0.2, %v235_v10  ;;  %vm300_vm0 = vcmp.gt.f32.partialorder %v236_v11, 0.0 }
  0x5e   :  { %489 = vst [vmem:[%s1073_s4 + $0x168] sm:$0xff] %v425_v19  ;;  %v426_v21 = vsel %vm298_vm14, %v234_v8, %v362_v14  ;;  %v364_v22 = vmul.f32 0.2, %v236_v11  ;;  %v237_v23 = vadd.f32 %v601_v44, %v167_v15  ;;  %v168_v24 = vmul.f32 %v565_v26, %v98_v12  ;;  %v111_v14 = vld [vmem:[%s1071_s0 + $0x1f8] sm:$0xff] }
  0x5f   :  { %490 = vst [vmem:[%s1073_s4 + $0x170] sm:$0xff] %v426_v21  ;;  %v427_v27 = vsel %vm299_vm15, %v235_v10, %v363_v20  ;;  %v169_v28 = vmul.f32 %v565_v26, %v99_v16  ;;  %v170_v29 = vmul.f32 %v565_v26, %v100_v17  ;;  %v171_v30 = vmul.f32 %v565_v26, %v101_v18  ;;  %v110_v10 = vld [vmem:[%s1071_s0 + $0x1f0] sm:$0xff] }
  0x60   :  { %491 = vst [vmem:[%s1073_s4 + $0x178] sm:$0xff] %v427_v27  ;;  %v428_v32 = vsel %vm300_vm0, %v236_v11, %v364_v22  ;;  %vm301_vm1 = vcmp.gt.f32.partialorder %v237_v23, 0.0  ;;  %v365_v33 = vmul.f32 0.2, %v237_v23  ;;  %v238_v34 = vadd.f32 %v601_v44, %v168_v24 }
  0x61   :  { %492 = vst [vmem:[%s1073_s4 + $0x180] sm:$0xff] %v428_v32  ;;  %v239_v35 = vadd.f32 %v601_v44, %v169_v28  ;;  %v240_v36 = vadd.f32 %v601_v44, %v170_v29  ;;  %v241_v37 = vadd.f32 %v601_v44, %v171_v30  ;;  %v172_v38 = vmul.f32 %v565_v26, %v102_v25 }
  0x62   :  { %v429_v39 = vsel %vm301_vm1, %v237_v23, %v365_v33  ;;  %vm302_vm2 = vcmp.gt.f32.partialorder %v238_v34, 0.0  ;;  %v366_v40 = vmul.f32 0.2, %v238_v34  ;;  %v173_v41 = vmul.f32 %v565_v26, %v103_v31 }
  0x63   :  { %493 = vst [vmem:[%s1073_s4 + $0x188] sm:$0xff] %v429_v39  ;;  %vm303_vm3 = vcmp.gt.f32.partialorder %v239_v35, 0.0  ;;  %v367_v45 = vmul.f32 0.2, %v239_v35  ;;  %vm304_vm4 = vcmp.gt.f32.partialorder %v240_v36, 0.0  ;;  %vm305_vm5 = vcmp.gt.f32.partialorder %v241_v37, 0.0 }
  0x64   :  { %v368_v46 = vmul.f32 0.2, %v240_v36  ;;  %v430_v47 = vsel %vm302_vm2, %v238_v34, %v366_v40  ;;  %v369_v48 = vmul.f32 0.2, %v241_v37  ;;  %v242_v49 = vadd.f32 %v601_v44, %v172_v38 }
  0x65   :  { %494 = vst [vmem:[%s1073_s4 + $0x190] sm:$0xff] %v430_v47  ;;  %v431_v51 = vsel %vm303_vm3, %v239_v35, %v367_v45  ;;  %v243_v53 = vadd.f32 %v601_v44, %v173_v41  ;;  %v174_v54 = vmul.f32 %v565_v26, %v104_v42  ;;  %v175_v59 = vmul.f32 %v565_v26, %v105_v43 }
  0x66   :  { %v432_v52 = vsel %vm304_vm4, %v240_v36, %v368_v46  ;;  %495 = vst [vmem:[%s1073_s4 + $0x198] sm:$0xff] %v431_v51  ;;  %v433_v57 = vsel %vm305_vm5, %v241_v37, %v369_v48  ;;  %vm306_vm6 = vcmp.gt.f32.partialorder %v242_v49, 0.0  ;;  %v370_v58 = vmul.f32 0.2, %v242_v49 }
  0x67   :  { %496 = vst [vmem:[%s1073_s4 + $0x1a0] sm:$0xff] %v432_v52  ;;  %497 = vst [vmem:[%s1073_s4 + $0x1a8] sm:$0xff] %v433_v57  ;;  %vm307_vm7 = vcmp.gt.f32.partialorder %v243_v53, 0.0  ;;  %v371_v60 = vmul.f32 0.2, %v243_v53  ;;  %v244_v61 = vadd.f32 %v601_v44, %v174_v54  ;;  %v176_v62 = vmul.f32 %v565_v26, %v106_v50 }
  0x68   :  { %v434_v63 = vsel %vm306_vm6, %v242_v49, %v370_v58  ;;  %v245_v0 = vadd.f32 %v601_v44, %v175_v59  ;;  %v177_v1 = vmul.f32 %v565_v26, %v107_v55  ;;  %v178_v2 = vmul.f32 %v565_v26, %v108_v56 }
  0x69   :  { %498 = vst [vmem:[%s1073_s4 + $0x1b0] sm:$0xff] %v434_v63  ;;  %v435_v4 = vsel %vm307_vm7, %v243_v53, %v371_v60  ;;  %vm308_vm8 = vcmp.gt.f32.partialorder %v244_v61, 0.0  ;;  %v372_v5 = vmul.f32 0.2, %v244_v61  ;;  %v246_v6 = vadd.f32 %v601_v44, %v176_v62 }
  0x6a   :  { %499 = vst [vmem:[%s1073_s4 + $0x1b8] sm:$0xff] %v435_v4  ;;  %vm309_vm9 = vcmp.gt.f32.partialorder %v245_v0, 0.0  ;;  %v373_v7 = vmul.f32 0.2, %v245_v0  ;;  %v247_v8 = vadd.f32 %v601_v44, %v177_v1  ;;  %v248_v9 = vadd.f32 %v601_v44, %v178_v2 }
  0x6b   :  { %v436_v11 = vsel %vm308_vm8, %v244_v61, %v372_v5  ;;  %vm310_vm10 = vcmp.gt.f32.partialorder %v246_v6, 0.0  ;;  %v374_v12 = vmul.f32 0.2, %v246_v6  ;;  %v179_v13 = vmul.f32 %v565_v26, %v109_v3 }
  0x6c   :  { %500 = vst [vmem:[%s1073_s4 + $0x1c0] sm:$0xff] %v436_v11  ;;  %v437_v15 = vsel %vm309_vm9, %v245_v0, %v373_v7  ;;  %vm311_vm11 = vcmp.gt.f32.partialorder %v247_v8, 0.0  ;;  %v375_v16 = vmul.f32 0.2, %v247_v8  ;;  %vm312_vm12 = vcmp.gt.f32.partialorder %v248_v9, 0.0 }
  0x6d   :  { %501 = vst [vmem:[%s1073_s4 + $0x1c8] sm:$0xff] %v437_v15  ;;  %v438_v17 = vsel %vm310_vm10, %v246_v6, %v374_v12  ;;  %v376_v18 = vmul.f32 0.2, %v248_v9  ;;  %v249_v19 = vadd.f32 %v601_v44, %v179_v13  ;;  %v180_v20 = vmul.f32 %v565_v26, %v110_v10 }
  0x6e   :  { %502 = vst [vmem:[%s1073_s4 + $0x1d0] sm:$0xff] %v438_v17  ;;  %v439_v21 = vsel %vm311_vm11, %v247_v8, %v375_v16  ;;  %v181_v22 = vmul.f32 %v565_v26, %v111_v14 }
  0x6f   :  { %503 = vst [vmem:[%s1073_s4 + $0x1d8] sm:$0xff] %v439_v21  ;;  %v440_v23 = vsel %vm312_vm12, %v248_v9, %v376_v18  ;;  %vm313_vm13 = vcmp.gt.f32.partialorder %v249_v19, 0.0  ;;  %v377_v24 = vmul.f32 0.2, %v249_v19  ;;  %v250_v25 = vadd.f32 %v601_v44, %v180_v20 }
  0x70   :  { %504 = vst [vmem:[%s1073_s4 + $0x1e0] sm:$0xff] %v440_v23  ;;  %v251_v27 = vadd.f32 %v601_v44, %v181_v22 }
  0x71   :  { %v441_v28 = vsel %vm313_vm13, %v249_v19, %v377_v24  ;;  %vm314_vm14 = vcmp.gt.f32.partialorder %v250_v25, 0.0  ;;  %v378_v29 = vmul.f32 0.2, %v250_v25 }
  0x72   :  { %505 = vst [vmem:[%s1073_s4 + $0x1e8] sm:$0xff] %v441_v28  ;;  %vm315_vm15 = vcmp.gt.f32.partialorder %v251_v27, 0.0  ;;  %v379_v26 = vmul.f32 0.2, %v251_v27 }
  0x73   :  { %v442_v30 = vsel %vm314_vm14, %v250_v25, %v378_v29 }
  0x74   :  { %506 = vst [vmem:[%s1073_s4 + $0x1f0] sm:$0xff] %v442_v30  ;;  %v443_v31 = vsel %vm315_vm15, %v251_v27, %v379_v26 }
  0x75   :  { %507 = vst [vmem:[%s1073_s4 + $0x1f8] sm:$0xff] %v443_v31 }

// kernel: forward.11
= control target key start
LH: loop header
LB: loop body
LE: loop exit
PB: predicated region body
PF: predicated region fallthrough
CT: control target
= control target key end

     0   :  { %vm409_vm0 = vcmask 1040384   ;;  %s757_s1 = inlined_call_operand.vmem [shape: bf16[256,128], index: 1, kind: input, shape index: {}]   ;;  %s758_s0 = inlined_call_operand.vmem [shape: bf16[128,256], index: 0, kind: input, shape index: {}]   ;;  %s759_s2 = inlined_call_operand.vmem [shape: f32[128,128], index: 2, kind: output, shape index: {0}]   ;;  %s760_s3 = inlined_call_operand.vmem [shape: f32[1,2,128], index: 3, kind: output, shape index: {1}]  }
   0x1   :  { %v532_v0 = vld [vmem:[%s757_s1 + $0x40] sm:$0xff]   ;;  %v534_v2 = vld [vmem:[%s757_s1 + $0x48] sm:$0xff]   ;;  %v536_v4 = vld [vmem:[%s757_s1 + $0x50] sm:$0xff]  }
   0x2   :  { %v533_v1 = vld [vmem:[%s757_s1] sm:$0xff]   ;;  %452 = vmatprep.subr.bf16.mxu0 %v532_v0  ;;  %516 = vmatprep.subr.bf16.mxu1 %v532_v0  ;;  %v535_v3 = vld [vmem:[%s757_s1 + $0x8] sm:$0xff]   ;;  %v537_v5 = vld [vmem:[%s757_s1 + $0x10] sm:$0xff]  }
   0x3   :  { %453 = vmatpush3.bf16.msra.mxu0 %v533_v1  ;;  %524 = vmatpush3.bf16.msra.mxu1 %v533_v1  ;;  %v538_v6 = vld [vmem:[%s757_s1 + $0x58] sm:$0xff]   ;;  %v540_v8 = vld [vmem:[%s757_s1 + $0x60] sm:$0xff]   ;;  %v542_v10 = vld [vmem:[%s757_s1 + $0x68] sm:$0xff]  }
   0x4   :  { %454 = vmatprep.subr.bf16.mxu0 %v534_v2  ;;  %517 = vmatprep.subr.bf16.mxu1 %v534_v2  ;;  %v539_v7 = vld [vmem:[%s757_s1 + $0x18] sm:$0xff]   ;;  %v541_v9 = vld [vmem:[%s757_s1 + $0x20] sm:$0xff]   ;;  %v543_v12 = vld [vmem:[%s757_s1 + $0x28] sm:$0xff]  }
   0x5   :  { %v550_v11 = vld [vmem:[%s758_s0 + $0x4] ss:$8 sps:$4 sm:$0xff]   ;;  %v544_v14 = vld [vmem:[%s757_s1 + $0x70] sm:$0xff]   ;;  %v546_v16 = vld [vmem:[%s757_s1 + $0x78] sm:$0xff]  }
   0x6   :  { %v556_v13 = vld [vmem:[%s758_s0 + $0x44] ss:$8 sps:$4 sm:$0xff]   ;;  %270 = vmatprep.mubr.bf16.mxu0 %v550_v11  ;;  %v545_v15 = vld [vmem:[%s757_s1 + $0x30] sm:$0xff]   ;;  %v547_v17 = vld [vmem:[%s757_s1 + $0x38] sm:$0xff]  }
   0x7   :  { %455 = vmatpush3.bf16.msra.mxu0 %v535_v3  ;;  %525 = vmatpush3.bf16.msra.mxu1 %v535_v3  ;;  %v548_v18 = vld [vmem:[%s758_s0] ss:$8 sps:$4 sm:$0xff]   ;;  %v551_v20 = vld [vmem:[%s758_s0 + $0x14] ss:$8 sps:$4 sm:$0xff]   ;;  %v553_v22 = vld [vmem:[%s758_s0 + $0x10] ss:$8 sps:$4 sm:$0xff]  }
   0x8   :  { %456 = vmatprep.subr.bf16.mxu0 %v536_v4  ;;  %518 = vmatprep.subr.bf16.mxu1 %v536_v4  ;;  %v554_v19 = vld [vmem:[%s758_s0 + $0x40] ss:$8 sps:$4 sm:$0xff]   ;;  %v560_v21 = vld [vmem:[%s758_s0 + $0x54] ss:$8 sps:$4 sm:$0xff]   ;;  %v562_v23 = vld [vmem:[%s758_s0 + $0x50] ss:$8 sps:$4 sm:$0xff]  }
   0x9   :  { %302 = vmatprep.mubr.bf16.mxu1 %v556_v13  ;;  %v557_v24 = vld [vmem:[%s758_s0 + $0x24] ss:$8 sps:$4 sm:$0xff]   ;;  %v559_v26 = vld [vmem:[%s758_s0 + $0x20] ss:$8 sps:$4 sm:$0xff]   ;;  %v563_v28 = vld [vmem:[%s758_s0 + $0x34] ss:$8 sps:$4 sm:$0xff]  }
   0xa   :  { %v566_v25 = vld [vmem:[%s758_s0 + $0x64] ss:$8 sps:$4 sm:$0xff]   ;;  %v568_v27 = vld [vmem:[%s758_s0 + $0x60] ss:$8 sps:$4 sm:$0xff]   ;;  %v569_v29 = vld [vmem:[%s758_s0 + $0x74] ss:$8 sps:$4 sm:$0xff]  }
   0xb   :  { %457 = vmatpush3.bf16.msra.mxu0 %v537_v5  ;;  %526 = vmatpush3.bf16.msra.mxu1 %v537_v5  ;;  %v565_v30 = vld [vmem:[%s758_s0 + $0x30] ss:$8 sps:$4 sm:$0xff]  }
   0xc   :  { %458 = vmatprep.subr.bf16.mxu0 %v538_v6  ;;  %519 = vmatprep.subr.bf16.mxu1 %v538_v6  ;;  %v571_v31 = vld [vmem:[%s758_s0 + $0x70] ss:$8 sps:$4 sm:$0xff]  }
   0xf   :  { %459 = vmatpush3.bf16.msra.mxu0 %v539_v7  ;;  %527 = vmatpush3.bf16.msra.mxu1 %v539_v7 }
  0x10   :  { %460 = vmatprep.subr.bf16.mxu0 %v540_v8  ;;  %520 = vmatprep.subr.bf16.mxu1 %v540_v8 }
  0x13   :  { %461 = vmatpush3.bf16.msra.mxu0 %v541_v9  ;;  %528 = vmatpush3.bf16.msra.mxu1 %v541_v9 }
  0x14   :  { %462 = vmatprep.subr.bf16.mxu0 %v542_v10  ;;  %521 = vmatprep.subr.bf16.mxu1 %v542_v10 }
  0x17   :  { %463 = vmatpush3.bf16.msra.mxu0 %v543_v12  ;;  %529 = vmatpush3.bf16.msra.mxu1 %v543_v12 }
  0x18   :  { %464 = vmatprep.subr.bf16.mxu0 %v544_v14  ;;  %522 = vmatprep.subr.bf16.mxu1 %v544_v14 }
  0x1b   :  { %465 = vmatpush3.bf16.msra.mxu0 %v545_v15  ;;  %530 = vmatpush3.bf16.msra.mxu1 %v545_v15 }
  0x1c   :  { %466 = vmatprep.subr.bf16.mxu0 %v546_v16  ;;  %523 = vmatprep.subr.bf16.mxu1 %v546_v16 }
  0x1f   :  { %467 = vmatpush3.bf16.msra.mxu0 %v547_v17  ;;  %531 = vmatpush3.bf16.msra.mxu1 %v547_v17 }
  0x22   :  { %271 = vmatmul.mubr.bf16.vlgmr.msra.gmra.mrb[0].mxu0 %v548_v18  ;;  %303 = vmatmul.mubr.bf16.vlgmr.msra.gmra.mrb[0].mxu1 %v554_v19 }
  0x23   :  { %278 = vmatprep.mubr.bf16.mxu0 %v551_v20  ;;  %310 = vmatprep.mubr.bf16.mxu1 %v560_v21 }
  0x2a   :  { %279 = vmatmul.mubr.bf16.gmra.mrb[4].mxu0 %v553_v22  ;;  %311 = vmatmul.mubr.bf16.gmra.mrb[4].mxu1 %v562_v23 }
  0x2b   :  { %286 = vmatprep.mubr.bf16.mxu0 %v557_v24  ;;  %318 = vmatprep.mubr.bf16.mxu1 %v566_v25 }
  0x32   :  { %287 = vmatmul.mubr.bf16.gmra.mrb[8].mxu0 %v559_v26  ;;  %319 = vmatmul.mubr.bf16.gmra.mrb[8].mxu1 %v568_v27 }
  0x33   :  { %294 = vmatprep.mubr.bf16.mxu0 %v563_v28  ;;  %326 = vmatprep.mubr.bf16.mxu1 %v569_v29 }
  0x3a   :  { %295 = vmatmul.mubr.bf16.gmra.mrb[12].mxu0 %v565_v30  ;;  %327 = vmatmul.mubr.bf16.gmra.mrb[12].mxu1 %v571_v31 }
  0xf5   :  { %v468_v32 = vpop.f32.mrb[0].mxu0  ;;  %v492_v33 = vpop.f32.mrb[0].mxu1 }
  0xf6   :  { %v469_v34 = vpop.f32.mrb[1].mxu0  ;;  %v493_v35 = vpop.f32.mrb[1].mxu1 }
  0xf7   :  { %v470_v36 = vadd.f32 %v469_v34, %v468_v32  ;;  %v471_v37 = vpop.f32.mrb[2].mxu0  ;;  %v688_v38 = vadd.f32 %v493_v35, %v492_v33  ;;  %v495_v39 = vpop.f32.mrb[2].mxu1 }
  0xf8   :  { %v472_v40 = vpop.f32.mrb[3].mxu0  ;;  %v496_v41 = vpop.f32.mrb[3].mxu1 }
  0xf9   :  { %335 = vst [vmem:[%s759_s2] sm:$0xff] %v470_v36  ;;  %v473_v42 = vadd.f32 %v472_v40, %v471_v37  ;;  %343 = vst [vmem:[%s759_s2 + $0x40] sm:$0xff] %v688_v38  ;;  %v697_v43 = vadd.f32 %v496_v41, %v495_v39  ;;  %v372_v44 = vmul.f32 %v470_v36, %v470_v36 }
  0xfa   :  { %v380_v37 = vmul.f32 %v688_v38, %v688_v38 }
  0xfb   :  { %336 = vst [vmem:[%s759_s2 + $0x8] sm:$0xff] %v473_v42  ;;  %v351_v45 = vadd.f32 %v473_v42, %v470_v36  ;;  %v373_v46 = vmul.f32 %v473_v42, %v473_v42  ;;  %344 = vst [vmem:[%s759_s2 + $0x48] sm:$0xff] %v697_v43  ;;  %v381_v41 = vmul.f32 %v697_v43, %v697_v43 }
  0xfd   :  { %v388_v47 = vadd.f32 %v373_v46, %v372_v44  ;;  %v474_v48 = vpop.f32.mrb[4].mxu0  ;;  %v498_v49 = vpop.f32.mrb[4].mxu1 }
  0xfe   :  { %v475_v50 = vpop.f32.mrb[5].mxu0  ;;  %v499_v51 = vpop.f32.mrb[5].mxu1 }
  0xff   :  { %v476_v52 = vadd.f32 %v475_v50, %v474_v48  ;;  %v477_v53 = vpop.f32.mrb[6].mxu0  ;;  %v706_v54 = vadd.f32 %v499_v51, %v498_v49  ;;  %v501_v55 = vpop.f32.mrb[6].mxu1 }
 0x100   :  { %v478_v56 = vpop.f32.mrb[7].mxu0  ;;  %v502_v57 = vpop.f32.mrb[7].mxu1 }
 0x101   :  { %337 = vst [vmem:[%s759_s2 + $0x10] sm:$0xff] %v476_v52  ;;  %v352_v58 = vadd.f32 %v476_v52, %v351_v45  ;;  %v374_v59 = vmul.f32 %v476_v52, %v476_v52  ;;  %v479_v60 = vadd.f32 %v478_v56, %v477_v53  ;;  %345 = vst [vmem:[%s759_s2 + $0x50] sm:$0xff] %v706_v54 }
 0x102   :  { %v503_v61 = vadd.f32 %v502_v57, %v501_v55  ;;  %v382_v45 = vmul.f32 %v706_v54, %v706_v54 }
 0x103   :  { %v389_v62 = vadd.f32 %v388_v47, %v374_v59  ;;  %338 = vst [vmem:[%s759_s2 + $0x18] sm:$0xff] %v479_v60  ;;  %v353_v63 = vadd.f32 %v479_v60, %v352_v58  ;;  %v375_v0 = vmul.f32 %v479_v60, %v479_v60 }
 0x104   :  { %346 = vst [vmem:[%s759_s2 + $0x58] sm:$0xff] %v503_v61  ;;  %v383_v48 = vmul.f32 %v503_v61, %v503_v61 }
 0x105   :  { %v390_v1 = vadd.f32 %v389_v62, %v375_v0  ;;  %v480_v2 = vpop.f32.mrb[8].mxu0  ;;  %v504_v3 = vpop.f32.mrb[8].mxu1 }
 0x106   :  { %v481_v4 = vpop.f32.mrb[9].mxu0  ;;  %v505_v5 = vpop.f32.mrb[9].mxu1 }
 0x107   :  { %v482_v6 = vadd.f32 %v481_v4, %v480_v2  ;;  %v483_v7 = vpop.f32.mrb[10].mxu0  ;;  %v506_v8 = vadd.f32 %v505_v5, %v504_v3  ;;  %v507_v9 = vpop.f32.mrb[10].mxu1 }
 0x108   :  { %v484_v10 = vpop.f32.mrb[11].mxu0  ;;  %v508_v11 = vpop.f32.mrb[11].mxu1 }
 0x109   :  { %339 = vst [vmem:[%s759_s2 + $0x20] sm:$0xff] %v482_v6  ;;  %v354_v12 = vadd.f32 %v482_v6, %v353_v63  ;;  %v376_v13 = vmul.f32 %v482_v6, %v482_v6  ;;  %v485_v14 = vadd.f32 %v484_v10, %v483_v7  ;;  %347 = vst [vmem:[%s759_s2 + $0x60] sm:$0xff] %v506_v8 }
 0x10a   :  { %v509_v15 = vadd.f32 %v508_v11, %v507_v9  ;;  %v384_v52 = vmul.f32 %v506_v8, %v506_v8 }
 0x10b   :  { %v391_v16 = vadd.f32 %v390_v1, %v376_v13  ;;  %340 = vst [vmem:[%s759_s2 + $0x28] sm:$0xff] %v485_v14  ;;  %v355_v17 = vadd.f32 %v485_v14, %v354_v12  ;;  %v377_v18 = vmul.f32 %v485_v14, %v485_v14 }
 0x10c   :  { %348 = vst [vmem:[%s759_s2 + $0x68] sm:$0xff] %v509_v15  ;;  %v385_v56 = vmul.f32 %v509_v15, %v509_v15 }
 0x10d   :  { %v392_v19 = vadd.f32 %v391_v16, %v377_v18  ;;  %v486_v20 = vpop.f32.mrb[12].mxu0  ;;  %v510_v21 = vpop.f32.mrb[12].mxu1 }
 0x10e   :  { %v487_v22 = vpop.f32.mrb[13].mxu0  ;;  %v511_v23 = vpop.f32.mrb[13].mxu1 }
 0x10f   :  { %v488_v24 = vadd.f32 %v487_v22, %v486_v20  ;;  %v489_v25 = vpop.f32.mrb[14].mxu0  ;;  %v512_v26 = vadd.f32 %v511_v23, %v510_v21  ;;  %v513_v27 = vpop.f32.mrb[14].mxu1 }
 0x110   :  { %v490_v28 = vpop.f32.mrb[15].mxu0  ;;  %v514_v29 = vpop.f32.mrb[15].mxu1 }
 0x111   :  { %341 = vst [vmem:[%s759_s2 + $0x30] sm:$0xff] %v488_v24  ;;  %v356_v30 = vadd.f32 %v488_v24, %v355_v17  ;;  %v378_v31 = vmul.f32 %v488_v24, %v488_v24  ;;  %v491_v32 = vadd.f32 %v490_v28, %v489_v25  ;;  %349 = vst [vmem:[%s759_s2 + $0x70] sm:$0xff] %v512_v26 }
 0x112   :  { %v515_v33 = vadd.f32 %v514_v29, %v513_v27  ;;  %v386_v57 = vmul.f32 %v512_v26, %v512_v26 }
 0x113   :  { %v393_v34 = vadd.f32 %v392_v19, %v378_v31  ;;  %342 = vst [vmem:[%s759_s2 + $0x38] sm:$0xff] %v491_v32  ;;  %v357_v35 = vadd.f32 %v491_v32, %v356_v30  ;;  %v379_v36 = vmul.f32 %v491_v32, %v491_v32 }
 0x114   :  { %350 = vst [vmem:[%s759_s2 + $0x78] sm:$0xff] %v515_v33  ;;  %v387_v62 = vmul.f32 %v515_v33, %v515_v33 }
 0x115   :  { %v358_v39 = vadd.f32 %v688_v38, %v357_v35  ;;  %v394_v40 = vadd.f32 %v393_v34, %v379_v36 }
 0x117   :  { %v359_v42 = vadd.f32 %v697_v43, %v358_v39  ;;  %v395_v44 = vadd.f32 %v394_v40, %v380_v37 }
 0x119   :  { %v396_v46 = vadd.f32 %v395_v44, %v381_v41  ;;  %v360_v47 = vadd.f32 %v706_v54, %v359_v42 }
 0x11b   :  { %v361_v49 = vadd.f32 %v503_v61, %v360_v47  ;;  %v397_v50 = vadd.f32 %v396_v46, %v382_v45 }
 0x11d   :  { %v362_v51 = vadd.f32 %v506_v8, %v361_v49  ;;  %v398_v53 = vadd.f32 %v397_v50, %v383_v48 }
 0x11f   :  { %v399_v38 = vadd.f32 %v398_v53, %v384_v52  ;;  %v363_v55 = vadd.f32 %v509_v15, %v362_v51 }
 0x121   :  { %v400_v58 = vadd.f32 %v399_v38, %v385_v56  ;;  %v364_v59 = vadd.f32 %v512_v26, %v363_v55 }
 0x123   :  { %v401_v43 = vadd.f32 %v400_v58, %v386_v57  ;;  %v365_v60 = vadd.f32 %v515_v33, %v364_v59 }
 0x125   :  { %v366_v63 = vrot.slane %v365_v60, 4  ;;  %v402_v0 = vadd.f32 %v401_v43, %v387_v62 }
 0x127   :  { %v367_v1 = vadd.f32 %v366_v63, %v365_v60  ;;  %v403_v2 = vrot.slane %v402_v0, 4 }
 0x129   :  { %v368_v54 = vrot.slane %v367_v1, 2  ;;  %v404_v3 = vadd.f32 %v403_v2, %v402_v0 }
 0x12b   :  { %v369_v61 = vadd.f32 %v368_v54, %v367_v1  ;;  %v405_v4 = vrot.slane %v404_v3, 2 }
 0x12d   :  { %v370_v5 = vrot.slane %v369_v61, 1  ;;  %v406_v6 = vadd.f32 %v405_v4, %v404_v3 }
 0x12f   :  { %v407_v7 = vrot.slane %v406_v6, 1  ;;  %v371_v8 = vadd.f32 %v370_v5, %v369_v61 }
 0x131   :  { %v408_v9 = vadd.f32 %v407_v7, %v406_v6 }
 0x133   :  { %v410_v10 = vsel %vm409_vm0, %v371_v8, %v408_v9 }
 0x134   :  { %411 = vst [vmem:[%s760_s3] sm:$0x3] %v410_v10 }

// kernel: forward.12
= control target key start
LH: loop header
LB: loop body
LE: loop exit
PB: predicated region body
PF: predicated region fallthrough
CT: control target
= control target key end

     0   :  { %v179_v6 = vmov 1966171168   ;;  %v31_v8 = vlaneseq  ;;  %s349_s1 = inlined_call_operand.vmem [shape: f32[2,128], index: 1, kind: input, shape index: {}]   ;;  %s350_s2 = inlined_call_operand.vmem [shape: f32[1,128], index: 2, kind: input, shape index: {}]   ;;  %s351_s0 = inlined_call_operand.vmem [shape: f32[128,128], index: 0, kind: input, shape index: {}]   ;;  %s352_s3 = inlined_call_operand.vmem [shape: f32[1,128], index: 3, kind: input, shape index: {}]   ;;  %s353_s4 = inlined_call_operand.vmem [shape: f32[128,128], index: 4, kind: output, shape index: {}]  }
   0x1   :  { %v17_v0 = vld [vmem:[%s349_s1] sm:$0x3]  ;;  %v29_v7 = vunpack.c.l.s4 %v179_v6  ;;  %v49_v21 = vld [vmem:[%s351_s0 + $0x8] sm:$0xff]  ;;  %v50_v22 = vld [vmem:[%s351_s0 + $0x10] sm:$0xff] }
   0x2   :  { %v18_v1 = vmul.f32 0.0078125, %v17_v0  ;;  %v32_v10 = vshrl.u32 %v31_v8, 7  ;;  %v26_v15 = vld [vmem:[%s350_s2] sm:$0x1]  ;;  %v51_v23 = vld [vmem:[%s351_s0 + $0x18] sm:$0xff]  ;;  %v53_v27 = vld [vmem:[%s351_s0 + $0x28] sm:$0xff] }
   0x3   :  { %v30_v9 = vunpack.c.0.s8 %v29_v7  ;;  %v45_v19 = vld [vmem:[%s352_s3] sm:$0x1]  ;;  %v54_v28 = vld [vmem:[%s351_s0 + $0x30] sm:$0xff]  ;;  %v55_v29 = vld [vmem:[%s351_s0 + $0x38] sm:$0xff] }
   0x4   :  { %v19_v2 = vmul.f32 %v18_v1, %v18_v1  ;;  %v67_v17 = vsub.s32 0, %v32_v10  ;;  %v48_v20 = vld [vmem:[%s351_s0] sm:$0xff]  ;;  %v57_v31 = vld [vmem:[%s351_s0 + $0x48] sm:$0xff]  ;;  %v58_v32 = vld [vmem:[%s351_s0 + $0x50] sm:$0xff] }
   0x5   :  { %v33_v11 = vsub.s32 %v30_v9, %v32_v10  ;;  %v52_v24 = vld [vmem:[%s351_s0 + $0x20] sm:$0xff]  ;;  %v59_v37 = vld [vmem:[%s351_s0 + $0x58] sm:$0xff]  ;;  %v61_v39 = vld [vmem:[%s351_s0 + $0x68] sm:$0xff] }
   0x6   :  { %v21_v3 = vrot.slane %v19_v2, 7  ;;  %v56_v30 = vld [vmem:[%s351_s0 + $0x40] sm:$0xff] }
   0x7   :  { %v60_v38 = vld [vmem:[%s351_s0 + $0x60] sm:$0xff] }
   0x8   :  { %v23_v4 = vsub.f32 %v18_v1, %v21_v3 }
   0xa   :  { %v24_v5 = vadd.f32 1e-05, %v23_v4 }
   0xc   :  { %177 = vrsqrt.f32 %v24_v5 }
  0x16   :  { %v178_v12 = vpop.eup %177 }
  0x17   :  { %v34_v13 = vrot.slane %v178_v12, %v33_v11 }
  0x19   :  { %v35_v14 = vcombine.high %v34_v13, %v34_v13 }
  0x1b   :  { %v42_v16 = vrot.slane %v35_v14, %v33_v11 }
  0x1d   :  { %v44_v18 = vmul.f32 %v42_v16, %v26_v15 }
  0x1f   :  { %v46_v25 = vmul.f32 %v44_v18, %v18_v1  ;;  %v229_v26 = vrot.slane %v44_v18, %v67_v17  ;;  %v62_v18 = vld [vmem:[%s351_s0 + $0x70] sm:$0xff] }
  0x21   :  { %v47_v33 = vsub.f32 %v45_v19, %v46_v25  ;;  %v70_v34 = vmul.f32 %v229_v26, %v48_v20  ;;  %v71_v35 = vmul.f32 %v229_v26, %v49_v21  ;;  %v72_v36 = vmul.f32 %v229_v26, %v50_v22  ;;  %v63_v19 = vld [vmem:[%s351_s0 + $0x78] sm:$0xff] }
  0x22   :  { %v73_v40 = vmul.f32 %v229_v26, %v51_v23  ;;  %v74_v41 = vmul.f32 %v229_v26, %v52_v24  ;;  %v75_v42 = vmul.f32 %v229_v26, %v53_v27  ;;  %v76_v43 = vmul.f32 %v229_v26, %v54_v28 }
  0x23   :  { %v265_v44 = vrot.slane %v47_v33, %v67_v17  ;;  %v77_v45 = vmul.f32 %v229_v26, %v55_v29  ;;  %v78_v46 = vmul.f32 %v229_v26, %v56_v30  ;;  %v79_v47 = vmul.f32 %v229_v26, %v57_v31 }
  0x24   :  { %v80_v48 = vmul.f32 %v229_v26, %v58_v32  ;;  %v81_v49 = vmul.f32 %v229_v26, %v59_v37  ;;  %v82_v50 = vmul.f32 %v229_v26, %v60_v38  ;;  %v274_v51 = vmul.f32 %v229_v26, %v61_v39 }
  0x25   :  { %v92_v52 = vadd.f32 %v265_v44, %v70_v34  ;;  %v93_v53 = vadd.f32 %v265_v44, %v71_v35  ;;  %v94_v54 = vadd.f32 %v265_v44, %v72_v36  ;;  %v95_v55 = vadd.f32 %v265_v44, %v73_v40 }
  0x26   :  { %v96_v56 = vadd.f32 %v265_v44, %v74_v41  ;;  %v97_v57 = vadd.f32 %v265_v44, %v75_v42  ;;  %v98_v58 = vadd.f32 %v265_v44, %v76_v43  ;;  %v99_v59 = vadd.f32 %v265_v44, %v77_v45 }
  0x27   :  { %vm108_vm0 = vcmp.gt.f32.partialorder %v92_v52, 0.0  ;;  %v124_v60 = vmul.f32 0.2, %v92_v52  ;;  %vm109_vm1 = vcmp.gt.f32.partialorder %v93_v53, 0.0  ;;  %v125_v61 = vmul.f32 0.2, %v93_v53 }
  0x28   :  { %vm110_vm2 = vcmp.gt.f32.partialorder %v94_v54, 0.0  ;;  %v126_v62 = vmul.f32 0.2, %v94_v54  ;;  %vm111_vm3 = vcmp.gt.f32.partialorder %v95_v55, 0.0  ;;  %v127_v63 = vmul.f32 0.2, %v95_v55 }
  0x29   :  { %v140_v0 = vsel %vm108_vm0, %v92_v52, %v124_v60  ;;  %v141_v1 = vsel %vm109_vm1, %v93_v53, %v125_v61  ;;  %vm112_vm4 = vcmp.gt.f32.partialorder %v96_v56, 0.0  ;;  %v128_v2 = vmul.f32 0.2, %v96_v56 }
  0x2a   :  { %156 = vst [vmem:[%s353_s4] sm:$0xff] %v140_v0  ;;  %157 = vst [vmem:[%s353_s4 + $0x8] sm:$0xff] %v141_v1  ;;  %v142_v3 = vsel %vm110_vm2, %v94_v54, %v126_v62  ;;  %v143_v4 = vsel %vm111_vm3, %v95_v55, %v127_v63  ;;  %vm113_vm5 = vcmp.gt.f32.partialorder %v97_v57, 0.0  ;;  %v129_v5 = vmul.f32 0.2, %v97_v57 }
  0x2b   :  { %158 = vst [vmem:[%s353_s4 + $0x10] sm:$0xff] %v142_v3  ;;  %159 = vst [vmem:[%s353_s4 + $0x18] sm:$0xff] %v143_v4  ;;  %v144_v6 = vsel %vm112_vm4, %v96_v56, %v128_v2  ;;  %vm114_vm6 = vcmp.gt.f32.partialorder %v98_v58, 0.0  ;;  %v130_v7 = vmul.f32 0.2, %v98_v58  ;;  %vm115_vm7 = vcmp.gt.f32.partialorder %v99_v59, 0.0 }
  0x2c   :  { %160 = vst [vmem:[%s353_s4 + $0x20] sm:$0xff] %v144_v6  ;;  %v145_v8 = vsel %vm113_vm5, %v97_v57, %v129_v5  ;;  %v131_v9 = vmul.f32 0.2, %v99_v59  ;;  %v100_v10 = vadd.f32 %v265_v44, %v78_v46  ;;  %v101_v11 = vadd.f32 %v265_v44, %v79_v47 }
  0x2d   :  { %161 = vst [vmem:[%s353_s4 + $0x28] sm:$0xff] %v145_v8  ;;  %v146_v12 = vsel %vm114_vm6, %v98_v58, %v130_v7  ;;  %v102_v13 = vadd.f32 %v265_v44, %v80_v48  ;;  %v103_v14 = vadd.f32 %v265_v44, %v81_v49  ;;  %v104_v15 = vadd.f32 %v265_v44, %v82_v50 }
  0x2e   :  { %162 = vst [vmem:[%s353_s4 + $0x30] sm:$0xff] %v146_v12  ;;  %v147_v16 = vsel %vm115_vm7, %v99_v59, %v131_v9  ;;  %vm116_vm8 = vcmp.gt.f32.partialorder %v100_v10, 0.0  ;;  %v132_v17 = vmul.f32 0.2, %v100_v10  ;;  %vm117_vm9 = vcmp.gt.f32.partialorder %v101_v11, 0.0 }
  0x2f   :  { %163 = vst [vmem:[%s353_s4 + $0x38] sm:$0xff] %v147_v16  ;;  %v133_v20 = vmul.f32 0.2, %v101_v11  ;;  %vm118_vm10 = vcmp.gt.f32.partialorder %v102_v13, 0.0  ;;  %v134_v21 = vmul.f32 0.2, %v102_v13  ;;  %v105_v28 = vadd.f32 %v265_v44, %v274_v51 }
  0x30   :  { %vm119_vm11 = vcmp.gt.f32.partialorder %v103_v14, 0.0  ;;  %v148_v22 = vsel %vm116_vm8, %v100_v10, %v132_v17  ;;  %v135_v23 = vmul.f32 0.2, %v103_v14  ;;  %vm120_vm12 = vcmp.gt.f32.partialorder %v104_v15, 0.0 }
  0x31   :  { %v136_v24 = vmul.f32 0.2, %v104_v15  ;;  %164 = vst [vmem:[%s353_s4 + $0x40] sm:$0xff] %v148_v22  ;;  %v149_v25 = vsel %vm117_vm9, %v101_v11, %v133_v20  ;;  %v150_v27 = vsel %vm118_vm10, %v102_v13, %v134_v21  ;;  %v84_v29 = vmul.f32 %v229_v26, %v62_v18 }
  0x32   :  { %165 = vst [vmem:[%s353_s4 + $0x48] sm:$0xff] %v149_v25  ;;  %166 = vst [vmem:[%s353_s4 + $0x50] sm:$0xff] %v150_v27  ;;  %v151_v30 = vsel %vm119_vm11, %v103_v14, %v135_v23  ;;  %v85_v32 = vmul.f32 %v229_v26, %v63_v19  ;;  %vm121_vm13 = vcmp.gt.f32.partialorder %v105_v28, 0.0  ;;  %v137_v33 = vmul.f32 0.2, %v105_v28 }
  0x33   :  { %v152_v31 = vsel %vm120_vm12, %v104_v15, %v136_v24  ;;  %167 = vst [vmem:[%s353_s4 + $0x58] sm:$0xff] %v151_v30  ;;  %v106_v34 = vadd.f32 %v265_v44, %v84_v29 }
  0x34   :  { %168 = vst [vmem:[%s353_s4 + $0x60] sm:$0xff] %v152_v31  ;;  %v107_v35 = vadd.f32 %v265_v44, %v85_v32  ;;  %v153_v36 = vsel %vm121_vm13, %v105_v28, %v137_v33 }
  0x35   :  { %vm122_vm14 = vcmp.gt.f32.partialorder %v106_v34, 0.0  ;;  %v138_v37 = vmul.f32 0.2, %v106_v34  ;;  %169 = vst [vmem:[%s353_s4 + $0x68] sm:$0xff] %v153_v36 }
  0x36   :  { %vm123_vm15 = vcmp.gt.f32.partialorder %v107_v35, 0.0  ;;  %v139_v26 = vmul.f32 0.2, %v107_v35 }
  0x37   :  { %v154_v38 = vsel %vm122_vm14, %v106_v34, %v138_v37 }
  0x38   :  { %170 = vst [vmem:[%s353_s4 + $0x70] sm:$0xff] %v154_v38  ;;  %v155_v39 = vsel %vm123_vm15, %v107_v35, %v139_v26 }
  0x39   :  { %171 = vst [vmem:[%s353_s4 + $0x78] sm:$0xff] %v155_v39 }

// kernel: forward.13
= control target key start
LH: loop header
LB: loop body
LE: loop exit
PB: predicated region body
PF: predicated region fallthrough
CT: control target
= control target key end

     0   :  { %vm442_vm0 = vcmask 1040384   ;;  %s748_s1 = inlined_call_operand.vmem [shape: bf16[512,128], index: 1, kind: input, shape index: {}]   ;;  %s749_s0 = inlined_call_operand.vmem [shape: bf16[32,512], index: 0, kind: input, shape index: {}]   ;;  %s750_s2 = inlined_call_operand.vmem [shape: f32[32,128], index: 2, kind: output, shape index: {0}]   ;;  %s751_s3 = inlined_call_operand.vmem [shape: f32[1,2,128], index: 3, kind: output, shape index: {1}]  }
   0x1   :  { %v549_v0 = vld [vmem:[%s748_s1 + $0x40] sm:$0xff]   ;;  %v553_v4 = vld [vmem:[%s748_s1 + $0x48] sm:$0xff]   ;;  %v557_v8 = vld [vmem:[%s748_s1 + $0x50] sm:$0xff]  }
   0x2   :  { %v550_v1 = vld [vmem:[%s748_s1 + $0xc0] sm:$0xff]   ;;  %493 = vmatprep.subr.bf16.mxu0 %v549_v0  ;;  %v554_v5 = vld [vmem:[%s748_s1 + $0xc8] sm:$0xff]   ;;  %v558_v9 = vld [vmem:[%s748_s1 + $0xd0] sm:$0xff]  }
   0x3   :  { %v551_v2 = vld [vmem:[%s748_s1] sm:$0xff]   ;;  %521 = vmatprep.subr.bf16.mxu1 %v550_v1  ;;  %v555_v6 = vld [vmem:[%s748_s1 + $0x8] sm:$0xff]   ;;  %v559_v10 = vld [vmem:[%s748_s1 + $0x10] sm:$0xff]  }
   0x4   :  { %v552_v3 = vld [vmem:[%s748_s1 + $0x80] sm:$0xff]   ;;  %494 = vmatpush3.bf16.msra.mxu0 %v551_v2  ;;  %v556_v7 = vld [vmem:[%s748_s1 + $0x88] sm:$0xff]   ;;  %v560_v11 = vld [vmem:[%s748_s1 + $0x90] sm:$0xff]  }
   0x5   :  { %522 = vmatpush3.bf16.msra.mxu1 %v552_v3  ;;  %495 = vmatprep.subr.bf16.mxu0 %v553_v4  ;;  %v561_v12 = vld [vmem:[%s748_s1 + $0x58] sm:$0xff]   ;;  %v565_v16 = vld [vmem:[%s748_s1 + $0x60] sm:$0xff]   ;;  %v569_v20 = vld [vmem:[%s748_s1 + $0x68] sm:$0xff]  }
   0x6   :  { %523 = vmatprep.subr.bf16.mxu1 %v554_v5  ;;  %v562_v13 = vld [vmem:[%s748_s1 + $0xd8] sm:$0xff]   ;;  %v566_v17 = vld [vmem:[%s748_s1 + $0xe0] sm:$0xff]   ;;  %v570_v21 = vld [vmem:[%s748_s1 + $0xe8] sm:$0xff]  }
   0x7   :  { %v563_v14 = vld [vmem:[%s748_s1 + $0x18] sm:$0xff]   ;;  %v567_v18 = vld [vmem:[%s748_s1 + $0x20] sm:$0xff]   ;;  %v571_v22 = vld [vmem:[%s748_s1 + $0x28] sm:$0xff]  }
   0x8   :  { %496 = vmatpush3.bf16.msra.mxu0 %v555_v6  ;;  %v564_v15 = vld [vmem:[%s748_s1 + $0x98] sm:$0xff]   ;;  %v568_v19 = vld [vmem:[%s748_s1 + $0xa0] sm:$0xff]   ;;  %v572_v23 = vld [vmem:[%s748_s1 + $0xa8] sm:$0xff]  }
   0x9   :  { %524 = vmatpush3.bf16.msra.mxu1 %v556_v7  ;;  %497 = vmatprep.subr.bf16.mxu0 %v557_v8  ;;  %v573_v24 = vld [vmem:[%s748_s1 + $0x70] sm:$0xff]   ;;  %v577_v28 = vld [vmem:[%s748_s1 + $0x78] sm:$0xff]  }
   0xa   :  { %525 = vmatprep.subr.bf16.mxu1 %v558_v9  ;;  %v574_v25 = vld [vmem:[%s748_s1 + $0xf0] sm:$0xff]   ;;  %v578_v29 = vld [vmem:[%s748_s1 + $0xf8] sm:$0xff]  }
   0xb   :  { %v575_v26 = vld [vmem:[%s748_s1 + $0x30] sm:$0xff]   ;;  %v579_v30 = vld [vmem:[%s748_s1 + $0x38] sm:$0xff]  }
   0xc   :  { %498 = vmatpush3.bf16.msra.mxu0 %v559_v10  ;;  %v576_v27 = vld [vmem:[%s748_s1 + $0xb0] sm:$0xff]   ;;  %v580_v31 = vld [vmem:[%s748_s1 + $0xb8] sm:$0xff]  }
   0xd   :  { %526 = vmatpush3.bf16.msra.mxu1 %v560_v11  ;;  %499 = vmatprep.subr.bf16.mxu0 %v561_v12  ;;  %v581_v32 = vld [vmem:[%s749_s0] ss:$16 sps:$4 sm:$0xff]   ;;  %v583_v33 = vld [vmem:[%s749_s0 + $0x4] ss:$16 sps:$4 sm:$0xff]   ;;  %v584_v34 = vld [vmem:[%s749_s0 + $0x8] ss:$16 sps:$4 sm:$0xff]  }
   0xe   :  { %527 = vmatprep.subr.bf16.mxu1 %v562_v13  ;;  %v586_v35 = vld [vmem:[%s749_s0 + $0xc] ss:$16 sps:$4 sm:$0xff]   ;;  %350 = vmatprep.mubr.bf16.mxu0 %v583_v33  ;;  %v587_v36 = vld [vmem:[%s749_s0 + $0x24] ss:$16 sps:$4 sm:$0xff]   ;;  %v591_v38 = vld [vmem:[%s749_s0 + $0x20] ss:$16 sps:$4 sm:$0xff]  }
   0xf   :  { %399 = vmatprep.mubr.bf16.mxu1 %v586_v35  ;;  %v589_v37 = vld [vmem:[%s749_s0 + $0x2c] ss:$16 sps:$4 sm:$0xff]   ;;  %v592_v39 = vld [vmem:[%s749_s0 + $0x28] ss:$16 sps:$4 sm:$0xff]  }
  0x10   :  { %500 = vmatpush3.bf16.msra.mxu0 %v563_v14 }
  0x11   :  { %528 = vmatpush3.bf16.msra.mxu1 %v564_v15  ;;  %501 = vmatprep.subr.bf16.mxu0 %v565_v16 }
  0x12   :  { %529 = vmatprep.subr.bf16.mxu1 %v566_v17 }
  0x14   :  { %502 = vmatpush3.bf16.msra.mxu0 %v567_v18 }
  0x15   :  { %530 = vmatpush3.bf16.msra.mxu1 %v568_v19  ;;  %503 = vmatprep.subr.bf16.mxu0 %v569_v20 }
  0x16   :  { %531 = vmatprep.subr.bf16.mxu1 %v570_v21 }
  0x18   :  { %504 = vmatpush3.bf16.msra.mxu0 %v571_v22 }
  0x19   :  { %532 = vmatpush3.bf16.msra.mxu1 %v572_v23  ;;  %505 = vmatprep.subr.bf16.mxu0 %v573_v24 }
  0x1a   :  { %533 = vmatprep.subr.bf16.mxu1 %v574_v25 }
  0x1c   :  { %506 = vmatpush3.bf16.msra.mxu0 %v575_v26 }
  0x1d   :  { %534 = vmatpush3.bf16.msra.mxu1 %v576_v27  ;;  %507 = vmatprep.subr.bf16.mxu0 %v577_v28 }
  0x1e   :  { %535 = vmatprep.subr.bf16.mxu1 %v578_v29 }
  0x20   :  { %508 = vmatpush3.bf16.msra.mxu0 %v579_v30 }
  0x21   :  { %536 = vmatpush3.bf16.msra.mxu1 %v580_v31 }
  0x23   :  { %351 = vmatmul.mubr.bf16.vlgmr.msra.gmra.mrb[0].mxu0 %v581_v32 }
  0x24   :  { %400 = vmatmul.mubr.bf16.vlgmr.msra.gmra.mrb[0].mxu1 %v584_v34  ;;  %358 = vmatprep.mubr.bf16.mxu0 %v587_v36 }
  0x25   :  { %407 = vmatprep.mubr.bf16.mxu1 %v589_v37 }
  0x2b   :  { %359 = vmatmul.mubr.bf16.gmra.mrb[4].mxu0 %v591_v38 }
  0x2c   :  { %408 = vmatmul.mubr.bf16.gmra.mrb[4].mxu1 %v592_v39 }
  0xf6   :  { %v509_v40 = vpop.f32.mrb[0].mxu0 }
  0xf7   :  { %v537_v41 = vpop.f32.mrb[0].mxu1  ;;  %v510_v42 = vpop.f32.mrb[1].mxu0 }
  0xf8   :  { %v511_v43 = vadd.f32 %v510_v42, %v509_v40  ;;  %v538_v44 = vpop.f32.mrb[1].mxu1  ;;  %v512_v45 = vpop.f32.mrb[2].mxu0 }
  0xf9   :  { %v539_v46 = vadd.f32 %v538_v44, %v537_v41  ;;  %v540_v47 = vpop.f32.mrb[2].mxu1  ;;  %v513_v48 = vpop.f32.mrb[3].mxu0 }
  0xfa   :  { %v514_v49 = vadd.f32 %v513_v48, %v512_v45  ;;  %v541_v50 = vpop.f32.mrb[3].mxu1 }
  0xfb   :  { %v402_v51 = vadd.f32 %v539_v46, %v511_v43  ;;  %v542_v52 = vadd.f32 %v541_v50, %v540_v47 }
  0xfd   :  { %416 = vst [vmem:[%s750_s2] sm:$0xff] %v402_v51  ;;  %v405_v53 = vadd.f32 %v542_v52, %v514_v49  ;;  %v429_v55 = vmul.f32 %v402_v51, %v402_v51 }
  0xfe   :  { %v515_v54 = vpop.f32.mrb[4].mxu0 }
  0xff   :  { %417 = vst [vmem:[%s750_s2 + $0x8] sm:$0xff] %v405_v53  ;;  %v420_v56 = vadd.f32 %v405_v53, %v402_v51  ;;  %v430_v57 = vmul.f32 %v405_v53, %v405_v53  ;;  %v543_v58 = vpop.f32.mrb[4].mxu1  ;;  %v516_v59 = vpop.f32.mrb[5].mxu0 }
 0x100   :  { %v517_v60 = vadd.f32 %v516_v59, %v515_v54  ;;  %v544_v61 = vpop.f32.mrb[5].mxu1  ;;  %v518_v62 = vpop.f32.mrb[6].mxu0 }
 0x101   :  { %v433_v63 = vadd.f32 %v430_v57, %v429_v55  ;;  %v545_v0 = vadd.f32 %v544_v61, %v543_v58  ;;  %v546_v1 = vpop.f32.mrb[6].mxu1  ;;  %v519_v2 = vpop.f32.mrb[7].mxu0 }
 0x102   :  { %v520_v3 = vadd.f32 %v519_v2, %v518_v62  ;;  %v547_v4 = vpop.f32.mrb[7].mxu1 }
 0x103   :  { %v410_v5 = vadd.f32 %v545_v0, %v517_v60  ;;  %v548_v6 = vadd.f32 %v547_v4, %v546_v1 }
 0x105   :  { %418 = vst [vmem:[%s750_s2 + $0x10] sm:$0xff] %v410_v5  ;;  %v421_v7 = vadd.f32 %v420_v56, %v410_v5  ;;  %v431_v8 = vmul.f32 %v410_v5, %v410_v5  ;;  %v413_v9 = vadd.f32 %v548_v6, %v520_v3 }
 0x107   :  { %v434_v10 = vadd.f32 %v433_v63, %v431_v8  ;;  %419 = vst [vmem:[%s750_s2 + $0x18] sm:$0xff] %v413_v9  ;;  %v422_v11 = vadd.f32 %v421_v7, %v413_v9  ;;  %v432_v12 = vmul.f32 %v413_v9, %v413_v9 }
 0x109   :  { %v423_v13 = vrot.slane %v422_v11, 4  ;;  %v435_v14 = vadd.f32 %v434_v10, %v432_v12 }
 0x10b   :  { %v424_v15 = vadd.f32 %v423_v13, %v422_v11  ;;  %v436_v16 = vrot.slane %v435_v14, 4 }
 0x10d   :  { %v425_v17 = vrot.slane %v424_v15, 2  ;;  %v437_v18 = vadd.f32 %v436_v16, %v435_v14 }
 0x10f   :  { %v426_v19 = vadd.f32 %v425_v17, %v424_v15  ;;  %v438_v20 = vrot.slane %v437_v18, 2 }
 0x111   :  { %v427_v21 = vrot.slane %v426_v19, 1  ;;  %v439_v22 = vadd.f32 %v438_v20, %v437_v18 }
 0x113   :  { %v440_v23 = vrot.slane %v439_v22, 1  ;;  %v428_v24 = vadd.f32 %v427_v21, %v426_v19 }
 0x115   :  { %v441_v25 = vadd.f32 %v440_v23, %v439_v22 }
 0x117   :  { %v443_v26 = vsel %vm442_vm0, %v428_v24, %v441_v25 }
 0x118   :  { %444 = vst [vmem:[%s751_s3] sm:$0x3] %v443_v26 }

// kernel: forward.14
= control target key start
LH: loop header
LB: loop body
LE: loop exit
PB: predicated region body
PF: predicated region fallthrough
CT: control target
= control target key end

     0   :  { %v95_v6 = vmov 1966171168   ;;  %v31_v8 = vlaneseq  ;;  %s154_s1 = inlined_call_operand.vmem [shape: f32[2,128], index: 1, kind: input, shape index: {}]   ;;  %s155_s2 = inlined_call_operand.vmem [shape: f32[1,128], index: 2, kind: input, shape index: {}]   ;;  %s156_s3 = inlined_call_operand.vmem [shape: f32[1,128], index: 3, kind: input, shape index: {}]   ;;  %s157_s0 = inlined_call_operand.vmem [shape: f32[32,128], index: 0, kind: input, shape index: {}]   ;;  %s158_s4 = inlined_call_operand.vmem [shape: f32[32,128], index: 4, kind: output, shape index: {}]  }
   0x1   :  { %v17_v0 = vld [vmem:[%s154_s1] sm:$0x3]  ;;  %v29_v7 = vunpack.c.l.s4 %v95_v6  ;;  %v49_v21 = vld [vmem:[%s157_s0 + $0x8] sm:$0xff]  ;;  %v50_v22 = vld [vmem:[%s157_s0 + $0x10] sm:$0xff] }
   0x2   :  { %v18_v1 = vmul.f32 0.03125, %v17_v0  ;;  %v32_v10 = vshrl.u32 %v31_v8, 7  ;;  %v26_v15 = vld [vmem:[%s155_s2] sm:$0x1]  ;;  %v51_v25 = vld [vmem:[%s157_s0 + $0x18] sm:$0xff] }
   0x3   :  { %v30_v9 = vunpack.c.0.s8 %v29_v7  ;;  %v45_v19 = vld [vmem:[%s156_s3] sm:$0x1] }
   0x4   :  { %v19_v2 = vmul.f32 %v18_v1, %v18_v1  ;;  %v55_v17 = vsub.s32 0, %v32_v10  ;;  %v48_v20 = vld [vmem:[%s157_s0] sm:$0xff] }
   0x5   :  { %v33_v11 = vsub.s32 %v30_v9, %v32_v10 }
   0x6   :  { %v21_v3 = vrot.slane %v19_v2, 7 }
   0x8   :  { %v23_v4 = vsub.f32 %v18_v1, %v21_v3 }
   0xa   :  { %v24_v5 = vadd.f32 1e-05, %v23_v4 }
   0xc   :  { %93 = vrsqrt.f32 %v24_v5 }
  0x16   :  { %v94_v12 = vpop.eup %93 }
  0x17   :  { %v34_v13 = vrot.slane %v94_v12, %v33_v11 }
  0x19   :  { %v35_v14 = vcombine.high %v34_v13, %v34_v13 }
  0x1b   :  { %v42_v16 = vrot.slane %v35_v14, %v33_v11 }
  0x1d   :  { %v44_v18 = vmul.f32 %v42_v16, %v26_v15 }
  0x1f   :  { %v46_v23 = vmul.f32 %v44_v18, %v18_v1  ;;  %v56_v24 = vrot.slane %v44_v18, %v55_v17 }
  0x21   :  { %v47_v26 = vsub.f32 %v45_v19, %v46_v23  ;;  %v58_v27 = vmul.f32 %v56_v24, %v48_v20  ;;  %v59_v28 = vmul.f32 %v56_v24, %v49_v21  ;;  %v60_v29 = vmul.f32 %v56_v24, %v50_v22 }
  0x22   :  { %v61_v30 = vmul.f32 %v56_v24, %v51_v25 }
  0x23   :  { %v66_v31 = vrot.slane %v47_v26, %v55_v17 }
  0x25   :  { %v68_v32 = vadd.f32 %v66_v31, %v58_v27  ;;  %v69_v33 = vadd.f32 %v66_v31, %v59_v28  ;;  %v70_v34 = vadd.f32 %v66_v31, %v60_v29  ;;  %v71_v35 = vadd.f32 %v66_v31, %v61_v30 }
  0x27   :  { %vm72_vm0 = vcmp.gt.f32.partialorder %v68_v32, 0.0  ;;  %v76_v36 = vmul.f32 0.2, %v68_v32  ;;  %vm73_vm1 = vcmp.gt.f32.partialorder %v69_v33, 0.0  ;;  %v77_v37 = vmul.f32 0.2, %v69_v33 }
  0x28   :  { %vm74_vm2 = vcmp.gt.f32.partialorder %v70_v34, 0.0  ;;  %v78_v38 = vmul.f32 0.2, %v70_v34  ;;  %vm75_vm3 = vcmp.gt.f32.partialorder %v71_v35, 0.0  ;;  %v79_v39 = vmul.f32 0.2, %v71_v35 }
  0x29   :  { %v80_v40 = vsel %vm72_vm0, %v68_v32, %v76_v36  ;;  %v81_v41 = vsel %vm73_vm1, %v69_v33, %v77_v37 }
  0x2a   :  { %84 = vst [vmem:[%s158_s4] sm:$0xff] %v80_v40  ;;  %85 = vst [vmem:[%s158_s4 + $0x8] sm:$0xff] %v81_v41  ;;  %v82_v42 = vsel %vm74_vm2, %v70_v34, %v78_v38  ;;  %v83_v43 = vsel %vm75_vm3, %v71_v35, %v79_v39 }
  0x2b   :  { %86 = vst [vmem:[%s158_s4 + $0x10] sm:$0xff] %v82_v42  ;;  %87 = vst [vmem:[%s158_s4 + $0x18] sm:$0xff] %v83_v43 }

// kernel: forward.15
= control target key start
LH: loop header
LB: loop body
LE: loop exit
PB: predicated region body
PF: predicated region fallthrough
CT: control target
= control target key end

     0   :  { %s1194_s1 = inlined_call_operand.vmem [shape: bf16[1024,128], index: 1, kind: input, shape index: {}]   ;;  %s1195_s0 = inlined_call_operand.vmem [shape: bf16[8,1024], index: 0, kind: input, shape index: {}]   ;;  %s1196_s2 = inlined_call_operand.vmem [shape: f32[1,128], index: 2, kind: input, shape index: {}]   ;;  %s1197_s3 = inlined_call_operand.vmem [shape: f32[8,128], index: 3, kind: output, shape index: {}]  }
   0x1   :  { %v892_v0 = vld [vmem:[%s1194_s1 + $0x40] sm:$0xff]   ;;  %v896_v4 = vld [vmem:[%s1194_s1 + $0x48] sm:$0xff]   ;;  %v900_v8 = vld [vmem:[%s1194_s1 + $0x50] sm:$0xff]  }
   0x2   :  { %v893_v1 = vld [vmem:[%s1194_s1 + $0xc0] sm:$0xff]   ;;  %804 = vmatprep.subr.bf16.mxu0 %v892_v0  ;;  %v897_v5 = vld [vmem:[%s1194_s1 + $0xc8] sm:$0xff]   ;;  %v901_v9 = vld [vmem:[%s1194_s1 + $0xd0] sm:$0xff]  }
   0x3   :  { %v894_v2 = vld [vmem:[%s1194_s1] sm:$0xff]   ;;  %826 = vmatprep.subr.bf16.mxu1 %v893_v1  ;;  %v898_v6 = vld [vmem:[%s1194_s1 + $0x8] sm:$0xff]   ;;  %v902_v10 = vld [vmem:[%s1194_s1 + $0x10] sm:$0xff]  }
   0x4   :  { %v895_v3 = vld [vmem:[%s1194_s1 + $0x80] sm:$0xff]   ;;  %805 = vmatpush3.bf16.msra.mxu0 %v894_v2  ;;  %v899_v7 = vld [vmem:[%s1194_s1 + $0x88] sm:$0xff]   ;;  %v903_v11 = vld [vmem:[%s1194_s1 + $0x90] sm:$0xff]  }
   0x5   :  { %827 = vmatpush3.bf16.msra.mxu1 %v895_v3  ;;  %806 = vmatprep.subr.bf16.mxu0 %v896_v4  ;;  %v904_v12 = vld [vmem:[%s1194_s1 + $0x58] sm:$0xff]   ;;  %v908_v16 = vld [vmem:[%s1194_s1 + $0x60] sm:$0xff]   ;;  %v912_v20 = vld [vmem:[%s1194_s1 + $0x68] sm:$0xff]  }
   0x6   :  { %828 = vmatprep.subr.bf16.mxu1 %v897_v5  ;;  %v905_v13 = vld [vmem:[%s1194_s1 + $0xd8] sm:$0xff]   ;;  %v909_v17 = vld [vmem:[%s1194_s1 + $0xe0] sm:$0xff]   ;;  %v913_v21 = vld [vmem:[%s1194_s1 + $0xe8] sm:$0xff]  }
   0x7   :  { %v906_v14 = vld [vmem:[%s1194_s1 + $0x18] sm:$0xff]   ;;  %v910_v18 = vld [vmem:[%s1194_s1 + $0x20] sm:$0xff]   ;;  %v914_v22 = vld [vmem:[%s1194_s1 + $0x28] sm:$0xff]  }
   0x8   :  { %807 = vmatpush3.bf16.msra.mxu0 %v898_v6  ;;  %v907_v15 = vld [vmem:[%s1194_s1 + $0x98] sm:$0xff]   ;;  %v911_v19 = vld [vmem:[%s1194_s1 + $0xa0] sm:$0xff]   ;;  %v915_v23 = vld [vmem:[%s1194_s1 + $0xa8] sm:$0xff]  }
   0x9   :  { %829 = vmatpush3.bf16.msra.mxu1 %v899_v7  ;;  %808 = vmatprep.subr.bf16.mxu0 %v900_v8  ;;  %v916_v24 = vld [vmem:[%s1194_s1 + $0x70] sm:$0xff]   ;;  %v920_v28 = vld [vmem:[%s1194_s1 + $0x78] sm:$0xff]   ;;  %v15_v32 = vld [vmem:[%s1195_s0] sm:$0xff] }
   0xa   :  { %830 = vmatprep.subr.bf16.mxu1 %v901_v9  ;;  %v917_v25 = vld [vmem:[%s1194_s1 + $0xf0] sm:$0xff]   ;;  %v921_v29 = vld [vmem:[%s1194_s1 + $0xf8] sm:$0xff]   ;;  %v16_v33 = vld [vmem:[%s1195_s0 + $0x8] sm:$0xff]  ;;  %v732_v34 = vcombine.low %v15_v32, %v15_v32  ;;  %v733_v35 = vcombine.high %v15_v32, %v15_v32 }
   0xb   :  { %v918_v26 = vld [vmem:[%s1194_s1 + $0x30] sm:$0xff]   ;;  %v922_v30 = vld [vmem:[%s1194_s1 + $0x38] sm:$0xff]   ;;  %v734_v36 = vcombine.low %v16_v33, %v16_v33  ;;  %v735_v37 = vcombine.high %v16_v33, %v16_v33  ;;  %v928_v38 = vld [vmem:[%s1194_s1 + $0x140] sm:$0xff]  }
   0xc   :  { %809 = vmatpush3.bf16.msra.mxu0 %v902_v10  ;;  %v919_v27 = vld [vmem:[%s1194_s1 + $0xb0] sm:$0xff]   ;;  %v923_v31 = vld [vmem:[%s1194_s1 + $0xb8] sm:$0xff]   ;;  %v929_v39 = vld [vmem:[%s1194_s1 + $0x1c0] sm:$0xff]   ;;  %598 = vmatprep.mubr.bf16.mxu0 %v733_v35 }
   0xd   :  { %831 = vmatpush3.bf16.msra.mxu1 %v903_v11  ;;  %810 = vmatprep.subr.bf16.mxu0 %v904_v12  ;;  %v930_v40 = vld [vmem:[%s1194_s1 + $0x100] sm:$0xff]   ;;  %v932_v42 = vld [vmem:[%s1194_s1 + $0x148] sm:$0xff]   ;;  %v936_v46 = vld [vmem:[%s1194_s1 + $0x150] sm:$0xff]  }
   0xe   :  { %832 = vmatprep.subr.bf16.mxu1 %v905_v13  ;;  %638 = vmatprep.mubr.bf16.mxu1 %v735_v37  ;;  %v931_v41 = vld [vmem:[%s1194_s1 + $0x180] sm:$0xff]   ;;  %v933_v43 = vld [vmem:[%s1194_s1 + $0x1c8] sm:$0xff]   ;;  %v937_v47 = vld [vmem:[%s1194_s1 + $0x1d0] sm:$0xff]  }
   0xf   :  { %v934_v44 = vld [vmem:[%s1194_s1 + $0x108] sm:$0xff]   ;;  %v938_v48 = vld [vmem:[%s1194_s1 + $0x110] sm:$0xff]   ;;  %v940_v50 = vld [vmem:[%s1194_s1 + $0x158] sm:$0xff]  }
  0x10   :  { %811 = vmatpush3.bf16.msra.mxu0 %v906_v14  ;;  %v935_v45 = vld [vmem:[%s1194_s1 + $0x188] sm:$0xff]   ;;  %v939_v49 = vld [vmem:[%s1194_s1 + $0x190] sm:$0xff]   ;;  %v941_v51 = vld [vmem:[%s1194_s1 + $0x1d8] sm:$0xff]  }
  0x11   :  { %833 = vmatpush3.bf16.msra.mxu1 %v907_v15  ;;  %812 = vmatprep.subr.bf16.mxu0 %v908_v16  ;;  %v942_v52 = vld [vmem:[%s1194_s1 + $0x118] sm:$0xff]   ;;  %v944_v54 = vld [vmem:[%s1194_s1 + $0x160] sm:$0xff]   ;;  %v948_v58 = vld [vmem:[%s1194_s1 + $0x168] sm:$0xff]  }
  0x12   :  { %834 = vmatprep.subr.bf16.mxu1 %v909_v17  ;;  %v943_v53 = vld [vmem:[%s1194_s1 + $0x198] sm:$0xff]   ;;  %v945_v55 = vld [vmem:[%s1194_s1 + $0x1e0] sm:$0xff]   ;;  %v949_v59 = vld [vmem:[%s1194_s1 + $0x1e8] sm:$0xff]  }
  0x13   :  { %v946_v56 = vld [vmem:[%s1194_s1 + $0x120] sm:$0xff]   ;;  %v950_v60 = vld [vmem:[%s1194_s1 + $0x128] sm:$0xff]   ;;  %v952_v62 = vld [vmem:[%s1194_s1 + $0x170] sm:$0xff]  }
  0x14   :  { %813 = vmatpush3.bf16.msra.mxu0 %v910_v18  ;;  %v947_v57 = vld [vmem:[%s1194_s1 + $0x1a0] sm:$0xff]   ;;  %v951_v61 = vld [vmem:[%s1194_s1 + $0x1a8] sm:$0xff]   ;;  %v953_v63 = vld [vmem:[%s1194_s1 + $0x1f0] sm:$0xff]  }
  0x15   :  { %835 = vmatpush3.bf16.msra.mxu1 %v911_v19  ;;  %814 = vmatprep.subr.bf16.mxu0 %v912_v20  ;;  %v954_v0 = vld [vmem:[%s1194_s1 + $0x130] sm:$0xff]   ;;  %v956_v2 = vld [vmem:[%s1194_s1 + $0x178] sm:$0xff]   ;;  %v731_v14 = vld [vmem:[%s1196_s2] ss:$0 sm:$0xff] }
  0x16   :  { %836 = vmatprep.subr.bf16.mxu1 %v913_v21  ;;  %v955_v1 = vld [vmem:[%s1194_s1 + $0x1b0] sm:$0xff]   ;;  %v957_v3 = vld [vmem:[%s1194_s1 + $0x1f8] sm:$0xff]  }
  0x17   :  { %v958_v4 = vld [vmem:[%s1194_s1 + $0x138] sm:$0xff]   ;;  %v17_v6 = vld [vmem:[%s1195_s0 + $0x10] sm:$0xff] }
  0x18   :  { %815 = vmatpush3.bf16.msra.mxu0 %v914_v22  ;;  %v959_v5 = vld [vmem:[%s1194_s1 + $0x1b8] sm:$0xff]   ;;  %v736_v7 = vcombine.low %v17_v6, %v17_v6  ;;  %v737_v8 = vcombine.high %v17_v6, %v17_v6 }
  0x19   :  { %837 = vmatpush3.bf16.msra.mxu1 %v915_v23  ;;  %816 = vmatprep.subr.bf16.mxu0 %v916_v24  ;;  %v18_v9 = vld [vmem:[%s1195_s0 + $0x18] sm:$0xff] }
  0x1a   :  { %838 = vmatprep.subr.bf16.mxu1 %v917_v25  ;;  %v738_v10 = vcombine.low %v18_v9, %v18_v9  ;;  %v739_v11 = vcombine.high %v18_v9, %v18_v9 }
  0x1c   :  { %817 = vmatpush3.bf16.msra.mxu0 %v918_v26 }
  0x1d   :  { %839 = vmatpush3.bf16.msra.mxu1 %v919_v27  ;;  %818 = vmatprep.subr.bf16.mxu0 %v920_v28 }
  0x1e   :  { %840 = vmatprep.subr.bf16.mxu1 %v921_v29 }
  0x20   :  { %819 = vmatpush3.bf16.msra.mxu0 %v922_v30 }
  0x21   :  { %841 = vmatpush3.bf16.msra.mxu1 %v923_v31  ;;  %848 = vmatprep.subr.bf16.mxu0 %v928_v38 }
  0x22   :  { %870 = vmatprep.subr.bf16.mxu1 %v929_v39 }
  0x23   :  { %599 = vmatmul.mubr.bf16.vlgmr.msra.gmra.mrb[0].mxu0 %v732_v34 }
  0x24   :  { %639 = vmatmul.mubr.bf16.vlgmr.msra.gmra.mrb[0].mxu1 %v734_v36  ;;  %849 = vmatpush3.bf16.msra.mxu0 %v930_v40 }
  0x25   :  { %871 = vmatpush3.bf16.msra.mxu1 %v931_v41  ;;  %850 = vmatprep.subr.bf16.mxu0 %v932_v42 }
  0x26   :  { %872 = vmatprep.subr.bf16.mxu1 %v933_v43  ;;  %678 = vmatprep.mubr.bf16.mxu0 %v737_v8 }
  0x27   :  { %718 = vmatprep.mubr.bf16.mxu1 %v739_v11 }
  0x28   :  { %851 = vmatpush3.bf16.msra.mxu0 %v934_v44 }
  0x29   :  { %873 = vmatpush3.bf16.msra.mxu1 %v935_v45  ;;  %852 = vmatprep.subr.bf16.mxu0 %v936_v46 }
  0x2a   :  { %874 = vmatprep.subr.bf16.mxu1 %v937_v47 }
  0x2c   :  { %853 = vmatpush3.bf16.msra.mxu0 %v938_v48 }
  0x2d   :  { %875 = vmatpush3.bf16.msra.mxu1 %v939_v49  ;;  %854 = vmatprep.subr.bf16.mxu0 %v940_v50 }
  0x2e   :  { %876 = vmatprep.subr.bf16.mxu1 %v941_v51 }
  0x30   :  { %855 = vmatpush3.bf16.msra.mxu0 %v942_v52 }
  0x31   :  { %877 = vmatpush3.bf16.msra.mxu1 %v943_v53  ;;  %856 = vmatprep.subr.bf16.mxu0 %v944_v54 }
  0x32   :  { %878 = vmatprep.subr.bf16.mxu1 %v945_v55 }
  0x34   :  { %857 = vmatpush3.bf16.msra.mxu0 %v946_v56 }
  0x35   :  { %879 = vmatpush3.bf16.msra.mxu1 %v947_v57  ;;  %858 = vmatprep.subr.bf16.mxu0 %v948_v58 }
  0x36   :  { %880 = vmatprep.subr.bf16.mxu1 %v949_v59 }
  0x38   :  { %859 = vmatpush3.bf16.msra.mxu0 %v950_v60 }
  0x39   :  { %881 = vmatpush3.bf16.msra.mxu1 %v951_v61  ;;  %860 = vmatprep.subr.bf16.mxu0 %v952_v62 }
  0x3a   :  { %882 = vmatprep.subr.bf16.mxu1 %v953_v63 }
  0x3c   :  { %861 = vmatpush3.bf16.msra.mxu0 %v954_v0 }
  0x3d   :  { %883 = vmatpush3.bf16.msra.mxu1 %v955_v1  ;;  %862 = vmatprep.subr.bf16.mxu0 %v956_v2 }
  0x3e   :  { %884 = vmatprep.subr.bf16.mxu1 %v957_v3 }
  0x40   :  { %863 = vmatpush3.bf16.msra.mxu0 %v958_v4 }
  0x41   :  { %885 = vmatpush3.bf16.msra.mxu1 %v959_v5 }
  0x43   :  { %679 = vmatmul.mubr.bf16.vlgmr.msra.gmra.mrb[4].mxu0 %v736_v7 }
  0x44   :  { %719 = vmatmul.mubr.bf16.vlgmr.msra.gmra.mrb[4].mxu1 %v738_v10 }
  0xf6   :  { %v820_v12 = vpop.f32.mrb[0].mxu0 }
  0xf7   :  { %v842_v13 = vpop.f32.mrb[0].mxu1  ;;  %v821_v15 = vpop.f32.mrb[1].mxu0 }
  0xf8   :  { %v843_v16 = vpop.f32.mrb[1].mxu1  ;;  %v822_v17 = vadd.f32 %v821_v15, %v820_v12  ;;  %v823_v19 = vpop.f32.mrb[2].mxu0 }
  0xf9   :  { %v844_v18 = vadd.f32 %v843_v16, %v842_v13  ;;  %v845_v20 = vpop.f32.mrb[2].mxu1  ;;  %v824_v21 = vpop.f32.mrb[3].mxu0 }
  0xfa   :  { %v846_v22 = vpop.f32.mrb[3].mxu1  ;;  %v601_v23 = vadd.f32 %v822_v17, %v731_v14 }
  0xfc   :  { %v641_v24 = vadd.f32 %v844_v18, %v601_v23 }
 0x116   :  { %v864_v25 = vpop.f32.mrb[4].mxu0 }
 0x117   :  { %v886_v26 = vpop.f32.mrb[4].mxu1  ;;  %v865_v27 = vpop.f32.mrb[5].mxu0 }
 0x118   :  { %v887_v28 = vpop.f32.mrb[5].mxu1  ;;  %v866_v29 = vadd.f32 %v865_v27, %v864_v25  ;;  %v867_v31 = vpop.f32.mrb[6].mxu0 }
 0x119   :  { %v888_v30 = vadd.f32 %v887_v28, %v886_v26  ;;  %v889_v32 = vpop.f32.mrb[6].mxu1  ;;  %v868_v33 = vpop.f32.mrb[7].mxu0 }
 0x11a   :  { %v890_v34 = vpop.f32.mrb[7].mxu1  ;;  %v681_v35 = vadd.f32 %v866_v29, %v641_v24 }
 0x11c   :  { %v721_v36 = vadd.f32 %v888_v30, %v681_v35 }
 0x11e   :  { %726 = vst [vmem:[%s1197_s3] sm:$0xff] %v721_v36 }

</bundles_post_ra>
